<compile_context>
chip_gen: v6e
topology: v6e:2x2x1
jax: 0.10.0
libtpu: 0.0.40
codegen_flags: <defaults>
</compile_context>

<pallas_src>
import jax
import jax.numpy as jnp
from jax.experimental import pallas as pl
from jax.experimental.pallas import tpu as pltpu


def _band_rows(oh: int, target: int = 8) -> int:
    """Largest divisor of `oh` that is <= target (keeps every output block full)."""
    t = min(oh, target)
    while oh % t:
        t -= 1
    return t


def conv2d_kernel(x_ref, w_ref, b_ref, o_ref):
    # x_ref: (H, W, C)        bf16  full input image (resident across row bands)
    # w_ref: (KH, KW, C, O)   bf16  weights, VMEM-resident (constant block index)
    # b_ref: (1, O)           f32   bias
    # o_ref: (TOH, OW, O)     f32   one band of output rows
    TOH, OW, O = o_ref.shape
    KH, KW, C, _ = w_ref.shape

    band = pl.program_id(1)
    oh0 = band * TOH

    w_all = w_ref[...]          # (KH, KW, C, O), loaded once per step
    bias = b_ref[...]           # (1, O)

    # Conv as an accumulation of KH*KW shifted matmuls over the resident image:
    # out[oh, ow, :] = sum_{kh,kw} x[oh+kh, ow+kw, :] @ W[kh, kw]  (+ bias)
    for r in range(TOH):                                   # static unroll
        acc = jnp.zeros((OW, O), jnp.float32)
        for kh in range(KH):
            row = x_ref[oh0 + r + kh]                      # (W, C), dynamic row
            for kw in range(KW):
                acc += jnp.dot(row[kw:kw + OW, :],         # (OW, C)
                               w_all[kh, kw],              # (C, O)
                               preferred_element_type=jnp.float32)
        o_ref[r] = acc + bias


def conv2d_pallas(x_nchw, weight, bias):
    """Conv2d with stride=1, no padding (PyTorch semantics).

    x_nchw: (N, C, H, W) f32.  weight: (outDim, C, KH, KW).  bias: (outDim,).
    Returns (N, outDim, OH, OW) f32.
    """
    N, C, H, W = x_nchw.shape
    outDim, Cw, KH, KW = weight.shape
    assert C == Cw
    OH, OW = H - KH + 1, W - KW + 1

    TOH = _band_rows(OH)              # output rows computed per grid step
    n_bands = OH // TOH

    # Layout glue only (single-pass transposes), bf16 operands for the kernel.
    x_nhwc = jnp.transpose(x_nchw, (0, 2, 3, 1)).astype(jnp.bfloat16)   # (N,H,W,C)
    w_k = jnp.transpose(weight, (2, 3, 1, 0)).astype(jnp.bfloat16)      # (KH,KW,C,O)
    b_k = bias.reshape(1, outDim).astype(jnp.float32)                   # (1,O)

    out_nhwc = pl.pallas_call(
        conv2d_kernel,
        out_shape=jax.ShapeDtypeStruct((N, OH, OW, outDim), jnp.float32),
        grid_spec=pltpu.PrefetchScalarGridSpec(
            num_scalar_prefetch=0,
            grid=(N, n_bands),
            in_specs=[
                # Full image per batch element, constant across the band axis
                # -> DMA'd once per image, reused for every band.
                pl.BlockSpec((None, H, W, C), lambda n, b: (n, 0, 0, 0)),
                # Weights / bias: constant block index -> fetched once, stays in VMEM.
                pl.BlockSpec((KH, KW, C, outDim), lambda n, b: (0, 0, 0, 0)),
                pl.BlockSpec((1, outDim), lambda n, b: (0, 0)),
            ],
            out_specs=pl.BlockSpec((None, TOH, OW, outDim),
                                   lambda n, b: (n, b, 0, 0)),
        ),
        compiler_params=pltpu.CompilerParams(
            dimension_semantics=("parallel", "parallel")),
    )(x_nhwc, w_k, b_k)

    return jnp.transpose(out_nhwc, (0, 3, 1, 2))            # NHWC -> NCHW


class ConvNetPallas:
    """Mirror of the PyTorch ConvNet: single Conv2d(3, outDim, 5, stride=1)."""

    def __init__(self, outDim, key):
        C_in, K = 3, 5
        kw, kb = jax.random.split(key)
        fan_in = C_in * K * K
        bound = 1.0 / (fan_in ** 0.5)
        self.weight = jax.random.uniform(
            kw, (outDim, C_in, K, K), jnp.float32, -bound, bound)
        self.bias = jax.random.uniform(
            kb, (outDim,), jnp.float32, -bound, bound)

    def __call__(self, x_nchw):
        return conv2d_pallas(x_nchw, self.weight, self.bias)


if __name__ == "__main__":
    key = jax.random.PRNGKey(0)
    k_x, k_p = jax.random.split(key)

    N, C, H, W = 2, 3, 16, 16
    outDim = 4
    x = jax.random.normal(k_x, (N, C, H, W), jnp.float32)

    net = ConvNetPallas(outDim, k_p)
    out = net(x)
    out = jax.block_until_ready(out)

    # sanity check against XLA's native conv (f32); tolerance loosened for the
    # bf16 operand cast inside the kernel (accumulation stays f32).
    ref = jax.lax.conv_general_dilated(
        x, net.weight, window_strides=(1, 1), padding="VALID",
        dimension_numbers=("NCHW", "OIHW", "NCHW"),
    ) + net.bias[None, :, None, None]
    assert out.shape == (N, outDim, H - 4, W - 4), out.shape
    assert jnp.allclose(out, ref, atol=5e-2, rtol=5e-2), float(
        jnp.max(jnp.abs(out - ref)))

    print("KERNEL_OK")
</pallas_src>

<mosaic_0001>
module attributes {stable_mosaic.version = 11 : i64} {
  func.func @conv2d_kernel(%arg0: i32, %arg1: i32, %arg2: memref<1x16x16x3xbf16, #tpu.memory_space<vmem>>, %arg3: memref<5x5x3x4xbf16, #tpu.memory_space<vmem>>, %arg4: memref<1x4xf32, #tpu.memory_space<vmem>>, %arg5: memref<1x6x12x4xf32, #tpu.memory_space<vmem>>) attributes {dimension_semantics = [#tpu.dimension_semantics<parallel>, #tpu.dimension_semantics<parallel>], iteration_bounds = array<i64: 2, 2>, scalar_prefetch = 0 : i64, scratch_operands = 0 : i64, tpu.core_type = #tpu.core_type<tc>, window_params = [{transform_indices = @transform_0, window_bounds = array<i64: 1, 16, 16, 3>}, {pipeline_mode = #tpu.pipeline_mode<synchronous>, transform_indices = @transform_1, window_bounds = array<i64: 5, 5, 3, 4>}, {pipeline_mode = #tpu.pipeline_mode<synchronous>, transform_indices = @transform_2, window_bounds = array<i64: 1, 4>}, {transform_indices = @transform_3, window_bounds = array<i64: 1, 6, 12, 4>}]} {
    %c6_i32 = arith.constant 6 : i32
    %0 = arith.muli %arg1, %c6_i32 : i32
    %c0 = arith.constant 0 : index
    %c0_0 = arith.constant 0 : index
    %c0_1 = arith.constant 0 : index
    %c0_2 = arith.constant 0 : index
    %1 = vector.load %arg3[%c0, %c0_0, %c0_1, %c0_2] : memref<5x5x3x4xbf16, #tpu.memory_space<vmem>>, vector<5x5x3x4xbf16>
    %c0_3 = arith.constant 0 : index
    %c0_4 = arith.constant 0 : index
    %2 = vector.load %arg4[%c0_3, %c0_4] : memref<1x4xf32, #tpu.memory_space<vmem>>, vector<1x4xf32>
    %cst = arith.constant 0.000000e+00 : f32
    %3 = vector.broadcast %cst : f32 to vector<12x4xf32>
    %c0_i32 = arith.constant 0 : i32
    %4 = arith.addi %0, %c0_i32 : i32
    %c0_i32_5 = arith.constant 0 : i32
    %5 = arith.addi %4, %c0_i32_5 : i32
    %c0_6 = arith.constant 0 : index
    %6 = arith.index_cast %5 : i32 to index
    %c0_7 = arith.constant 0 : index
    %c0_8 = arith.constant 0 : index
    %7 = vector.load %arg2[%c0_6, %6, %c0_7, %c0_8] : memref<1x16x16x3xbf16, #tpu.memory_space<vmem>>, vector<1x1x16x3xbf16>
    %8 = vector.shape_cast %7 : vector<1x1x16x3xbf16> to vector<16x3xbf16>
    %9 = vector.extract_strided_slice %8 {offsets = [0, 0], sizes = [12, 3], strides = [1, 1]} : vector<16x3xbf16> to vector<12x3xbf16>
    %10 = vector.extract_strided_slice %1 {offsets = [0, 0, 0, 0], sizes = [1, 1, 3, 4], strides = [1, 1, 1, 1]} : vector<5x5x3x4xbf16> to vector<1x1x3x4xbf16>
    %11 = vector.shape_cast %10 : vector<1x1x3x4xbf16> to vector<3x4xbf16>
    %cst_9 = arith.constant dense<0.000000e+00> : vector<12x4xf32>
    %12 = tpu.matmul %9, %11, %cst_9 {dimension_numbers = #tpu.dot_dimension_numbers<[1], [0], [0], [1], [0, 0, 1, 1], [], []>} : vector<12x3xbf16>, vector<3x4xbf16>, vector<12x4xf32> -> vector<12x4xf32>
    %13 = arith.addf %3, %12 : vector<12x4xf32>
    %14 = vector.extract_strided_slice %8 {offsets = [1, 0], sizes = [12, 3], strides = [1, 1]} : vector<16x3xbf16> to vector<12x3xbf16>
    %15 = vector.extract_strided_slice %1 {offsets = [0, 1, 0, 0], sizes = [1, 1, 3, 4], strides = [1, 1, 1, 1]} : vector<5x5x3x4xbf16> to vector<1x1x3x4xbf16>
    %16 = vector.shape_cast %15 : vector<1x1x3x4xbf16> to vector<3x4xbf16>
    %cst_10 = arith.constant dense<0.000000e+00> : vector<12x4xf32>
    %17 = tpu.matmul %14, %16, %cst_10 {dimension_numbers = #tpu.dot_dimension_numbers<[1], [0], [0], [1], [0, 0, 1, 1], [], []>} : vector<12x3xbf16>, vector<3x4xbf16>, vector<12x4xf32> -> vector<12x4xf32>
    %18 = arith.addf %13, %17 : vector<12x4xf32>
    %19 = vector.extract_strided_slice %8 {offsets = [2, 0], sizes = [12, 3], strides = [1, 1]} : vector<16x3xbf16> to vector<12x3xbf16>
    %20 = vector.extract_strided_slice %1 {offsets = [0, 2, 0, 0], sizes = [1, 1, 3, 4], strides = [1, 1, 1, 1]} : vector<5x5x3x4xbf16> to vector<1x1x3x4xbf16>
    %21 = vector.shape_cast %20 : vector<1x1x3x4xbf16> to vector<3x4xbf16>
    %cst_11 = arith.constant dense<0.000000e+00> : vector<12x4xf32>
    %22 = tpu.matmul %19, %21, %cst_11 {dimension_numbers = #tpu.dot_dimension_numbers<[1], [0], [0], [1], [0, 0, 1, 1], [], []>} : vector<12x3xbf16>, vector<3x4xbf16>, vector<12x4xf32> -> vector<12x4xf32>
    %23 = arith.addf %18, %22 : vector<12x4xf32>
    %24 = vector.extract_strided_slice %8 {offsets = [3, 0], sizes = [12, 3], strides = [1, 1]} : vector<16x3xbf16> to vector<12x3xbf16>
    %25 = vector.extract_strided_slice %1 {offsets = [0, 3, 0, 0], sizes = [1, 1, 3, 4], strides = [1, 1, 1, 1]} : vector<5x5x3x4xbf16> to vector<1x1x3x4xbf16>
    %26 = vector.shape_cast %25 : vector<1x1x3x4xbf16> to vector<3x4xbf16>
    %cst_12 = arith.constant dense<0.000000e+00> : vector<12x4xf32>
    %27 = tpu.matmul %24, %26, %cst_12 {dimension_numbers = #tpu.dot_dimension_numbers<[1], [0], [0], [1], [0, 0, 1, 1], [], []>} : vector<12x3xbf16>, vector<3x4xbf16>, vector<12x4xf32> -> vector<12x4xf32>
    %28 = arith.addf %23, %27 : vector<12x4xf32>
    %29 = vector.extract_strided_slice %8 {offsets = [4, 0], sizes = [12, 3], strides = [1, 1]} : vector<16x3xbf16> to vector<12x3xbf16>
    %30 = vector.extract_strided_slice %1 {offsets = [0, 4, 0, 0], sizes = [1, 1, 3, 4], strides = [1, 1, 1, 1]} : vector<5x5x3x4xbf16> to vector<1x1x3x4xbf16>
    %31 = vector.shape_cast %30 : vector<1x1x3x4xbf16> to vector<3x4xbf16>
    %cst_13 = arith.constant dense<0.000000e+00> : vector<12x4xf32>
    %32 = tpu.matmul %29, %31, %cst_13 {dimension_numbers = #tpu.dot_dimension_numbers<[1], [0], [0], [1], [0, 0, 1, 1], [], []>} : vector<12x3xbf16>, vector<3x4xbf16>, vector<12x4xf32> -> vector<12x4xf32>
    %33 = arith.addf %28, %32 : vector<12x4xf32>
    %c0_i32_14 = arith.constant 0 : i32
    %34 = arith.addi %0, %c0_i32_14 : i32
    %c1_i32 = arith.constant 1 : i32
    %35 = arith.addi %34, %c1_i32 : i32
    %c0_15 = arith.constant 0 : index
    %36 = arith.index_cast %35 : i32 to index
    %c0_16 = arith.constant 0 : index
    %c0_17 = arith.constant 0 : index
    %37 = vector.load %arg2[%c0_15, %36, %c0_16, %c0_17] : memref<1x16x16x3xbf16, #tpu.memory_space<vmem>>, vector<1x1x16x3xbf16>
    %38 = vector.shape_cast %37 : vector<1x1x16x3xbf16> to vector<16x3xbf16>
    %39 = vector.extract_strided_slice %38 {offsets = [0, 0], sizes = [12, 3], strides = [1, 1]} : vector<16x3xbf16> to vector<12x3xbf16>
    %40 = vector.extract_strided_slice %1 {offsets = [1, 0, 0, 0], sizes = [1, 1, 3, 4], strides = [1, 1, 1, 1]} : vector<5x5x3x4xbf16> to vector<1x1x3x4xbf16>
    %41 = vector.shape_cast %40 : vector<1x1x3x4xbf16> to vector<3x4xbf16>
    %cst_18 = arith.constant dense<0.000000e+00> : vector<12x4xf32>
    %42 = tpu.matmul %39, %41, %cst_18 {dimension_numbers = #tpu.dot_dimension_numbers<[1], [0], [0], [1], [0, 0, 1, 1], [], []>} : vector<12x3xbf16>, vector<3x4xbf16>, vector<12x4xf32> -> vector<12x4xf32>
    %43 = arith.addf %33, %42 : vector<12x4xf32>
    %44 = vector.extract_strided_slice %38 {offsets = [1, 0], sizes = [12, 3], strides = [1, 1]} : vector<16x3xbf16> to vector<12x3xbf16>
    %45 = vector.extract_strided_slice %1 {offsets = [1, 1, 0, 0], sizes = [1, 1, 3, 4], strides = [1, 1, 1, 1]} : vector<5x5x3x4xbf16> to vector<1x1x3x4xbf16>
    %46 = vector.shape_cast %45 : vector<1x1x3x4xbf16> to vector<3x4xbf16>
    %cst_19 = arith.constant dense<0.000000e+00> : vector<12x4xf32>
    %47 = tpu.matmul %44, %46, %cst_19 {dimension_numbers = #tpu.dot_dimension_numbers<[1], [0], [0], [1], [0, 0, 1, 1], [], []>} : vector<12x3xbf16>, vector<3x4xbf16>, vector<12x4xf32> -> vector<12x4xf32>
    %48 = arith.addf %43, %47 : vector<12x4xf32>
    %49 = vector.extract_strided_slice %38 {offsets = [2, 0], sizes = [12, 3], strides = [1, 1]} : vector<16x3xbf16> to vector<12x3xbf16>
    %50 = vector.extract_strided_slice %1 {offsets = [1, 2, 0, 0], sizes = [1, 1, 3, 4], strides = [1, 1, 1, 1]} : vector<5x5x3x4xbf16> to vector<1x1x3x4xbf16>
    %51 = vector.shape_cast %50 : vector<1x1x3x4xbf16> to vector<3x4xbf16>
    %cst_20 = arith.constant dense<0.000000e+00> : vector<12x4xf32>
    %52 = tpu.matmul %49, %51, %cst_20 {dimension_numbers = #tpu.dot_dimension_numbers<[1], [0], [0], [1], [0, 0, 1, 1], [], []>} : vector<12x3xbf16>, vector<3x4xbf16>, vector<12x4xf32> -> vector<12x4xf32>
    %53 = arith.addf %48, %52 : vector<12x4xf32>
    %54 = vector.extract_strided_slice %38 {offsets = [3, 0], sizes = [12, 3], strides = [1, 1]} : vector<16x3xbf16> to vector<12x3xbf16>
    %55 = vector.extract_strided_slice %1 {offsets = [1, 3, 0, 0], sizes = [1, 1, 3, 4], strides = [1, 1, 1, 1]} : vector<5x5x3x4xbf16> to vector<1x1x3x4xbf16>
    %56 = vector.shape_cast %55 : vector<1x1x3x4xbf16> to vector<3x4xbf16>
    %cst_21 = arith.constant dense<0.000000e+00> : vector<12x4xf32>
    %57 = tpu.matmul %54, %56, %cst_21 {dimension_numbers = #tpu.dot_dimension_numbers<[1], [0], [0], [1], [0, 0, 1, 1], [], []>} : vector<12x3xbf16>, vector<3x4xbf16>, vector<12x4xf32> -> vector<12x4xf32>
    %58 = arith.addf %53, %57 : vector<12x4xf32>
    %59 = vector.extract_strided_slice %38 {offsets = [4, 0], sizes = [12, 3], strides = [1, 1]} : vector<16x3xbf16> to vector<12x3xbf16>
    %60 = vector.extract_strided_slice %1 {offsets = [1, 4, 0, 0], sizes = [1, 1, 3, 4], strides = [1, 1, 1, 1]} : vector<5x5x3x4xbf16> to vector<1x1x3x4xbf16>
    %61 = vector.shape_cast %60 : vector<1x1x3x4xbf16> to vector<3x4xbf16>
    %cst_22 = arith.constant dense<0.000000e+00> : vector<12x4xf32>
    %62 = tpu.matmul %59, %61, %cst_22 {dimension_numbers = #tpu.dot_dimension_numbers<[1], [0], [0], [1], [0, 0, 1, 1], [], []>} : vector<12x3xbf16>, vector<3x4xbf16>, vector<12x4xf32> -> vector<12x4xf32>
    %63 = arith.addf %58, %62 : vector<12x4xf32>
    %c0_i32_23 = arith.constant 0 : i32
    %64 = arith.addi %0, %c0_i32_23 : i32
    %c2_i32 = arith.constant 2 : i32
    %65 = arith.addi %64, %c2_i32 : i32
    %c0_24 = arith.constant 0 : index
    %66 = arith.index_cast %65 : i32 to index
    %c0_25 = arith.constant 0 : index
    %c0_26 = arith.constant 0 : index
    %67 = vector.load %arg2[%c0_24, %66, %c0_25, %c0_26] : memref<1x16x16x3xbf16, #tpu.memory_space<vmem>>, vector<1x1x16x3xbf16>
    %68 = vector.shape_cast %67 : vector<1x1x16x3xbf16> to vector<16x3xbf16>
    %69 = vector.extract_strided_slice %68 {offsets = [0, 0], sizes = [12, 3], strides = [1, 1]} : vector<16x3xbf16> to vector<12x3xbf16>
    %70 = vector.extract_strided_slice %1 {offsets = [2, 0, 0, 0], sizes = [1, 1, 3, 4], strides = [1, 1, 1, 1]} : vector<5x5x3x4xbf16> to vector<1x1x3x4xbf16>
    %71 = vector.shape_cast %70 : vector<1x1x3x4xbf16> to vector<3x4xbf16>
    %cst_27 = arith.constant dense<0.000000e+00> : vector<12x4xf32>
    %72 = tpu.matmul %69, %71, %cst_27 {dimension_numbers = #tpu.dot_dimension_numbers<[1], [0], [0], [1], [0, 0, 1, 1], [], []>} : vector<12x3xbf16>, vector<3x4xbf16>, vector<12x4xf32> -> vector<12x4xf32>
    %73 = arith.addf %63, %72 : vector<12x4xf32>
    %74 = vector.extract_strided_slice %68 {offsets = [1, 0], sizes = [12, 3], strides = [1, 1]} : vector<16x3xbf16> to vector<12x3xbf16>
    %75 = vector.extract_strided_slice %1 {offsets = [2, 1, 0, 0], sizes = [1, 1, 3, 4], strides = [1, 1, 1, 1]} : vector<5x5x3x4xbf16> to vector<1x1x3x4xbf16>
    %76 = vector.shape_cast %75 : vector<1x1x3x4xbf16> to vector<3x4xbf16>
    %cst_28 = arith.constant dense<0.000000e+00> : vector<12x4xf32>
    %77 = tpu.matmul %74, %76, %cst_28 {dimension_numbers = #tpu.dot_dimension_numbers<[1], [0], [0], [1], [0, 0, 1, 1], [], []>} : vector<12x3xbf16>, vector<3x4xbf16>, vector<12x4xf32> -> vector<12x4xf32>
    %78 = arith.addf %73, %77 : vector<12x4xf32>
    %79 = vector.extract_strided_slice %68 {offsets = [2, 0], sizes = [12, 3], strides = [1, 1]} : vector<16x3xbf16> to vector<12x3xbf16>
    %80 = vector.extract_strided_slice %1 {offsets = [2, 2, 0, 0], sizes = [1, 1, 3, 4], strides = [1, 1, 1, 1]} : vector<5x5x3x4xbf16> to vector<1x1x3x4xbf16>
    %81 = vector.shape_cast %80 : vector<1x1x3x4xbf16> to vector<3x4xbf16>
    %cst_29 = arith.constant dense<0.000000e+00> : vector<12x4xf32>
    %82 = tpu.matmul %79, %81, %cst_29 {dimension_numbers = #tpu.dot_dimension_numbers<[1], [0], [0], [1], [0, 0, 1, 1], [], []>} : vector<12x3xbf16>, vector<3x4xbf16>, vector<12x4xf32> -> vector<12x4xf32>
    %83 = arith.addf %78, %82 : vector<12x4xf32>
    %84 = vector.extract_strided_slice %68 {offsets = [3, 0], sizes = [12, 3], strides = [1, 1]} : vector<16x3xbf16> to vector<12x3xbf16>
    %85 = vector.extract_strided_slice %1 {offsets = [2, 3, 0, 0], sizes = [1, 1, 3, 4], strides = [1, 1, 1, 1]} : vector<5x5x3x4xbf16> to vector<1x1x3x4xbf16>
    %86 = vector.shape_cast %85 : vector<1x1x3x4xbf16> to vector<3x4xbf16>
    %cst_30 = arith.constant dense<0.000000e+00> : vector<12x4xf32>
    %87 = tpu.matmul %84, %86, %cst_30 {dimension_numbers = #tpu.dot_dimension_numbers<[1], [0], [0], [1], [0, 0, 1, 1], [], []>} : vector<12x3xbf16>, vector<3x4xbf16>, vector<12x4xf32> -> vector<12x4xf32>
    %88 = arith.addf %83, %87 : vector<12x4xf32>
    %89 = vector.extract_strided_slice %68 {offsets = [4, 0], sizes = [12, 3], strides = [1, 1]} : vector<16x3xbf16> to vector<12x3xbf16>
    %90 = vector.extract_strided_slice %1 {offsets = [2, 4, 0, 0], sizes = [1, 1, 3, 4], strides = [1, 1, 1, 1]} : vector<5x5x3x4xbf16> to vector<1x1x3x4xbf16>
    %91 = vector.shape_cast %90 : vector<1x1x3x4xbf16> to vector<3x4xbf16>
    %cst_31 = arith.constant dense<0.000000e+00> : vector<12x4xf32>
    %92 = tpu.matmul %89, %91, %cst_31 {dimension_numbers = #tpu.dot_dimension_numbers<[1], [0], [0], [1], [0, 0, 1, 1], [], []>} : vector<12x3xbf16>, vector<3x4xbf16>, vector<12x4xf32> -> vector<12x4xf32>
    %93 = arith.addf %88, %92 : vector<12x4xf32>
    %c0_i32_32 = arith.constant 0 : i32
    %94 = arith.addi %0, %c0_i32_32 : i32
    %c3_i32 = arith.constant 3 : i32
    %95 = arith.addi %94, %c3_i32 : i32
    %c0_33 = arith.constant 0 : index
    %96 = arith.index_cast %95 : i32 to index
    %c0_34 = arith.constant 0 : index
    %c0_35 = arith.constant 0 : index
    %97 = vector.load %arg2[%c0_33, %96, %c0_34, %c0_35] : memref<1x16x16x3xbf16, #tpu.memory_space<vmem>>, vector<1x1x16x3xbf16>
    %98 = vector.shape_cast %97 : vector<1x1x16x3xbf16> to vector<16x3xbf16>
    %99 = vector.extract_strided_slice %98 {offsets = [0, 0], sizes = [12, 3], strides = [1, 1]} : vector<16x3xbf16> to vector<12x3xbf16>
    %100 = vector.extract_strided_slice %1 {offsets = [3, 0, 0, 0], sizes = [1, 1, 3, 4], strides = [1, 1, 1, 1]} : vector<5x5x3x4xbf16> to vector<1x1x3x4xbf16>
    %101 = vector.shape_cast %100 : vector<1x1x3x4xbf16> to vector<3x4xbf16>
    %cst_36 = arith.constant dense<0.000000e+00> : vector<12x4xf32>
    %102 = tpu.matmul %99, %101, %cst_36 {dimension_numbers = #tpu.dot_dimension_numbers<[1], [0], [0], [1], [0, 0, 1, 1], [], []>} : vector<12x3xbf16>, vector<3x4xbf16>, vector<12x4xf32> -> vector<12x4xf32>
    %103 = arith.addf %93, %102 : vector<12x4xf32>
    %104 = vector.extract_strided_slice %98 {offsets = [1, 0], sizes = [12, 3], strides = [1, 1]} : vector<16x3xbf16> to vector<12x3xbf16>
    %105 = vector.extract_strided_slice %1 {offsets = [3, 1, 0, 0], sizes = [1, 1, 3, 4], strides = [1, 1, 1, 1]} : vector<5x5x3x4xbf16> to vector<1x1x3x4xbf16>
    %106 = vector.shape_cast %105 : vector<1x1x3x4xbf16> to vector<3x4xbf16>
    %cst_37 = arith.constant dense<0.000000e+00> : vector<12x4xf32>
    %107 = tpu.matmul %104, %106, %cst_37 {dimension_numbers = #tpu.dot_dimension_numbers<[1], [0], [0], [1], [0, 0, 1, 1], [], []>} : vector<12x3xbf16>, vector<3x4xbf16>, vector<12x4xf32> -> vector<12x4xf32>
    %108 = arith.addf %103, %107 : vector<12x4xf32>
    %109 = vector.extract_strided_slice %98 {offsets = [2, 0], sizes = [12, 3], strides = [1, 1]} : vector<16x3xbf16> to vector<12x3xbf16>
    %110 = vector.extract_strided_slice %1 {offsets = [3, 2, 0, 0], sizes = [1, 1, 3, 4], strides = [1, 1, 1, 1]} : vector<5x5x3x4xbf16> to vector<1x1x3x4xbf16>
    %111 = vector.shape_cast %110 : vector<1x1x3x4xbf16> to vector<3x4xbf16>
    %cst_38 = arith.constant dense<0.000000e+00> : vector<12x4xf32>
    %112 = tpu.matmul %109, %111, %cst_38 {dimension_numbers = #tpu.dot_dimension_numbers<[1], [0], [0], [1], [0, 0, 1, 1], [], []>} : vector<12x3xbf16>, vector<3x4xbf16>, vector<12x4xf32> -> vector<12x4xf32>
    %113 = arith.addf %108, %112 : vector<12x4xf32>
    %114 = vector.extract_strided_slice %98 {offsets = [3, 0], sizes = [12, 3], strides = [1, 1]} : vector<16x3xbf16> to vector<12x3xbf16>
    %115 = vector.extract_strided_slice %1 {offsets = [3, 3, 0, 0], sizes = [1, 1, 3, 4], strides = [1, 1, 1, 1]} : vector<5x5x3x4xbf16> to vector<1x1x3x4xbf16>
    %116 = vector.shape_cast %115 : vector<1x1x3x4xbf16> to vector<3x4xbf16>
    %cst_39 = arith.constant dense<0.000000e+00> : vector<12x4xf32>
    %117 = tpu.matmul %114, %116, %cst_39 {dimension_numbers = #tpu.dot_dimension_numbers<[1], [0], [0], [1], [0, 0, 1, 1], [], []>} : vector<12x3xbf16>, vector<3x4xbf16>, vector<12x4xf32> -> vector<12x4xf32>
    %118 = arith.addf %113, %117 : vector<12x4xf32>
    %119 = vector.extract_strided_slice %98 {offsets = [4, 0], sizes = [12, 3], strides = [1, 1]} : vector<16x3xbf16> to vector<12x3xbf16>
    %120 = vector.extract_strided_slice %1 {offsets = [3, 4, 0, 0], sizes = [1, 1, 3, 4], strides = [1, 1, 1, 1]} : vector<5x5x3x4xbf16> to vector<1x1x3x4xbf16>
    %121 = vector.shape_cast %120 : vector<1x1x3x4xbf16> to vector<3x4xbf16>
    %cst_40 = arith.constant dense<0.000000e+00> : vector<12x4xf32>
    %122 = tpu.matmul %119, %121, %cst_40 {dimension_numbers = #tpu.dot_dimension_numbers<[1], [0], [0], [1], [0, 0, 1, 1], [], []>} : vector<12x3xbf16>, vector<3x4xbf16>, vector<12x4xf32> -> vector<12x4xf32>
    %123 = arith.addf %118, %122 : vector<12x4xf32>
    %c0_i32_41 = arith.constant 0 : i32
    %124 = arith.addi %0, %c0_i32_41 : i32
    %c4_i32 = arith.constant 4 : i32
    %125 = arith.addi %124, %c4_i32 : i32
    %c0_42 = arith.constant 0 : index
    %126 = arith.index_cast %125 : i32 to index
    %c0_43 = arith.constant 0 : index
    %c0_44 = arith.constant 0 : index
    %127 = vector.load %arg2[%c0_42, %126, %c0_43, %c0_44] : memref<1x16x16x3xbf16, #tpu.memory_space<vmem>>, vector<1x1x16x3xbf16>
    %128 = vector.shape_cast %127 : vector<1x1x16x3xbf16> to vector<16x3xbf16>
    %129 = vector.extract_strided_slice %128 {offsets = [0, 0], sizes = [12, 3], strides = [1, 1]} : vector<16x3xbf16> to vector<12x3xbf16>
    %130 = vector.extract_strided_slice %1 {offsets = [4, 0, 0, 0], sizes = [1, 1, 3, 4], strides = [1, 1, 1, 1]} : vector<5x5x3x4xbf16> to vector<1x1x3x4xbf16>
    %131 = vector.shape_cast %130 : vector<1x1x3x4xbf16> to vector<3x4xbf16>
    %cst_45 = arith.constant dense<0.000000e+00> : vector<12x4xf32>
    %132 = tpu.matmul %129, %131, %cst_45 {dimension_numbers = #tpu.dot_dimension_numbers<[1], [0], [0], [1], [0, 0, 1, 1], [], []>} : vector<12x3xbf16>, vector<3x4xbf16>, vector<12x4xf32> -> vector<12x4xf32>
    %133 = arith.addf %123, %132 : vector<12x4xf32>
    %134 = vector.extract_strided_slice %128 {offsets = [1, 0], sizes = [12, 3], strides = [1, 1]} : vector<16x3xbf16> to vector<12x3xbf16>
    %135 = vector.extract_strided_slice %1 {offsets = [4, 1, 0, 0], sizes = [1, 1, 3, 4], strides = [1, 1, 1, 1]} : vector<5x5x3x4xbf16> to vector<1x1x3x4xbf16>
    %136 = vector.shape_cast %135 : vector<1x1x3x4xbf16> to vector<3x4xbf16>
    %cst_46 = arith.constant dense<0.000000e+00> : vector<12x4xf32>
    %137 = tpu.matmul %134, %136, %cst_46 {dimension_numbers = #tpu.dot_dimension_numbers<[1], [0], [0], [1], [0, 0, 1, 1], [], []>} : vector<12x3xbf16>, vector<3x4xbf16>, vector<12x4xf32> -> vector<12x4xf32>
    %138 = arith.addf %133, %137 : vector<12x4xf32>
    %139 = vector.extract_strided_slice %128 {offsets = [2, 0], sizes = [12, 3], strides = [1, 1]} : vector<16x3xbf16> to vector<12x3xbf16>
    %140 = vector.extract_strided_slice %1 {offsets = [4, 2, 0, 0], sizes = [1, 1, 3, 4], strides = [1, 1, 1, 1]} : vector<5x5x3x4xbf16> to vector<1x1x3x4xbf16>
    %141 = vector.shape_cast %140 : vector<1x1x3x4xbf16> to vector<3x4xbf16>
    %cst_47 = arith.constant dense<0.000000e+00> : vector<12x4xf32>
    %142 = tpu.matmul %139, %141, %cst_47 {dimension_numbers = #tpu.dot_dimension_numbers<[1], [0], [0], [1], [0, 0, 1, 1], [], []>} : vector<12x3xbf16>, vector<3x4xbf16>, vector<12x4xf32> -> vector<12x4xf32>
    %143 = arith.addf %138, %142 : vector<12x4xf32>
    %144 = vector.extract_strided_slice %128 {offsets = [3, 0], sizes = [12, 3], strides = [1, 1]} : vector<16x3xbf16> to vector<12x3xbf16>
    %145 = vector.extract_strided_slice %1 {offsets = [4, 3, 0, 0], sizes = [1, 1, 3, 4], strides = [1, 1, 1, 1]} : vector<5x5x3x4xbf16> to vector<1x1x3x4xbf16>
    %146 = vector.shape_cast %145 : vector<1x1x3x4xbf16> to vector<3x4xbf16>
    %cst_48 = arith.constant dense<0.000000e+00> : vector<12x4xf32>
    %147 = tpu.matmul %144, %146, %cst_48 {dimension_numbers = #tpu.dot_dimension_numbers<[1], [0], [0], [1], [0, 0, 1, 1], [], []>} : vector<12x3xbf16>, vector<3x4xbf16>, vector<12x4xf32> -> vector<12x4xf32>
    %148 = arith.addf %143, %147 : vector<12x4xf32>
    %149 = vector.extract_strided_slice %128 {offsets = [4, 0], sizes = [12, 3], strides = [1, 1]} : vector<16x3xbf16> to vector<12x3xbf16>
    %150 = vector.extract_strided_slice %1 {offsets = [4, 4, 0, 0], sizes = [1, 1, 3, 4], strides = [1, 1, 1, 1]} : vector<5x5x3x4xbf16> to vector<1x1x3x4xbf16>
    %151 = vector.shape_cast %150 : vector<1x1x3x4xbf16> to vector<3x4xbf16>
    %cst_49 = arith.constant dense<0.000000e+00> : vector<12x4xf32>
    %152 = tpu.matmul %149, %151, %cst_49 {dimension_numbers = #tpu.dot_dimension_numbers<[1], [0], [0], [1], [0, 0, 1, 1], [], []>} : vector<12x3xbf16>, vector<3x4xbf16>, vector<12x4xf32> -> vector<12x4xf32>
    %153 = arith.addf %148, %152 : vector<12x4xf32>
    %154 = vector.broadcast %2 : vector<1x4xf32> to vector<12x4xf32>
    %155 = arith.addf %153, %154 : vector<12x4xf32>
    %c0_50 = arith.constant 0 : index
    %c0_51 = arith.constant 0 : index
    %c0_52 = arith.constant 0 : index
    %c0_53 = arith.constant 0 : index
    %156 = vector.load %arg5[%c0_50, %c0_51, %c0_52, %c0_53] : memref<1x6x12x4xf32, #tpu.memory_space<vmem>>, vector<1x1x12x4xf32>
    %157 = vector.shape_cast %156 : vector<1x1x12x4xf32> to vector<12x4xf32>
    %158 = vector.shape_cast %155 : vector<12x4xf32> to vector<1x1x12x4xf32>
    tpu.vector_store %arg5[%c0_50, %c0_51, %c0_52, %c0_53], %158 {strides = array<i32>} : memref<1x6x12x4xf32, #tpu.memory_space<vmem>>, vector<1x1x12x4xf32>,
    %cst_54 = arith.constant 0.000000e+00 : f32
    %159 = vector.broadcast %cst_54 : f32 to vector<12x4xf32>
    %c1_i32_55 = arith.constant 1 : i32
    %160 = arith.addi %0, %c1_i32_55 : i32
    %c0_i32_56 = arith.constant 0 : i32
    %161 = arith.addi %160, %c0_i32_56 : i32
    %c0_57 = arith.constant 0 : index
    %162 = arith.index_cast %161 : i32 to index
    %c0_58 = arith.constant 0 : index
    %c0_59 = arith.constant 0 : index
    %163 = vector.load %arg2[%c0_57, %162, %c0_58, %c0_59] : memref<1x16x16x3xbf16, #tpu.memory_space<vmem>>, vector<1x1x16x3xbf16>
    %164 = vector.shape_cast %163 : vector<1x1x16x3xbf16> to vector<16x3xbf16>
    %165 = vector.extract_strided_slice %164 {offsets = [0, 0], sizes = [12, 3], strides = [1, 1]} : vector<16x3xbf16> to vector<12x3xbf16>
    %166 = vector.extract_strided_slice %1 {offsets = [0, 0, 0, 0], sizes = [1, 1, 3, 4], strides = [1, 1, 1, 1]} : vector<5x5x3x4xbf16> to vector<1x1x3x4xbf16>
    %167 = vector.shape_cast %166 : vector<1x1x3x4xbf16> to vector<3x4xbf16>
    %cst_60 = arith.constant dense<0.000000e+00> : vector<12x4xf32>
    %168 = tpu.matmul %165, %167, %cst_60 {dimension_numbers = #tpu.dot_dimension_numbers<[1], [0], [0], [1], [0, 0, 1, 1], [], []>} : vector<12x3xbf16>, vector<3x4xbf16>, vector<12x4xf32> -> vector<12x4xf32>
    %169 = arith.addf %159, %168 : vector<12x4xf32>
    %170 = vector.extract_strided_slice %164 {offsets = [1, 0], sizes = [12, 3], strides = [1, 1]} : vector<16x3xbf16> to vector<12x3xbf16>
    %171 = vector.extract_strided_slice %1 {offsets = [0, 1, 0, 0], sizes = [1, 1, 3, 4], strides = [1, 1, 1, 1]} : vector<5x5x3x4xbf16> to vector<1x1x3x4xbf16>
    %172 = vector.shape_cast %171 : vector<1x1x3x4xbf16> to vector<3x4xbf16>
    %cst_61 = arith.constant dense<0.000000e+00> : vector<12x4xf32>
    %173 = tpu.matmul %170, %172, %cst_61 {dimension_numbers = #tpu.dot_dimension_numbers<[1], [0], [0], [1], [0, 0, 1, 1], [], []>} : vector<12x3xbf16>, vector<3x4xbf16>, vector<12x4xf32> -> vector<12x4xf32>
    %174 = arith.addf %169, %173 : vector<12x4xf32>
    %175 = vector.extract_strided_slice %164 {offsets = [2, 0], sizes = [12, 3], strides = [1, 1]} : vector<16x3xbf16> to vector<12x3xbf16>
    %176 = vector.extract_strided_slice %1 {offsets = [0, 2, 0, 0], sizes = [1, 1, 3, 4], strides = [1, 1, 1, 1]} : vector<5x5x3x4xbf16> to vector<1x1x3x4xbf16>
    %177 = vector.shape_cast %176 : vector<1x1x3x4xbf16> to vector<3x4xbf16>
    %cst_62 = arith.constant dense<0.000000e+00> : vector<12x4xf32>
    %178 = tpu.matmul %175, %177, %cst_62 {dimension_numbers = #tpu.dot_dimension_numbers<[1], [0], [0], [1], [0, 0, 1, 1], [], []>} : vector<12x3xbf16>, vector<3x4xbf16>, vector<12x4xf32> -> vector<12x4xf32>
    %179 = arith.addf %174, %178 : vector<12x4xf32>
    %180 = vector.extract_strided_slice %164 {offsets = [3, 0], sizes = [12, 3], strides = [1, 1]} : vector<16x3xbf16> to vector<12x3xbf16>
    %181 = vector.extract_strided_slice %1 {offsets = [0, 3, 0, 0], sizes = [1, 1, 3, 4], strides = [1, 1, 1, 1]} : vector<5x5x3x4xbf16> to vector<1x1x3x4xbf16>
    %182 = vector.shape_cast %181 : vector<1x1x3x4xbf16> to vector<3x4xbf16>
    %cst_63 = arith.constant dense<0.000000e+00> : vector<12x4xf32>
    %183 = tpu.matmul %180, %182, %cst_63 {dimension_numbers = #tpu.dot_dimension_numbers<[1], [0], [0], [1], [0, 0, 1, 1], [], []>} : vector<12x3xbf16>, vector<3x4xbf16>, vector<12x4xf32> -> vector<12x4xf32>
    %184 = arith.addf %179, %183 : vector<12x4xf32>
    %185 = vector.extract_strided_slice %164 {offsets = [4, 0], sizes = [12, 3], strides = [1, 1]} : vector<16x3xbf16> to vector<12x3xbf16>
    %186 = vector.extract_strided_slice %1 {offsets = [0, 4, 0, 0], sizes = [1, 1, 3, 4], strides = [1, 1, 1, 1]} : vector<5x5x3x4xbf16> to vector<1x1x3x4xbf16>
    %187 = vector.shape_cast %186 : vector<1x1x3x4xbf16> to vector<3x4xbf16>
    %cst_64 = arith.constant dense<0.000000e+00> : vector<12x4xf32>
    %188 = tpu.matmul %185, %187, %cst_64 {dimension_numbers = #tpu.dot_dimension_numbers<[1], [0], [0], [1], [0, 0, 1, 1], [], []>} : vector<12x3xbf16>, vector<3x4xbf16>, vector<12x4xf32> -> vector<12x4xf32>
    %189 = arith.addf %184, %188 : vector<12x4xf32>
    %c1_i32_65 = arith.constant 1 : i32
    %190 = arith.addi %0, %c1_i32_65 : i32
    %c1_i32_66 = arith.constant 1 : i32
    %191 = arith.addi %190, %c1_i32_66 : i32
    %c0_67 = arith.constant 0 : index
    %192 = arith.index_cast %191 : i32 to index
    %c0_68 = arith.constant 0 : index
    %c0_69 = arith.constant 0 : index
    %193 = vector.load %arg2[%c0_67, %192, %c0_68, %c0_69] : memref<1x16x16x3xbf16, #tpu.memory_space<vmem>>, vector<1x1x16x3xbf16>
    %194 = vector.shape_cast %193 : vector<1x1x16x3xbf16> to vector<16x3xbf16>
    %195 = vector.extract_strided_slice %194 {offsets = [0, 0], sizes = [12, 3], strides = [1, 1]} : vector<16x3xbf16> to vector<12x3xbf16>
    %196 = vector.extract_strided_slice %1 {offsets = [1, 0, 0, 0], sizes = [1, 1, 3, 4], strides = [1, 1, 1, 1]} : vector<5x5x3x4xbf16> to vector<1x1x3x4xbf16>
    %197 = vector.shape_cast %196 : vector<1x1x3x4xbf16> to vector<3x4xbf16>
    %cst_70 = arith.constant dense<0.000000e+00> : vector<12x4xf32>
    %198 = tpu.matmul %195, %197, %cst_70 {dimension_numbers = #tpu.dot_dimension_numbers<[1], [0], [0], [1], [0, 0, 1, 1], [], []>} : vector<12x3xbf16>, vector<3x4xbf16>, vector<12x4xf32> -> vector<12x4xf32>
    %199 = arith.addf %189, %198 : vector<12x4xf32>
    %200 = vector.extract_strided_slice %194 {offsets = [1, 0], sizes = [12, 3], strides = [1, 1]} : vector<16x3xbf16> to vector<12x3xbf16>
    %201 = vector.extract_strided_slice %1 {offsets = [1, 1, 0, 0], sizes = [1, 1, 3, 4], strides = [1, 1, 1, 1]} : vector<5x5x3x4xbf16> to vector<1x1x3x4xbf16>
    %202 = vector.shape_cast %201 : vector<1x1x3x4xbf16> to vector<3x4xbf16>
    %cst_71 = arith.constant dense<0.000000e+00> : vector<12x4xf32>
    %203 = tpu.matmul %200, %202, %cst_71 {dimension_numbers = #tpu.dot_dimension_numbers<[1], [0], [0], [1], [0, 0, 1, 1], [], []>} : vector<12x3xbf16>, vector<3x4xbf16>, vector<12x4xf32> -> vector<12x4xf32>
    %204 = arith.addf %199, %203 : vector<12x4xf32>
    %205 = vector.extract_strided_slice %194 {offsets = [2, 0], sizes = [12, 3], strides = [1, 1]} : vector<16x3xbf16> to vector<12x3xbf16>
    %206 = vector.extract_strided_slice %1 {offsets = [1, 2, 0, 0], sizes = [1, 1, 3, 4], strides = [1, 1, 1, 1]} : vector<5x5x3x4xbf16> to vector<1x1x3x4xbf16>
    %207 = vector.shape_cast %206 : vector<1x1x3x4xbf16> to vector<3x4xbf16>
    %cst_72 = arith.constant dense<0.000000e+00> : vector<12x4xf32>
    %208 = tpu.matmul %205, %207, %cst_72 {dimension_numbers = #tpu.dot_dimension_numbers<[1], [0], [0], [1], [0, 0, 1, 1], [], []>} : vector<12x3xbf16>, vector<3x4xbf16>, vector<12x4xf32> -> vector<12x4xf32>
    %209 = arith.addf %204, %208 : vector<12x4xf32>
    %210 = vector.extract_strided_slice %194 {offsets = [3, 0], sizes = [12, 3], strides = [1, 1]} : vector<16x3xbf16> to vector<12x3xbf16>
    %211 = vector.extract_strided_slice %1 {offsets = [1, 3, 0, 0], sizes = [1, 1, 3, 4], strides = [1, 1, 1, 1]} : vector<5x5x3x4xbf16> to vector<1x1x3x4xbf16>
    %212 = vector.shape_cast %211 : vector<1x1x3x4xbf16> to vector<3x4xbf16>
    %cst_73 = arith.constant dense<0.000000e+00> : vector<12x4xf32>
    %213 = tpu.matmul %210, %212, %cst_73 {dimension_numbers = #tpu.dot_dimension_numbers<[1], [0], [0], [1], [0, 0, 1, 1], [], []>} : vector<12x3xbf16>, vector<3x4xbf16>, vector<12x4xf32> -> vector<12x4xf32>
    %214 = arith.addf %209, %213 : vector<12x4xf32>
    %215 = vector.extract_strided_slice %194 {offsets = [4, 0], sizes = [12, 3], strides = [1, 1]} : vector<16x3xbf16> to vector<12x3xbf16>
    %216 = vector.extract_strided_slice %1 {offsets = [1, 4, 0, 0], sizes = [1, 1, 3, 4], strides = [1, 1, 1, 1]} : vector<5x5x3x4xbf16> to vector<1x1x3x4xbf16>
    %217 = vector.shape_cast %216 : vector<1x1x3x4xbf16> to vector<3x4xbf16>
    %cst_74 = arith.constant dense<0.000000e+00> : vector<12x4xf32>
    %218 = tpu.matmul %215, %217, %cst_74 {dimension_numbers = #tpu.dot_dimension_numbers<[1], [0], [0], [1], [0, 0, 1, 1], [], []>} : vector<12x3xbf16>, vector<3x4xbf16>, vector<12x4xf32> -> vector<12x4xf32>
    %219 = arith.addf %214, %218 : vector<12x4xf32>
    %c1_i32_75 = arith.constant 1 : i32
    %220 = arith.addi %0, %c1_i32_75 : i32
    %c2_i32_76 = arith.constant 2 : i32
    %221 = arith.addi %220, %c2_i32_76 : i32
    %c0_77 = arith.constant 0 : index
    %222 = arith.index_cast %221 : i32 to index
    %c0_78 = arith.constant 0 : index
    %c0_79 = arith.constant 0 : index
    %223 = vector.load %arg2[%c0_77, %222, %c0_78, %c0_79] : memref<1x16x16x3xbf16, #tpu.memory_space<vmem>>, vector<1x1x16x3xbf16>
    %224 = vector.shape_cast %223 : vector<1x1x16x3xbf16> to vector<16x3xbf16>
    %225 = vector.extract_strided_slice %224 {offsets = [0, 0], sizes = [12, 3], strides = [1, 1]} : vector<16x3xbf16> to vector<12x3xbf16>
    %226 = vector.extract_strided_slice %1 {offsets = [2, 0, 0, 0], sizes = [1, 1, 3, 4], strides = [1, 1, 1, 1]} : vector<5x5x3x4xbf16> to vector<1x1x3x4xbf16>
    %227 = vector.shape_cast %226 : vector<1x1x3x4xbf16> to vector<3x4xbf16>
    %cst_80 = arith.constant dense<0.000000e+00> : vector<12x4xf32>
    %228 = tpu.matmul %225, %227, %cst_80 {dimension_numbers = #tpu.dot_dimension_numbers<[1], [0], [0], [1], [0, 0, 1, 1], [], []>} : vector<12x3xbf16>, vector<3x4xbf16>, vector<12x4xf32> -> vector<12x4xf32>
    %229 = arith.addf %219, %228 : vector<12x4xf32>
    %230 = vector.extract_strided_slice %224 {offsets = [1, 0], sizes = [12, 3], strides = [1, 1]} : vector<16x3xbf16> to vector<12x3xbf16>
    %231 = vector.extract_strided_slice %1 {offsets = [2, 1, 0, 0], sizes = [1, 1, 3, 4], strides = [1, 1, 1, 1]} : vector<5x5x3x4xbf16> to vector<1x1x3x4xbf16>
    %232 = vector.shape_cast %231 : vector<1x1x3x4xbf16> to vector<3x4xbf16>
    %cst_81 = arith.constant dense<0.000000e+00> : vector<12x4xf32>
    %233 = tpu.matmul %230, %232, %cst_81 {dimension_numbers = #tpu.dot_dimension_numbers<[1], [0], [0], [1], [0, 0, 1, 1], [], []>} : vector<12x3xbf16>, vector<3x4xbf16>, vector<12x4xf32> -> vector<12x4xf32>
    %234 = arith.addf %229, %233 : vector<12x4xf32>
    %235 = vector.extract_strided_slice %224 {offsets = [2, 0], sizes = [12, 3], strides = [1, 1]} : vector<16x3xbf16> to vector<12x3xbf16>
    %236 = vector.extract_strided_slice %1 {offsets = [2, 2, 0, 0], sizes = [1, 1, 3, 4], strides = [1, 1, 1, 1]} : vector<5x5x3x4xbf16> to vector<1x1x3x4xbf16>
    %237 = vector.shape_cast %236 : vector<1x1x3x4xbf16> to vector<3x4xbf16>
    %cst_82 = arith.constant dense<0.000000e+00> : vector<12x4xf32>
    %238 = tpu.matmul %235, %237, %cst_82 {dimension_numbers = #tpu.dot_dimension_numbers<[1], [0], [0], [1], [0, 0, 1, 1], [], []>} : vector<12x3xbf16>, vector<3x4xbf16>, vector<12x4xf32> -> vector<12x4xf32>
    %239 = arith.addf %234, %238 : vector<12x4xf32>
    %240 = vector.extract_strided_slice %224 {offsets = [3, 0], sizes = [12, 3], strides = [1, 1]} : vector<16x3xbf16> to vector<12x3xbf16>
    %241 = vector.extract_strided_slice %1 {offsets = [2, 3, 0, 0], sizes = [1, 1, 3, 4], strides = [1, 1, 1, 1]} : vector<5x5x3x4xbf16> to vector<1x1x3x4xbf16>
    %242 = vector.shape_cast %241 : vector<1x1x3x4xbf16> to vector<3x4xbf16>
    %cst_83 = arith.constant dense<0.000000e+00> : vector<12x4xf32>
    %243 = tpu.matmul %240, %242, %cst_83 {dimension_numbers = #tpu.dot_dimension_numbers<[1], [0], [0], [1], [0, 0, 1, 1], [], []>} : vector<12x3xbf16>, vector<3x4xbf16>, vector<12x4xf32> -> vector<12x4xf32>
    %244 = arith.addf %239, %243 : vector<12x4xf32>
    %245 = vector.extract_strided_slice %224 {offsets = [4, 0], sizes = [12, 3], strides = [1, 1]} : vector<16x3xbf16> to vector<12x3xbf16>
    %246 = vector.extract_strided_slice %1 {offsets = [2, 4, 0, 0], sizes = [1, 1, 3, 4], strides = [1, 1, 1, 1]} : vector<5x5x3x4xbf16> to vector<1x1x3x4xbf16>
    %247 = vector.shape_cast %246 : vector<1x1x3x4xbf16> to vector<3x4xbf16>
    %cst_84 = arith.constant dense<0.000000e+00> : vector<12x4xf32>
    %248 = tpu.matmul %245, %247, %cst_84 {dimension_numbers = #tpu.dot_dimension_numbers<[1], [0], [0], [1], [0, 0, 1, 1], [], []>} : vector<12x3xbf16>, vector<3x4xbf16>, vector<12x4xf32> -> vector<12x4xf32>
    %249 = arith.addf %244, %248 : vector<12x4xf32>
    %c1_i32_85 = arith.constant 1 : i32
    %250 = arith.addi %0, %c1_i32_85 : i32
    %c3_i32_86 = arith.constant 3 : i32
    %251 = arith.addi %250, %c3_i32_86 : i32
    %c0_87 = arith.constant 0 : index
    %252 = arith.index_cast %251 : i32 to index
    %c0_88 = arith.constant 0 : index
    %c0_89 = arith.constant 0 : index
    %253 = vector.load %arg2[%c0_87, %252, %c0_88, %c0_89] : memref<1x16x16x3xbf16, #tpu.memory_space<vmem>>, vector<1x1x16x3xbf16>
    %254 = vector.shape_cast %253 : vector<1x1x16x3xbf16> to vector<16x3xbf16>
    %255 = vector.extract_strided_slice %254 {offsets = [0, 0], sizes = [12, 3], strides = [1, 1]} : vector<16x3xbf16> to vector<12x3xbf16>
    %256 = vector.extract_strided_slice %1 {offsets = [3, 0, 0, 0], sizes = [1, 1, 3, 4], strides = [1, 1, 1, 1]} : vector<5x5x3x4xbf16> to vector<1x1x3x4xbf16>
    %257 = vector.shape_cast %256 : vector<1x1x3x4xbf16> to vector<3x4xbf16>
    %cst_90 = arith.constant dense<0.000000e+00> : vector<12x4xf32>
    %258 = tpu.matmul %255, %257, %cst_90 {dimension_numbers = #tpu.dot_dimension_numbers<[1], [0], [0], [1], [0, 0, 1, 1], [], []>} : vector<12x3xbf16>, vector<3x4xbf16>, vector<12x4xf32> -> vector<12x4xf32>
    %259 = arith.addf %249, %258 : vector<12x4xf32>
    %260 = vector.extract_strided_slice %254 {offsets = [1, 0], sizes = [12, 3], strides = [1, 1]} : vector<16x3xbf16> to vector<12x3xbf16>
    %261 = vector.extract_strided_slice %1 {offsets = [3, 1, 0, 0], sizes = [1, 1, 3, 4], strides = [1, 1, 1, 1]} : vector<5x5x3x4xbf16> to vector<1x1x3x4xbf16>
    %262 = vector.shape_cast %261 : vector<1x1x3x4xbf16> to vector<3x4xbf16>
    %cst_91 = arith.constant dense<0.000000e+00> : vector<12x4xf32>
    %263 = tpu.matmul %260, %262, %cst_91 {dimension_numbers = #tpu.dot_dimension_numbers<[1], [0], [0], [1], [0, 0, 1, 1], [], []>} : vector<12x3xbf16>, vector<3x4xbf16>, vector<12x4xf32> -> vector<12x4xf32>
    %264 = arith.addf %259, %263 : vector<12x4xf32>
    %265 = vector.extract_strided_slice %254 {offsets = [2, 0], sizes = [12, 3], strides = [1, 1]} : vector<16x3xbf16> to vector<12x3xbf16>
    %266 = vector.extract_strided_slice %1 {offsets = [3, 2, 0, 0], sizes = [1, 1, 3, 4], strides = [1, 1, 1, 1]} : vector<5x5x3x4xbf16> to vector<1x1x3x4xbf16>
    %267 = vector.shape_cast %266 : vector<1x1x3x4xbf16> to vector<3x4xbf16>
    %cst_92 = arith.constant dense<0.000000e+00> : vector<12x4xf32>
    %268 = tpu.matmul %265, %267, %cst_92 {dimension_numbers = #tpu.dot_dimension_numbers<[1], [0], [0], [1], [0, 0, 1, 1], [], []>} : vector<12x3xbf16>, vector<3x4xbf16>, vector<12x4xf32> -> vector<12x4xf32>
    %269 = arith.addf %264, %268 : vector<12x4xf32>
    %270 = vector.extract_strided_slice %254 {offsets = [3, 0], sizes = [12, 3], strides = [1, 1]} : vector<16x3xbf16> to vector<12x3xbf16>
    %271 = vector.extract_strided_slice %1 {offsets = [3, 3, 0, 0], sizes = [1, 1, 3, 4], strides = [1, 1, 1, 1]} : vector<5x5x3x4xbf16> to vector<1x1x3x4xbf16>
    %272 = vector.shape_cast %271 : vector<1x1x3x4xbf16> to vector<3x4xbf16>
    %cst_93 = arith.constant dense<0.000000e+00> : vector<12x4xf32>
    %273 = tpu.matmul %270, %272, %cst_93 {dimension_numbers = #tpu.dot_dimension_numbers<[1], [0], [0], [1], [0, 0, 1, 1], [], []>} : vector<12x3xbf16>, vector<3x4xbf16>, vector<12x4xf32> -> vector<12x4xf32>
    %274 = arith.addf %269, %273 : vector<12x4xf32>
    %275 = vector.extract_strided_slice %254 {offsets = [4, 0], sizes = [12, 3], strides = [1, 1]} : vector<16x3xbf16> to vector<12x3xbf16>
    %276 = vector.extract_strided_slice %1 {offsets = [3, 4, 0, 0], sizes = [1, 1, 3, 4], strides = [1, 1, 1, 1]} : vector<5x5x3x4xbf16> to vector<1x1x3x4xbf16>
    %277 = vector.shape_cast %276 : vector<1x1x3x4xbf16> to vector<3x4xbf16>
    %cst_94 = arith.constant dense<0.000000e+00> : vector<12x4xf32>
    %278 = tpu.matmul %275, %277, %cst_94 {dimension_numbers = #tpu.dot_dimension_numbers<[1], [0], [0], [1], [0, 0, 1, 1], [], []>} : vector<12x3xbf16>, vector<3x4xbf16>, vector<12x4xf32> -> vector<12x4xf32>
    %279 = arith.addf %274, %278 : vector<12x4xf32>
    %c1_i32_95 = arith.constant 1 : i32
    %280 = arith.addi %0, %c1_i32_95 : i32
    %c4_i32_96 = arith.constant 4 : i32
    %281 = arith.addi %280, %c4_i32_96 : i32
    %c0_97 = arith.constant 0 : index
    %282 = arith.index_cast %281 : i32 to index
    %c0_98 = arith.constant 0 : index
    %c0_99 = arith.constant 0 : index
    %283 = vector.load %arg2[%c0_97, %282, %c0_98, %c0_99] : memref<1x16x16x3xbf16, #tpu.memory_space<vmem>>, vector<1x1x16x3xbf16>
    %284 = vector.shape_cast %283 : vector<1x1x16x3xbf16> to vector<16x3xbf16>
    %285 = vector.extract_strided_slice %284 {offsets = [0, 0], sizes = [12, 3], strides = [1, 1]} : vector<16x3xbf16> to vector<12x3xbf16>
    %286 = vector.extract_strided_slice %1 {offsets = [4, 0, 0, 0], sizes = [1, 1, 3, 4], strides = [1, 1, 1, 1]} : vector<5x5x3x4xbf16> to vector<1x1x3x4xbf16>
    %287 = vector.shape_cast %286 : vector<1x1x3x4xbf16> to vector<3x4xbf16>
    %cst_100 = arith.constant dense<0.000000e+00> : vector<12x4xf32>
    %288 = tpu.matmul %285, %287, %cst_100 {dimension_numbers = #tpu.dot_dimension_numbers<[1], [0], [0], [1], [0, 0, 1, 1], [], []>} : vector<12x3xbf16>, vector<3x4xbf16>, vector<12x4xf32> -> vector<12x4xf32>
    %289 = arith.addf %279, %288 : vector<12x4xf32>
    %290 = vector.extract_strided_slice %284 {offsets = [1, 0], sizes = [12, 3], strides = [1, 1]} : vector<16x3xbf16> to vector<12x3xbf16>
    %291 = vector.extract_strided_slice %1 {offsets = [4, 1, 0, 0], sizes = [1, 1, 3, 4], strides = [1, 1, 1, 1]} : vector<5x5x3x4xbf16> to vector<1x1x3x4xbf16>
    %292 = vector.shape_cast %291 : vector<1x1x3x4xbf16> to vector<3x4xbf16>
    %cst_101 = arith.constant dense<0.000000e+00> : vector<12x4xf32>
    %293 = tpu.matmul %290, %292, %cst_101 {dimension_numbers = #tpu.dot_dimension_numbers<[1], [0], [0], [1], [0, 0, 1, 1], [], []>} : vector<12x3xbf16>, vector<3x4xbf16>, vector<12x4xf32> -> vector<12x4xf32>
    %294 = arith.addf %289, %293 : vector<12x4xf32>
    %295 = vector.extract_strided_slice %284 {offsets = [2, 0], sizes = [12, 3], strides = [1, 1]} : vector<16x3xbf16> to vector<12x3xbf16>
    %296 = vector.extract_strided_slice %1 {offsets = [4, 2, 0, 0], sizes = [1, 1, 3, 4], strides = [1, 1, 1, 1]} : vector<5x5x3x4xbf16> to vector<1x1x3x4xbf16>
    %297 = vector.shape_cast %296 : vector<1x1x3x4xbf16> to vector<3x4xbf16>
    %cst_102 = arith.constant dense<0.000000e+00> : vector<12x4xf32>
    %298 = tpu.matmul %295, %297, %cst_102 {dimension_numbers = #tpu.dot_dimension_numbers<[1], [0], [0], [1], [0, 0, 1, 1], [], []>} : vector<12x3xbf16>, vector<3x4xbf16>, vector<12x4xf32> -> vector<12x4xf32>
    %299 = arith.addf %294, %298 : vector<12x4xf32>
    %300 = vector.extract_strided_slice %284 {offsets = [3, 0], sizes = [12, 3], strides = [1, 1]} : vector<16x3xbf16> to vector<12x3xbf16>
    %301 = vector.extract_strided_slice %1 {offsets = [4, 3, 0, 0], sizes = [1, 1, 3, 4], strides = [1, 1, 1, 1]} : vector<5x5x3x4xbf16> to vector<1x1x3x4xbf16>
    %302 = vector.shape_cast %301 : vector<1x1x3x4xbf16> to vector<3x4xbf16>
    %cst_103 = arith.constant dense<0.000000e+00> : vector<12x4xf32>
    %303 = tpu.matmul %300, %302, %cst_103 {dimension_numbers = #tpu.dot_dimension_numbers<[1], [0], [0], [1], [0, 0, 1, 1], [], []>} : vector<12x3xbf16>, vector<3x4xbf16>, vector<12x4xf32> -> vector<12x4xf32>
    %304 = arith.addf %299, %303 : vector<12x4xf32>
    %305 = vector.extract_strided_slice %284 {offsets = [4, 0], sizes = [12, 3], strides = [1, 1]} : vector<16x3xbf16> to vector<12x3xbf16>
    %306 = vector.extract_strided_slice %1 {offsets = [4, 4, 0, 0], sizes = [1, 1, 3, 4], strides = [1, 1, 1, 1]} : vector<5x5x3x4xbf16> to vector<1x1x3x4xbf16>
    %307 = vector.shape_cast %306 : vector<1x1x3x4xbf16> to vector<3x4xbf16>
    %cst_104 = arith.constant dense<0.000000e+00> : vector<12x4xf32>
    %308 = tpu.matmul %305, %307, %cst_104 {dimension_numbers = #tpu.dot_dimension_numbers<[1], [0], [0], [1], [0, 0, 1, 1], [], []>} : vector<12x3xbf16>, vector<3x4xbf16>, vector<12x4xf32> -> vector<12x4xf32>
    %309 = arith.addf %304, %308 : vector<12x4xf32>
    %310 = vector.broadcast %2 : vector<1x4xf32> to vector<12x4xf32>
    %311 = arith.addf %309, %310 : vector<12x4xf32>
    %c0_105 = arith.constant 0 : index
    %c1 = arith.constant 1 : index
    %c0_106 = arith.constant 0 : index
    %c0_107 = arith.constant 0 : index
    %312 = vector.load %arg5[%c0_105, %c1, %c0_106, %c0_107] : memref<1x6x12x4xf32, #tpu.memory_space<vmem>>, vector<1x1x12x4xf32>
    %313 = vector.shape_cast %312 : vector<1x1x12x4xf32> to vector<12x4xf32>
    %314 = vector.shape_cast %311 : vector<12x4xf32> to vector<1x1x12x4xf32>
    tpu.vector_store %arg5[%c0_105, %c1, %c0_106, %c0_107], %314 {strides = array<i32>} : memref<1x6x12x4xf32, #tpu.memory_space<vmem>>, vector<1x1x12x4xf32>,
    %cst_108 = arith.constant 0.000000e+00 : f32
    %315 = vector.broadcast %cst_108 : f32 to vector<12x4xf32>
    %c2_i32_109 = arith.constant 2 : i32
    %316 = arith.addi %0, %c2_i32_109 : i32
    %c0_i32_110 = arith.constant 0 : i32
    %317 = arith.addi %316, %c0_i32_110 : i32
    %c0_111 = arith.constant 0 : index
    %318 = arith.index_cast %317 : i32 to index
    %c0_112 = arith.constant 0 : index
    %c0_113 = arith.constant 0 : index
    %319 = vector.load %arg2[%c0_111, %318, %c0_112, %c0_113] : memref<1x16x16x3xbf16, #tpu.memory_space<vmem>>, vector<1x1x16x3xbf16>
    %320 = vector.shape_cast %319 : vector<1x1x16x3xbf16> to vector<16x3xbf16>
    %321 = vector.extract_strided_slice %320 {offsets = [0, 0], sizes = [12, 3], strides = [1, 1]} : vector<16x3xbf16> to vector<12x3xbf16>
    %322 = vector.extract_strided_slice %1 {offsets = [0, 0, 0, 0], sizes = [1, 1, 3, 4], strides = [1, 1, 1, 1]} : vector<5x5x3x4xbf16> to vector<1x1x3x4xbf16>
    %323 = vector.shape_cast %322 : vector<1x1x3x4xbf16> to vector<3x4xbf16>
    %cst_114 = arith.constant dense<0.000000e+00> : vector<12x4xf32>
    %324 = tpu.matmul %321, %323, %cst_114 {dimension_numbers = #tpu.dot_dimension_numbers<[1], [0], [0], [1], [0, 0, 1, 1], [], []>} : vector<12x3xbf16>, vector<3x4xbf16>, vector<12x4xf32> -> vector<12x4xf32>
    %325 = arith.addf %315, %324 : vector<12x4xf32>
    %326 = vector.extract_strided_slice %320 {offsets = [1, 0], sizes = [12, 3], strides = [1, 1]} : vector<16x3xbf16> to vector<12x3xbf16>
    %327 = vector.extract_strided_slice %1 {offsets = [0, 1, 0, 0], sizes = [1, 1, 3, 4], strides = [1, 1, 1, 1]} : vector<5x5x3x4xbf16> to vector<1x1x3x4xbf16>
    %328 = vector.shape_cast %327 : vector<1x1x3x4xbf16> to vector<3x4xbf16>
    %cst_115 = arith.constant dense<0.000000e+00> : vector<12x4xf32>
    %329 = tpu.matmul %326, %328, %cst_115 {dimension_numbers = #tpu.dot_dimension_numbers<[1], [0], [0], [1], [0, 0, 1, 1], [], []>} : vector<12x3xbf16>, vector<3x4xbf16>, vector<12x4xf32> -> vector<12x4xf32>
    %330 = arith.addf %325, %329 : vector<12x4xf32>
    %331 = vector.extract_strided_slice %320 {offsets = [2, 0], sizes = [12, 3], strides = [1, 1]} : vector<16x3xbf16> to vector<12x3xbf16>
    %332 = vector.extract_strided_slice %1 {offsets = [0, 2, 0, 0], sizes = [1, 1, 3, 4], strides = [1, 1, 1, 1]} : vector<5x5x3x4xbf16> to vector<1x1x3x4xbf16>
    %333 = vector.shape_cast %332 : vector<1x1x3x4xbf16> to vector<3x4xbf16>
    %cst_116 = arith.constant dense<0.000000e+00> : vector<12x4xf32>
    %334 = tpu.matmul %331, %333, %cst_116 {dimension_numbers = #tpu.dot_dimension_numbers<[1], [0], [0], [1], [0, 0, 1, 1], [], []>} : vector<12x3xbf16>, vector<3x4xbf16>, vector<12x4xf32> -> vector<12x4xf32>
    %335 = arith.addf %330, %334 : vector<12x4xf32>
    %336 = vector.extract_strided_slice %320 {offsets = [3, 0], sizes = [12, 3], strides = [1, 1]} : vector<16x3xbf16> to vector<12x3xbf16>
    %337 = vector.extract_strided_slice %1 {offsets = [0, 3, 0, 0], sizes = [1, 1, 3, 4], strides = [1, 1, 1, 1]} : vector<5x5x3x4xbf16> to vector<1x1x3x4xbf16>
    %338 = vector.shape_cast %337 : vector<1x1x3x4xbf16> to vector<3x4xbf16>
    %cst_117 = arith.constant dense<0.000000e+00> : vector<12x4xf32>
    %339 = tpu.matmul %336, %338, %cst_117 {dimension_numbers = #tpu.dot_dimension_numbers<[1], [0], [0], [1], [0, 0, 1, 1], [], []>} : vector<12x3xbf16>, vector<3x4xbf16>, vector<12x4xf32> -> vector<12x4xf32>
    %340 = arith.addf %335, %339 : vector<12x4xf32>
    %341 = vector.extract_strided_slice %320 {offsets = [4, 0], sizes = [12, 3], strides = [1, 1]} : vector<16x3xbf16> to vector<12x3xbf16>
    %342 = vector.extract_strided_slice %1 {offsets = [0, 4, 0, 0], sizes = [1, 1, 3, 4], strides = [1, 1, 1, 1]} : vector<5x5x3x4xbf16> to vector<1x1x3x4xbf16>
    %343 = vector.shape_cast %342 : vector<1x1x3x4xbf16> to vector<3x4xbf16>
    %cst_118 = arith.constant dense<0.000000e+00> : vector<12x4xf32>
    %344 = tpu.matmul %341, %343, %cst_118 {dimension_numbers = #tpu.dot_dimension_numbers<[1], [0], [0], [1], [0, 0, 1, 1], [], []>} : vector<12x3xbf16>, vector<3x4xbf16>, vector<12x4xf32> -> vector<12x4xf32>
    %345 = arith.addf %340, %344 : vector<12x4xf32>
    %c2_i32_119 = arith.constant 2 : i32
    %346 = arith.addi %0, %c2_i32_119 : i32
    %c1_i32_120 = arith.constant 1 : i32
    %347 = arith.addi %346, %c1_i32_120 : i32
    %c0_121 = arith.constant 0 : index
    %348 = arith.index_cast %347 : i32 to index
    %c0_122 = arith.constant 0 : index
    %c0_123 = arith.constant 0 : index
    %349 = vector.load %arg2[%c0_121, %348, %c0_122, %c0_123] : memref<1x16x16x3xbf16, #tpu.memory_space<vmem>>, vector<1x1x16x3xbf16>
    %350 = vector.shape_cast %349 : vector<1x1x16x3xbf16> to vector<16x3xbf16>
    %351 = vector.extract_strided_slice %350 {offsets = [0, 0], sizes = [12, 3], strides = [1, 1]} : vector<16x3xbf16> to vector<12x3xbf16>
    %352 = vector.extract_strided_slice %1 {offsets = [1, 0, 0, 0], sizes = [1, 1, 3, 4], strides = [1, 1, 1, 1]} : vector<5x5x3x4xbf16> to vector<1x1x3x4xbf16>
    %353 = vector.shape_cast %352 : vector<1x1x3x4xbf16> to vector<3x4xbf16>
    %cst_124 = arith.constant dense<0.000000e+00> : vector<12x4xf32>
    %354 = tpu.matmul %351, %353, %cst_124 {dimension_numbers = #tpu.dot_dimension_numbers<[1], [0], [0], [1], [0, 0, 1, 1], [], []>} : vector<12x3xbf16>, vector<3x4xbf16>, vector<12x4xf32> -> vector<12x4xf32>
    %355 = arith.addf %345, %354 : vector<12x4xf32>
    %356 = vector.extract_strided_slice %350 {offsets = [1, 0], sizes = [12, 3], strides = [1, 1]} : vector<16x3xbf16> to vector<12x3xbf16>
    %357 = vector.extract_strided_slice %1 {offsets = [1, 1, 0, 0], sizes = [1, 1, 3, 4], strides = [1, 1, 1, 1]} : vector<5x5x3x4xbf16> to vector<1x1x3x4xbf16>
    %358 = vector.shape_cast %357 : vector<1x1x3x4xbf16> to vector<3x4xbf16>
    %cst_125 = arith.constant dense<0.000000e+00> : vector<12x4xf32>
    %359 = tpu.matmul %356, %358, %cst_125 {dimension_numbers = #tpu.dot_dimension_numbers<[1], [0], [0], [1], [0, 0, 1, 1], [], []>} : vector<12x3xbf16>, vector<3x4xbf16>, vector<12x4xf32> -> vector<12x4xf32>
    %360 = arith.addf %355, %359 : vector<12x4xf32>
    %361 = vector.extract_strided_slice %350 {offsets = [2, 0], sizes = [12, 3], strides = [1, 1]} : vector<16x3xbf16> to vector<12x3xbf16>
    %362 = vector.extract_strided_slice %1 {offsets = [1, 2, 0, 0], sizes = [1, 1, 3, 4], strides = [1, 1, 1, 1]} : vector<5x5x3x4xbf16> to vector<1x1x3x4xbf16>
    %363 = vector.shape_cast %362 : vector<1x1x3x4xbf16> to vector<3x4xbf16>
    %cst_126 = arith.constant dense<0.000000e+00> : vector<12x4xf32>
    %364 = tpu.matmul %361, %363, %cst_126 {dimension_numbers = #tpu.dot_dimension_numbers<[1], [0], [0], [1], [0, 0, 1, 1], [], []>} : vector<12x3xbf16>, vector<3x4xbf16>, vector<12x4xf32> -> vector<12x4xf32>
    %365 = arith.addf %360, %364 : vector<12x4xf32>
    %366 = vector.extract_strided_slice %350 {offsets = [3, 0], sizes = [12, 3], strides = [1, 1]} : vector<16x3xbf16> to vector<12x3xbf16>
    %367 = vector.extract_strided_slice %1 {offsets = [1, 3, 0, 0], sizes = [1, 1, 3, 4], strides = [1, 1, 1, 1]} : vector<5x5x3x4xbf16> to vector<1x1x3x4xbf16>
    %368 = vector.shape_cast %367 : vector<1x1x3x4xbf16> to vector<3x4xbf16>
    %cst_127 = arith.constant dense<0.000000e+00> : vector<12x4xf32>
    %369 = tpu.matmul %366, %368, %cst_127 {dimension_numbers = #tpu.dot_dimension_numbers<[1], [0], [0], [1], [0, 0, 1, 1], [], []>} : vector<12x3xbf16>, vector<3x4xbf16>, vector<12x4xf32> -> vector<12x4xf32>
    %370 = arith.addf %365, %369 : vector<12x4xf32>
    %371 = vector.extract_strided_slice %350 {offsets = [4, 0], sizes = [12, 3], strides = [1, 1]} : vector<16x3xbf16> to vector<12x3xbf16>
    %372 = vector.extract_strided_slice %1 {offsets = [1, 4, 0, 0], sizes = [1, 1, 3, 4], strides = [1, 1, 1, 1]} : vector<5x5x3x4xbf16> to vector<1x1x3x4xbf16>
    %373 = vector.shape_cast %372 : vector<1x1x3x4xbf16> to vector<3x4xbf16>
    %cst_128 = arith.constant dense<0.000000e+00> : vector<12x4xf32>
    %374 = tpu.matmul %371, %373, %cst_128 {dimension_numbers = #tpu.dot_dimension_numbers<[1], [0], [0], [1], [0, 0, 1, 1], [], []>} : vector<12x3xbf16>, vector<3x4xbf16>, vector<12x4xf32> -> vector<12x4xf32>
    %375 = arith.addf %370, %374 : vector<12x4xf32>
    %c2_i32_129 = arith.constant 2 : i32
    %376 = arith.addi %0, %c2_i32_129 : i32
    %c2_i32_130 = arith.constant 2 : i32
    %377 = arith.addi %376, %c2_i32_130 : i32
    %c0_131 = arith.constant 0 : index
    %378 = arith.index_cast %377 : i32 to index
    %c0_132 = arith.constant 0 : index
    %c0_133 = arith.constant 0 : index
    %379 = vector.load %arg2[%c0_131, %378, %c0_132, %c0_133] : memref<1x16x16x3xbf16, #tpu.memory_space<vmem>>, vector<1x1x16x3xbf16>
    %380 = vector.shape_cast %379 : vector<1x1x16x3xbf16> to vector<16x3xbf16>
    %381 = vector.extract_strided_slice %380 {offsets = [0, 0], sizes = [12, 3], strides = [1, 1]} : vector<16x3xbf16> to vector<12x3xbf16>
    %382 = vector.extract_strided_slice %1 {offsets = [2, 0, 0, 0], sizes = [1, 1, 3, 4], strides = [1, 1, 1, 1]} : vector<5x5x3x4xbf16> to vector<1x1x3x4xbf16>
    %383 = vector.shape_cast %382 : vector<1x1x3x4xbf16> to vector<3x4xbf16>
    %cst_134 = arith.constant dense<0.000000e+00> : vector<12x4xf32>
    %384 = tpu.matmul %381, %383, %cst_134 {dimension_numbers = #tpu.dot_dimension_numbers<[1], [0], [0], [1], [0, 0, 1, 1], [], []>} : vector<12x3xbf16>, vector<3x4xbf16>, vector<12x4xf32> -> vector<12x4xf32>
    %385 = arith.addf %375, %384 : vector<12x4xf32>
    %386 = vector.extract_strided_slice %380 {offsets = [1, 0], sizes = [12, 3], strides = [1, 1]} : vector<16x3xbf16> to vector<12x3xbf16>
    %387 = vector.extract_strided_slice %1 {offsets = [2, 1, 0, 0], sizes = [1, 1, 3, 4], strides = [1, 1, 1, 1]} : vector<5x5x3x4xbf16> to vector<1x1x3x4xbf16>
    %388 = vector.shape_cast %387 : vector<1x1x3x4xbf16> to vector<3x4xbf16>
    %cst_135 = arith.constant dense<0.000000e+00> : vector<12x4xf32>
    %389 = tpu.matmul %386, %388, %cst_135 {dimension_numbers = #tpu.dot_dimension_numbers<[1], [0], [0], [1], [0, 0, 1, 1], [], []>} : vector<12x3xbf16>, vector<3x4xbf16>, vector<12x4xf32> -> vector<12x4xf32>
    %390 = arith.addf %385, %389 : vector<12x4xf32>
    %391 = vector.extract_strided_slice %380 {offsets = [2, 0], sizes = [12, 3], strides = [1, 1]} : vector<16x3xbf16> to vector<12x3xbf16>
    %392 = vector.extract_strided_slice %1 {offsets = [2, 2, 0, 0], sizes = [1, 1, 3, 4], strides = [1, 1, 1, 1]} : vector<5x5x3x4xbf16> to vector<1x1x3x4xbf16>
    %393 = vector.shape_cast %392 : vector<1x1x3x4xbf16> to vector<3x4xbf16>
    %cst_136 = arith.constant dense<0.000000e+00> : vector<12x4xf32>
    %394 = tpu.matmul %391, %393, %cst_136 {dimension_numbers = #tpu.dot_dimension_numbers<[1], [0], [0], [1], [0, 0, 1, 1], [], []>} : vector<12x3xbf16>, vector<3x4xbf16>, vector<12x4xf32> -> vector<12x4xf32>
    %395 = arith.addf %390, %394 : vector<12x4xf32>
    %396 = vector.extract_strided_slice %380 {offsets = [3, 0], sizes = [12, 3], strides = [1, 1]} : vector<16x3xbf16> to vector<12x3xbf16>
    %397 = vector.extract_strided_slice %1 {offsets = [2, 3, 0, 0], sizes = [1, 1, 3, 4], strides = [1, 1, 1, 1]} : vector<5x5x3x4xbf16> to vector<1x1x3x4xbf16>
    %398 = vector.shape_cast %397 : vector<1x1x3x4xbf16> to vector<3x4xbf16>
    %cst_137 = arith.constant dense<0.000000e+00> : vector<12x4xf32>
    %399 = tpu.matmul %396, %398, %cst_137 {dimension_numbers = #tpu.dot_dimension_numbers<[1], [0], [0], [1], [0, 0, 1, 1], [], []>} : vector<12x3xbf16>, vector<3x4xbf16>, vector<12x4xf32> -> vector<12x4xf32>
    %400 = arith.addf %395, %399 : vector<12x4xf32>
    %401 = vector.extract_strided_slice %380 {offsets = [4, 0], sizes = [12, 3], strides = [1, 1]} : vector<16x3xbf16> to vector<12x3xbf16>
    %402 = vector.extract_strided_slice %1 {offsets = [2, 4, 0, 0], sizes = [1, 1, 3, 4], strides = [1, 1, 1, 1]} : vector<5x5x3x4xbf16> to vector<1x1x3x4xbf16>
    %403 = vector.shape_cast %402 : vector<1x1x3x4xbf16> to vector<3x4xbf16>
    %cst_138 = arith.constant dense<0.000000e+00> : vector<12x4xf32>
    %404 = tpu.matmul %401, %403, %cst_138 {dimension_numbers = #tpu.dot_dimension_numbers<[1], [0], [0], [1], [0, 0, 1, 1], [], []>} : vector<12x3xbf16>, vector<3x4xbf16>, vector<12x4xf32> -> vector<12x4xf32>
    %405 = arith.addf %400, %404 : vector<12x4xf32>
    %c2_i32_139 = arith.constant 2 : i32
    %406 = arith.addi %0, %c2_i32_139 : i32
    %c3_i32_140 = arith.constant 3 : i32
    %407 = arith.addi %406, %c3_i32_140 : i32
    %c0_141 = arith.constant 0 : index
    %408 = arith.index_cast %407 : i32 to index
    %c0_142 = arith.constant 0 : index
    %c0_143 = arith.constant 0 : index
    %409 = vector.load %arg2[%c0_141, %408, %c0_142, %c0_143] : memref<1x16x16x3xbf16, #tpu.memory_space<vmem>>, vector<1x1x16x3xbf16>
    %410 = vector.shape_cast %409 : vector<1x1x16x3xbf16> to vector<16x3xbf16>
    %411 = vector.extract_strided_slice %410 {offsets = [0, 0], sizes = [12, 3], strides = [1, 1]} : vector<16x3xbf16> to vector<12x3xbf16>
    %412 = vector.extract_strided_slice %1 {offsets = [3, 0, 0, 0], sizes = [1, 1, 3, 4], strides = [1, 1, 1, 1]} : vector<5x5x3x4xbf16> to vector<1x1x3x4xbf16>
    %413 = vector.shape_cast %412 : vector<1x1x3x4xbf16> to vector<3x4xbf16>
    %cst_144 = arith.constant dense<0.000000e+00> : vector<12x4xf32>
    %414 = tpu.matmul %411, %413, %cst_144 {dimension_numbers = #tpu.dot_dimension_numbers<[1], [0], [0], [1], [0, 0, 1, 1], [], []>} : vector<12x3xbf16>, vector<3x4xbf16>, vector<12x4xf32> -> vector<12x4xf32>
    %415 = arith.addf %405, %414 : vector<12x4xf32>
    %416 = vector.extract_strided_slice %410 {offsets = [1, 0], sizes = [12, 3], strides = [1, 1]} : vector<16x3xbf16> to vector<12x3xbf16>
    %417 = vector.extract_strided_slice %1 {offsets = [3, 1, 0, 0], sizes = [1, 1, 3, 4], strides = [1, 1, 1, 1]} : vector<5x5x3x4xbf16> to vector<1x1x3x4xbf16>
    %418 = vector.shape_cast %417 : vector<1x1x3x4xbf16> to vector<3x4xbf16>
    %cst_145 = arith.constant dense<0.000000e+00> : vector<12x4xf32>
    %419 = tpu.matmul %416, %418, %cst_145 {dimension_numbers = #tpu.dot_dimension_numbers<[1], [0], [0], [1], [0, 0, 1, 1], [], []>} : vector<12x3xbf16>, vector<3x4xbf16>, vector<12x4xf32> -> vector<12x4xf32>
    %420 = arith.addf %415, %419 : vector<12x4xf32>
    %421 = vector.extract_strided_slice %410 {offsets = [2, 0], sizes = [12, 3], strides = [1, 1]} : vector<16x3xbf16> to vector<12x3xbf16>
    %422 = vector.extract_strided_slice %1 {offsets = [3, 2, 0, 0], sizes = [1, 1, 3, 4], strides = [1, 1, 1, 1]} : vector<5x5x3x4xbf16> to vector<1x1x3x4xbf16>
    %423 = vector.shape_cast %422 : vector<1x1x3x4xbf16> to vector<3x4xbf16>
    %cst_146 = arith.constant dense<0.000000e+00> : vector<12x4xf32>
    %424 = tpu.matmul %421, %423, %cst_146 {dimension_numbers = #tpu.dot_dimension_numbers<[1], [0], [0], [1], [0, 0, 1, 1], [], []>} : vector<12x3xbf16>, vector<3x4xbf16>, vector<12x4xf32> -> vector<12x4xf32>
    %425 = arith.addf %420, %424 : vector<12x4xf32>
    %426 = vector.extract_strided_slice %410 {offsets = [3, 0], sizes = [12, 3], strides = [1, 1]} : vector<16x3xbf16> to vector<12x3xbf16>
    %427 = vector.extract_strided_slice %1 {offsets = [3, 3, 0, 0], sizes = [1, 1, 3, 4], strides = [1, 1, 1, 1]} : vector<5x5x3x4xbf16> to vector<1x1x3x4xbf16>
    %428 = vector.shape_cast %427 : vector<1x1x3x4xbf16> to vector<3x4xbf16>
    %cst_147 = arith.constant dense<0.000000e+00> : vector<12x4xf32>
    %429 = tpu.matmul %426, %428, %cst_147 {dimension_numbers = #tpu.dot_dimension_numbers<[1], [0], [0], [1], [0, 0, 1, 1], [], []>} : vector<12x3xbf16>, vector<3x4xbf16>, vector<12x4xf32> -> vector<12x4xf32>
    %430 = arith.addf %425, %429 : vector<12x4xf32>
    %431 = vector.extract_strided_slice %410 {offsets = [4, 0], sizes = [12, 3], strides = [1, 1]} : vector<16x3xbf16> to vector<12x3xbf16>
    %432 = vector.extract_strided_slice %1 {offsets = [3, 4, 0, 0], sizes = [1, 1, 3, 4], strides = [1, 1, 1, 1]} : vector<5x5x3x4xbf16> to vector<1x1x3x4xbf16>
    %433 = vector.shape_cast %432 : vector<1x1x3x4xbf16> to vector<3x4xbf16>
    %cst_148 = arith.constant dense<0.000000e+00> : vector<12x4xf32>
    %434 = tpu.matmul %431, %433, %cst_148 {dimension_numbers = #tpu.dot_dimension_numbers<[1], [0], [0], [1], [0, 0, 1, 1], [], []>} : vector<12x3xbf16>, vector<3x4xbf16>, vector<12x4xf32> -> vector<12x4xf32>
    %435 = arith.addf %430, %434 : vector<12x4xf32>
    %c2_i32_149 = arith.constant 2 : i32
    %436 = arith.addi %0, %c2_i32_149 : i32
    %c4_i32_150 = arith.constant 4 : i32
    %437 = arith.addi %436, %c4_i32_150 : i32
    %c0_151 = arith.constant 0 : index
    %438 = arith.index_cast %437 : i32 to index
    %c0_152 = arith.constant 0 : index
    %c0_153 = arith.constant 0 : index
    %439 = vector.load %arg2[%c0_151, %438, %c0_152, %c0_153] : memref<1x16x16x3xbf16, #tpu.memory_space<vmem>>, vector<1x1x16x3xbf16>
    %440 = vector.shape_cast %439 : vector<1x1x16x3xbf16> to vector<16x3xbf16>
    %441 = vector.extract_strided_slice %440 {offsets = [0, 0], sizes = [12, 3], strides = [1, 1]} : vector<16x3xbf16> to vector<12x3xbf16>
    %442 = vector.extract_strided_slice %1 {offsets = [4, 0, 0, 0], sizes = [1, 1, 3, 4], strides = [1, 1, 1, 1]} : vector<5x5x3x4xbf16> to vector<1x1x3x4xbf16>
    %443 = vector.shape_cast %442 : vector<1x1x3x4xbf16> to vector<3x4xbf16>
    %cst_154 = arith.constant dense<0.000000e+00> : vector<12x4xf32>
    %444 = tpu.matmul %441, %443, %cst_154 {dimension_numbers = #tpu.dot_dimension_numbers<[1], [0], [0], [1], [0, 0, 1, 1], [], []>} : vector<12x3xbf16>, vector<3x4xbf16>, vector<12x4xf32> -> vector<12x4xf32>
    %445 = arith.addf %435, %444 : vector<12x4xf32>
    %446 = vector.extract_strided_slice %440 {offsets = [1, 0], sizes = [12, 3], strides = [1, 1]} : vector<16x3xbf16> to vector<12x3xbf16>
    %447 = vector.extract_strided_slice %1 {offsets = [4, 1, 0, 0], sizes = [1, 1, 3, 4], strides = [1, 1, 1, 1]} : vector<5x5x3x4xbf16> to vector<1x1x3x4xbf16>
    %448 = vector.shape_cast %447 : vector<1x1x3x4xbf16> to vector<3x4xbf16>
    %cst_155 = arith.constant dense<0.000000e+00> : vector<12x4xf32>
    %449 = tpu.matmul %446, %448, %cst_155 {dimension_numbers = #tpu.dot_dimension_numbers<[1], [0], [0], [1], [0, 0, 1, 1], [], []>} : vector<12x3xbf16>, vector<3x4xbf16>, vector<12x4xf32> -> vector<12x4xf32>
    %450 = arith.addf %445, %449 : vector<12x4xf32>
    %451 = vector.extract_strided_slice %440 {offsets = [2, 0], sizes = [12, 3], strides = [1, 1]} : vector<16x3xbf16> to vector<12x3xbf16>
    %452 = vector.extract_strided_slice %1 {offsets = [4, 2, 0, 0], sizes = [1, 1, 3, 4], strides = [1, 1, 1, 1]} : vector<5x5x3x4xbf16> to vector<1x1x3x4xbf16>
    %453 = vector.shape_cast %452 : vector<1x1x3x4xbf16> to vector<3x4xbf16>
    %cst_156 = arith.constant dense<0.000000e+00> : vector<12x4xf32>
    %454 = tpu.matmul %451, %453, %cst_156 {dimension_numbers = #tpu.dot_dimension_numbers<[1], [0], [0], [1], [0, 0, 1, 1], [], []>} : vector<12x3xbf16>, vector<3x4xbf16>, vector<12x4xf32> -> vector<12x4xf32>
    %455 = arith.addf %450, %454 : vector<12x4xf32>
    %456 = vector.extract_strided_slice %440 {offsets = [3, 0], sizes = [12, 3], strides = [1, 1]} : vector<16x3xbf16> to vector<12x3xbf16>
    %457 = vector.extract_strided_slice %1 {offsets = [4, 3, 0, 0], sizes = [1, 1, 3, 4], strides = [1, 1, 1, 1]} : vector<5x5x3x4xbf16> to vector<1x1x3x4xbf16>
    %458 = vector.shape_cast %457 : vector<1x1x3x4xbf16> to vector<3x4xbf16>
    %cst_157 = arith.constant dense<0.000000e+00> : vector<12x4xf32>
    %459 = tpu.matmul %456, %458, %cst_157 {dimension_numbers = #tpu.dot_dimension_numbers<[1], [0], [0], [1], [0, 0, 1, 1], [], []>} : vector<12x3xbf16>, vector<3x4xbf16>, vector<12x4xf32> -> vector<12x4xf32>
    %460 = arith.addf %455, %459 : vector<12x4xf32>
    %461 = vector.extract_strided_slice %440 {offsets = [4, 0], sizes = [12, 3], strides = [1, 1]} : vector<16x3xbf16> to vector<12x3xbf16>
    %462 = vector.extract_strided_slice %1 {offsets = [4, 4, 0, 0], sizes = [1, 1, 3, 4], strides = [1, 1, 1, 1]} : vector<5x5x3x4xbf16> to vector<1x1x3x4xbf16>
    %463 = vector.shape_cast %462 : vector<1x1x3x4xbf16> to vector<3x4xbf16>
    %cst_158 = arith.constant dense<0.000000e+00> : vector<12x4xf32>
    %464 = tpu.matmul %461, %463, %cst_158 {dimension_numbers = #tpu.dot_dimension_numbers<[1], [0], [0], [1], [0, 0, 1, 1], [], []>} : vector<12x3xbf16>, vector<3x4xbf16>, vector<12x4xf32> -> vector<12x4xf32>
    %465 = arith.addf %460, %464 : vector<12x4xf32>
    %466 = vector.broadcast %2 : vector<1x4xf32> to vector<12x4xf32>
    %467 = arith.addf %465, %466 : vector<12x4xf32>
    %c0_159 = arith.constant 0 : index
    %c2 = arith.constant 2 : index
    %c0_160 = arith.constant 0 : index
    %c0_161 = arith.constant 0 : index
    %468 = vector.load %arg5[%c0_159, %c2, %c0_160, %c0_161] : memref<1x6x12x4xf32, #tpu.memory_space<vmem>>, vector<1x1x12x4xf32>
    %469 = vector.shape_cast %468 : vector<1x1x12x4xf32> to vector<12x4xf32>
    %470 = vector.shape_cast %467 : vector<12x4xf32> to vector<1x1x12x4xf32>
    tpu.vector_store %arg5[%c0_159, %c2, %c0_160, %c0_161], %470 {strides = array<i32>} : memref<1x6x12x4xf32, #tpu.memory_space<vmem>>, vector<1x1x12x4xf32>,
    %cst_162 = arith.constant 0.000000e+00 : f32
    %471 = vector.broadcast %cst_162 : f32 to vector<12x4xf32>
    %c3_i32_163 = arith.constant 3 : i32
    %472 = arith.addi %0, %c3_i32_163 : i32
    %c0_i32_164 = arith.constant 0 : i32
    %473 = arith.addi %472, %c0_i32_164 : i32
    %c0_165 = arith.constant 0 : index
    %474 = arith.index_cast %473 : i32 to index
    %c0_166 = arith.constant 0 : index
    %c0_167 = arith.constant 0 : index
    %475 = vector.load %arg2[%c0_165, %474, %c0_166, %c0_167] : memref<1x16x16x3xbf16, #tpu.memory_space<vmem>>, vector<1x1x16x3xbf16>
    %476 = vector.shape_cast %475 : vector<1x1x16x3xbf16> to vector<16x3xbf16>
    %477 = vector.extract_strided_slice %476 {offsets = [0, 0], sizes = [12, 3], strides = [1, 1]} : vector<16x3xbf16> to vector<12x3xbf16>
    %478 = vector.extract_strided_slice %1 {offsets = [0, 0, 0, 0], sizes = [1, 1, 3, 4], strides = [1, 1, 1, 1]} : vector<5x5x3x4xbf16> to vector<1x1x3x4xbf16>
    %479 = vector.shape_cast %478 : vector<1x1x3x4xbf16> to vector<3x4xbf16>
    %cst_168 = arith.constant dense<0.000000e+00> : vector<12x4xf32>
    %480 = tpu.matmul %477, %479, %cst_168 {dimension_numbers = #tpu.dot_dimension_numbers<[1], [0], [0], [1], [0, 0, 1, 1], [], []>} : vector<12x3xbf16>, vector<3x4xbf16>, vector<12x4xf32> -> vector<12x4xf32>
    %481 = arith.addf %471, %480 : vector<12x4xf32>
    %482 = vector.extract_strided_slice %476 {offsets = [1, 0], sizes = [12, 3], strides = [1, 1]} : vector<16x3xbf16> to vector<12x3xbf16>
    %483 = vector.extract_strided_slice %1 {offsets = [0, 1, 0, 0], sizes = [1, 1, 3, 4], strides = [1, 1, 1, 1]} : vector<5x5x3x4xbf16> to vector<1x1x3x4xbf16>
    %484 = vector.shape_cast %483 : vector<1x1x3x4xbf16> to vector<3x4xbf16>
    %cst_169 = arith.constant dense<0.000000e+00> : vector<12x4xf32>
    %485 = tpu.matmul %482, %484, %cst_169 {dimension_numbers = #tpu.dot_dimension_numbers<[1], [0], [0], [1], [0, 0, 1, 1], [], []>} : vector<12x3xbf16>, vector<3x4xbf16>, vector<12x4xf32> -> vector<12x4xf32>
    %486 = arith.addf %481, %485 : vector<12x4xf32>
    %487 = vector.extract_strided_slice %476 {offsets = [2, 0], sizes = [12, 3], strides = [1, 1]} : vector<16x3xbf16> to vector<12x3xbf16>
    %488 = vector.extract_strided_slice %1 {offsets = [0, 2, 0, 0], sizes = [1, 1, 3, 4], strides = [1, 1, 1, 1]} : vector<5x5x3x4xbf16> to vector<1x1x3x4xbf16>
    %489 = vector.shape_cast %488 : vector<1x1x3x4xbf16> to vector<3x4xbf16>
    %cst_170 = arith.constant dense<0.000000e+00> : vector<12x4xf32>
    %490 = tpu.matmul %487, %489, %cst_170 {dimension_numbers = #tpu.dot_dimension_numbers<[1], [0], [0], [1], [0, 0, 1, 1], [], []>} : vector<12x3xbf16>, vector<3x4xbf16>, vector<12x4xf32> -> vector<12x4xf32>
    %491 = arith.addf %486, %490 : vector<12x4xf32>
    %492 = vector.extract_strided_slice %476 {offsets = [3, 0], sizes = [12, 3], strides = [1, 1]} : vector<16x3xbf16> to vector<12x3xbf16>
    %493 = vector.extract_strided_slice %1 {offsets = [0, 3, 0, 0], sizes = [1, 1, 3, 4], strides = [1, 1, 1, 1]} : vector<5x5x3x4xbf16> to vector<1x1x3x4xbf16>
    %494 = vector.shape_cast %493 : vector<1x1x3x4xbf16> to vector<3x4xbf16>
    %cst_171 = arith.constant dense<0.000000e+00> : vector<12x4xf32>
    %495 = tpu.matmul %492, %494, %cst_171 {dimension_numbers = #tpu.dot_dimension_numbers<[1], [0], [0], [1], [0, 0, 1, 1], [], []>} : vector<12x3xbf16>, vector<3x4xbf16>, vector<12x4xf32> -> vector<12x4xf32>
    %496 = arith.addf %491, %495 : vector<12x4xf32>
    %497 = vector.extract_strided_slice %476 {offsets = [4, 0], sizes = [12, 3], strides = [1, 1]} : vector<16x3xbf16> to vector<12x3xbf16>
    %498 = vector.extract_strided_slice %1 {offsets = [0, 4, 0, 0], sizes = [1, 1, 3, 4], strides = [1, 1, 1, 1]} : vector<5x5x3x4xbf16> to vector<1x1x3x4xbf16>
    %499 = vector.shape_cast %498 : vector<1x1x3x4xbf16> to vector<3x4xbf16>
    %cst_172 = arith.constant dense<0.000000e+00> : vector<12x4xf32>
    %500 = tpu.matmul %497, %499, %cst_172 {dimension_numbers = #tpu.dot_dimension_numbers<[1], [0], [0], [1], [0, 0, 1, 1], [], []>} : vector<12x3xbf16>, vector<3x4xbf16>, vector<12x4xf32> -> vector<12x4xf32>
    %501 = arith.addf %496, %500 : vector<12x4xf32>
    %c3_i32_173 = arith.constant 3 : i32
    %502 = arith.addi %0, %c3_i32_173 : i32
    %c1_i32_174 = arith.constant 1 : i32
    %503 = arith.addi %502, %c1_i32_174 : i32
    %c0_175 = arith.constant 0 : index
    %504 = arith.index_cast %503 : i32 to index
    %c0_176 = arith.constant 0 : index
    %c0_177 = arith.constant 0 : index
    %505 = vector.load %arg2[%c0_175, %504, %c0_176, %c0_177] : memref<1x16x16x3xbf16, #tpu.memory_space<vmem>>, vector<1x1x16x3xbf16>
    %506 = vector.shape_cast %505 : vector<1x1x16x3xbf16> to vector<16x3xbf16>
    %507 = vector.extract_strided_slice %506 {offsets = [0, 0], sizes = [12, 3], strides = [1, 1]} : vector<16x3xbf16> to vector<12x3xbf16>
    %508 = vector.extract_strided_slice %1 {offsets = [1, 0, 0, 0], sizes = [1, 1, 3, 4], strides = [1, 1, 1, 1]} : vector<5x5x3x4xbf16> to vector<1x1x3x4xbf16>
    %509 = vector.shape_cast %508 : vector<1x1x3x4xbf16> to vector<3x4xbf16>
    %cst_178 = arith.constant dense<0.000000e+00> : vector<12x4xf32>
    %510 = tpu.matmul %507, %509, %cst_178 {dimension_numbers = #tpu.dot_dimension_numbers<[1], [0], [0], [1], [0, 0, 1, 1], [], []>} : vector<12x3xbf16>, vector<3x4xbf16>, vector<12x4xf32> -> vector<12x4xf32>
    %511 = arith.addf %501, %510 : vector<12x4xf32>
    %512 = vector.extract_strided_slice %506 {offsets = [1, 0], sizes = [12, 3], strides = [1, 1]} : vector<16x3xbf16> to vector<12x3xbf16>
    %513 = vector.extract_strided_slice %1 {offsets = [1, 1, 0, 0], sizes = [1, 1, 3, 4], strides = [1, 1, 1, 1]} : vector<5x5x3x4xbf16> to vector<1x1x3x4xbf16>
    %514 = vector.shape_cast %513 : vector<1x1x3x4xbf16> to vector<3x4xbf16>
    %cst_179 = arith.constant dense<0.000000e+00> : vector<12x4xf32>
    %515 = tpu.matmul %512, %514, %cst_179 {dimension_numbers = #tpu.dot_dimension_numbers<[1], [0], [0], [1], [0, 0, 1, 1], [], []>} : vector<12x3xbf16>, vector<3x4xbf16>, vector<12x4xf32> -> vector<12x4xf32>
    %516 = arith.addf %511, %515 : vector<12x4xf32>
    %517 = vector.extract_strided_slice %506 {offsets = [2, 0], sizes = [12, 3], strides = [1, 1]} : vector<16x3xbf16> to vector<12x3xbf16>
    %518 = vector.extract_strided_slice %1 {offsets = [1, 2, 0, 0], sizes = [1, 1, 3, 4], strides = [1, 1, 1, 1]} : vector<5x5x3x4xbf16> to vector<1x1x3x4xbf16>
    %519 = vector.shape_cast %518 : vector<1x1x3x4xbf16> to vector<3x4xbf16>
    %cst_180 = arith.constant dense<0.000000e+00> : vector<12x4xf32>
    %520 = tpu.matmul %517, %519, %cst_180 {dimension_numbers = #tpu.dot_dimension_numbers<[1], [0], [0], [1], [0, 0, 1, 1], [], []>} : vector<12x3xbf16>, vector<3x4xbf16>, vector<12x4xf32> -> vector<12x4xf32>
    %521 = arith.addf %516, %520 : vector<12x4xf32>
    %522 = vector.extract_strided_slice %506 {offsets = [3, 0], sizes = [12, 3], strides = [1, 1]} : vector<16x3xbf16> to vector<12x3xbf16>
    %523 = vector.extract_strided_slice %1 {offsets = [1, 3, 0, 0], sizes = [1, 1, 3, 4], strides = [1, 1, 1, 1]} : vector<5x5x3x4xbf16> to vector<1x1x3x4xbf16>
    %524 = vector.shape_cast %523 : vector<1x1x3x4xbf16> to vector<3x4xbf16>
    %cst_181 = arith.constant dense<0.000000e+00> : vector<12x4xf32>
    %525 = tpu.matmul %522, %524, %cst_181 {dimension_numbers = #tpu.dot_dimension_numbers<[1], [0], [0], [1], [0, 0, 1, 1], [], []>} : vector<12x3xbf16>, vector<3x4xbf16>, vector<12x4xf32> -> vector<12x4xf32>
    %526 = arith.addf %521, %525 : vector<12x4xf32>
    %527 = vector.extract_strided_slice %506 {offsets = [4, 0], sizes = [12, 3], strides = [1, 1]} : vector<16x3xbf16> to vector<12x3xbf16>
    %528 = vector.extract_strided_slice %1 {offsets = [1, 4, 0, 0], sizes = [1, 1, 3, 4], strides = [1, 1, 1, 1]} : vector<5x5x3x4xbf16> to vector<1x1x3x4xbf16>
    %529 = vector.shape_cast %528 : vector<1x1x3x4xbf16> to vector<3x4xbf16>
    %cst_182 = arith.constant dense<0.000000e+00> : vector<12x4xf32>
    %530 = tpu.matmul %527, %529, %cst_182 {dimension_numbers = #tpu.dot_dimension_numbers<[1], [0], [0], [1], [0, 0, 1, 1], [], []>} : vector<12x3xbf16>, vector<3x4xbf16>, vector<12x4xf32> -> vector<12x4xf32>
    %531 = arith.addf %526, %530 : vector<12x4xf32>
    %c3_i32_183 = arith.constant 3 : i32
    %532 = arith.addi %0, %c3_i32_183 : i32
    %c2_i32_184 = arith.constant 2 : i32
    %533 = arith.addi %532, %c2_i32_184 : i32
    %c0_185 = arith.constant 0 : index
    %534 = arith.index_cast %533 : i32 to index
    %c0_186 = arith.constant 0 : index
    %c0_187 = arith.constant 0 : index
    %535 = vector.load %arg2[%c0_185, %534, %c0_186, %c0_187] : memref<1x16x16x3xbf16, #tpu.memory_space<vmem>>, vector<1x1x16x3xbf16>
    %536 = vector.shape_cast %535 : vector<1x1x16x3xbf16> to vector<16x3xbf16>
    %537 = vector.extract_strided_slice %536 {offsets = [0, 0], sizes = [12, 3], strides = [1, 1]} : vector<16x3xbf16> to vector<12x3xbf16>
    %538 = vector.extract_strided_slice %1 {offsets = [2, 0, 0, 0], sizes = [1, 1, 3, 4], strides = [1, 1, 1, 1]} : vector<5x5x3x4xbf16> to vector<1x1x3x4xbf16>
    %539 = vector.shape_cast %538 : vector<1x1x3x4xbf16> to vector<3x4xbf16>
    %cst_188 = arith.constant dense<0.000000e+00> : vector<12x4xf32>
    %540 = tpu.matmul %537, %539, %cst_188 {dimension_numbers = #tpu.dot_dimension_numbers<[1], [0], [0], [1], [0, 0, 1, 1], [], []>} : vector<12x3xbf16>, vector<3x4xbf16>, vector<12x4xf32> -> vector<12x4xf32>
    %541 = arith.addf %531, %540 : vector<12x4xf32>
    %542 = vector.extract_strided_slice %536 {offsets = [1, 0], sizes = [12, 3], strides = [1, 1]} : vector<16x3xbf16> to vector<12x3xbf16>
    %543 = vector.extract_strided_slice %1 {offsets = [2, 1, 0, 0], sizes = [1, 1, 3, 4], strides = [1, 1, 1, 1]} : vector<5x5x3x4xbf16> to vector<1x1x3x4xbf16>
    %544 = vector.shape_cast %543 : vector<1x1x3x4xbf16> to vector<3x4xbf16>
    %cst_189 = arith.constant dense<0.000000e+00> : vector<12x4xf32>
    %545 = tpu.matmul %542, %544, %cst_189 {dimension_numbers = #tpu.dot_dimension_numbers<[1], [0], [0], [1], [0, 0, 1, 1], [], []>} : vector<12x3xbf16>, vector<3x4xbf16>, vector<12x4xf32> -> vector<12x4xf32>
    %546 = arith.addf %541, %545 : vector<12x4xf32>
    %547 = vector.extract_strided_slice %536 {offsets = [2, 0], sizes = [12, 3], strides = [1, 1]} : vector<16x3xbf16> to vector<12x3xbf16>
    %548 = vector.extract_strided_slice %1 {offsets = [2, 2, 0, 0], sizes = [1, 1, 3, 4], strides = [1, 1, 1, 1]} : vector<5x5x3x4xbf16> to vector<1x1x3x4xbf16>
    %549 = vector.shape_cast %548 : vector<1x1x3x4xbf16> to vector<3x4xbf16>
    %cst_190 = arith.constant dense<0.000000e+00> : vector<12x4xf32>
    %550 = tpu.matmul %547, %549, %cst_190 {dimension_numbers = #tpu.dot_dimension_numbers<[1], [0], [0], [1], [0, 0, 1, 1], [], []>} : vector<12x3xbf16>, vector<3x4xbf16>, vector<12x4xf32> -> vector<12x4xf32>
    %551 = arith.addf %546, %550 : vector<12x4xf32>
    %552 = vector.extract_strided_slice %536 {offsets = [3, 0], sizes = [12, 3], strides = [1, 1]} : vector<16x3xbf16> to vector<12x3xbf16>
    %553 = vector.extract_strided_slice %1 {offsets = [2, 3, 0, 0], sizes = [1, 1, 3, 4], strides = [1, 1, 1, 1]} : vector<5x5x3x4xbf16> to vector<1x1x3x4xbf16>
    %554 = vector.shape_cast %553 : vector<1x1x3x4xbf16> to vector<3x4xbf16>
    %cst_191 = arith.constant dense<0.000000e+00> : vector<12x4xf32>
    %555 = tpu.matmul %552, %554, %cst_191 {dimension_numbers = #tpu.dot_dimension_numbers<[1], [0], [0], [1], [0, 0, 1, 1], [], []>} : vector<12x3xbf16>, vector<3x4xbf16>, vector<12x4xf32> -> vector<12x4xf32>
    %556 = arith.addf %551, %555 : vector<12x4xf32>
    %557 = vector.extract_strided_slice %536 {offsets = [4, 0], sizes = [12, 3], strides = [1, 1]} : vector<16x3xbf16> to vector<12x3xbf16>
    %558 = vector.extract_strided_slice %1 {offsets = [2, 4, 0, 0], sizes = [1, 1, 3, 4], strides = [1, 1, 1, 1]} : vector<5x5x3x4xbf16> to vector<1x1x3x4xbf16>
    %559 = vector.shape_cast %558 : vector<1x1x3x4xbf16> to vector<3x4xbf16>
    %cst_192 = arith.constant dense<0.000000e+00> : vector<12x4xf32>
    %560 = tpu.matmul %557, %559, %cst_192 {dimension_numbers = #tpu.dot_dimension_numbers<[1], [0], [0], [1], [0, 0, 1, 1], [], []>} : vector<12x3xbf16>, vector<3x4xbf16>, vector<12x4xf32> -> vector<12x4xf32>
    %561 = arith.addf %556, %560 : vector<12x4xf32>
    %c3_i32_193 = arith.constant 3 : i32
    %562 = arith.addi %0, %c3_i32_193 : i32
    %c3_i32_194 = arith.constant 3 : i32
    %563 = arith.addi %562, %c3_i32_194 : i32
    %c0_195 = arith.constant 0 : index
    %564 = arith.index_cast %563 : i32 to index
    %c0_196 = arith.constant 0 : index
    %c0_197 = arith.constant 0 : index
    %565 = vector.load %arg2[%c0_195, %564, %c0_196, %c0_197] : memref<1x16x16x3xbf16, #tpu.memory_space<vmem>>, vector<1x1x16x3xbf16>
    %566 = vector.shape_cast %565 : vector<1x1x16x3xbf16> to vector<16x3xbf16>
    %567 = vector.extract_strided_slice %566 {offsets = [0, 0], sizes = [12, 3], strides = [1, 1]} : vector<16x3xbf16> to vector<12x3xbf16>
    %568 = vector.extract_strided_slice %1 {offsets = [3, 0, 0, 0], sizes = [1, 1, 3, 4], strides = [1, 1, 1, 1]} : vector<5x5x3x4xbf16> to vector<1x1x3x4xbf16>
    %569 = vector.shape_cast %568 : vector<1x1x3x4xbf16> to vector<3x4xbf16>
    %cst_198 = arith.constant dense<0.000000e+00> : vector<12x4xf32>
    %570 = tpu.matmul %567, %569, %cst_198 {dimension_numbers = #tpu.dot_dimension_numbers<[1], [0], [0], [1], [0, 0, 1, 1], [], []>} : vector<12x3xbf16>, vector<3x4xbf16>, vector<12x4xf32> -> vector<12x4xf32>
    %571 = arith.addf %561, %570 : vector<12x4xf32>
    %572 = vector.extract_strided_slice %566 {offsets = [1, 0], sizes = [12, 3], strides = [1, 1]} : vector<16x3xbf16> to vector<12x3xbf16>
    %573 = vector.extract_strided_slice %1 {offsets = [3, 1, 0, 0], sizes = [1, 1, 3, 4], strides = [1, 1, 1, 1]} : vector<5x5x3x4xbf16> to vector<1x1x3x4xbf16>
    %574 = vector.shape_cast %573 : vector<1x1x3x4xbf16> to vector<3x4xbf16>
    %cst_199 = arith.constant dense<0.000000e+00> : vector<12x4xf32>
    %575 = tpu.matmul %572, %574, %cst_199 {dimension_numbers = #tpu.dot_dimension_numbers<[1], [0], [0], [1], [0, 0, 1, 1], [], []>} : vector<12x3xbf16>, vector<3x4xbf16>, vector<12x4xf32> -> vector<12x4xf32>
    %576 = arith.addf %571, %575 : vector<12x4xf32>
    %577 = vector.extract_strided_slice %566 {offsets = [2, 0], sizes = [12, 3], strides = [1, 1]} : vector<16x3xbf16> to vector<12x3xbf16>
    %578 = vector.extract_strided_slice %1 {offsets = [3, 2, 0, 0], sizes = [1, 1, 3, 4], strides = [1, 1, 1, 1]} : vector<5x5x3x4xbf16> to vector<1x1x3x4xbf16>
    %579 = vector.shape_cast %578 : vector<1x1x3x4xbf16> to vector<3x4xbf16>
    %cst_200 = arith.constant dense<0.000000e+00> : vector<12x4xf32>
    %580 = tpu.matmul %577, %579, %cst_200 {dimension_numbers = #tpu.dot_dimension_numbers<[1], [0], [0], [1], [0, 0, 1, 1], [], []>} : vector<12x3xbf16>, vector<3x4xbf16>, vector<12x4xf32> -> vector<12x4xf32>
    %581 = arith.addf %576, %580 : vector<12x4xf32>
    %582 = vector.extract_strided_slice %566 {offsets = [3, 0], sizes = [12, 3], strides = [1, 1]} : vector<16x3xbf16> to vector<12x3xbf16>
    %583 = vector.extract_strided_slice %1 {offsets = [3, 3, 0, 0], sizes = [1, 1, 3, 4], strides = [1, 1, 1, 1]} : vector<5x5x3x4xbf16> to vector<1x1x3x4xbf16>
    %584 = vector.shape_cast %583 : vector<1x1x3x4xbf16> to vector<3x4xbf16>
    %cst_201 = arith.constant dense<0.000000e+00> : vector<12x4xf32>
    %585 = tpu.matmul %582, %584, %cst_201 {dimension_numbers = #tpu.dot_dimension_numbers<[1], [0], [0], [1], [0, 0, 1, 1], [], []>} : vector<12x3xbf16>, vector<3x4xbf16>, vector<12x4xf32> -> vector<12x4xf32>
    %586 = arith.addf %581, %585 : vector<12x4xf32>
    %587 = vector.extract_strided_slice %566 {offsets = [4, 0], sizes = [12, 3], strides = [1, 1]} : vector<16x3xbf16> to vector<12x3xbf16>
    %588 = vector.extract_strided_slice %1 {offsets = [3, 4, 0, 0], sizes = [1, 1, 3, 4], strides = [1, 1, 1, 1]} : vector<5x5x3x4xbf16> to vector<1x1x3x4xbf16>
    %589 = vector.shape_cast %588 : vector<1x1x3x4xbf16> to vector<3x4xbf16>
    %cst_202 = arith.constant dense<0.000000e+00> : vector<12x4xf32>
    %590 = tpu.matmul %587, %589, %cst_202 {dimension_numbers = #tpu.dot_dimension_numbers<[1], [0], [0], [1], [0, 0, 1, 1], [], []>} : vector<12x3xbf16>, vector<3x4xbf16>, vector<12x4xf32> -> vector<12x4xf32>
    %591 = arith.addf %586, %590 : vector<12x4xf32>
    %c3_i32_203 = arith.constant 3 : i32
    %592 = arith.addi %0, %c3_i32_203 : i32
    %c4_i32_204 = arith.constant 4 : i32
    %593 = arith.addi %592, %c4_i32_204 : i32
    %c0_205 = arith.constant 0 : index
    %594 = arith.index_cast %593 : i32 to index
    %c0_206 = arith.constant 0 : index
    %c0_207 = arith.constant 0 : index
    %595 = vector.load %arg2[%c0_205, %594, %c0_206, %c0_207] : memref<1x16x16x3xbf16, #tpu.memory_space<vmem>>, vector<1x1x16x3xbf16>
    %596 = vector.shape_cast %595 : vector<1x1x16x3xbf16> to vector<16x3xbf16>
    %597 = vector.extract_strided_slice %596 {offsets = [0, 0], sizes = [12, 3], strides = [1, 1]} : vector<16x3xbf16> to vector<12x3xbf16>
    %598 = vector.extract_strided_slice %1 {offsets = [4, 0, 0, 0], sizes = [1, 1, 3, 4], strides = [1, 1, 1, 1]} : vector<5x5x3x4xbf16> to vector<1x1x3x4xbf16>
    %599 = vector.shape_cast %598 : vector<1x1x3x4xbf16> to vector<3x4xbf16>
    %cst_208 = arith.constant dense<0.000000e+00> : vector<12x4xf32>
    %600 = tpu.matmul %597, %599, %cst_208 {dimension_numbers = #tpu.dot_dimension_numbers<[1], [0], [0], [1], [0, 0, 1, 1], [], []>} : vector<12x3xbf16>, vector<3x4xbf16>, vector<12x4xf32> -> vector<12x4xf32>
    %601 = arith.addf %591, %600 : vector<12x4xf32>
    %602 = vector.extract_strided_slice %596 {offsets = [1, 0], sizes = [12, 3], strides = [1, 1]} : vector<16x3xbf16> to vector<12x3xbf16>
    %603 = vector.extract_strided_slice %1 {offsets = [4, 1, 0, 0], sizes = [1, 1, 3, 4], strides = [1, 1, 1, 1]} : vector<5x5x3x4xbf16> to vector<1x1x3x4xbf16>
    %604 = vector.shape_cast %603 : vector<1x1x3x4xbf16> to vector<3x4xbf16>
    %cst_209 = arith.constant dense<0.000000e+00> : vector<12x4xf32>
    %605 = tpu.matmul %602, %604, %cst_209 {dimension_numbers = #tpu.dot_dimension_numbers<[1], [0], [0], [1], [0, 0, 1, 1], [], []>} : vector<12x3xbf16>, vector<3x4xbf16>, vector<12x4xf32> -> vector<12x4xf32>
    %606 = arith.addf %601, %605 : vector<12x4xf32>
    %607 = vector.extract_strided_slice %596 {offsets = [2, 0], sizes = [12, 3], strides = [1, 1]} : vector<16x3xbf16> to vector<12x3xbf16>
    %608 = vector.extract_strided_slice %1 {offsets = [4, 2, 0, 0], sizes = [1, 1, 3, 4], strides = [1, 1, 1, 1]} : vector<5x5x3x4xbf16> to vector<1x1x3x4xbf16>
    %609 = vector.shape_cast %608 : vector<1x1x3x4xbf16> to vector<3x4xbf16>
    %cst_210 = arith.constant dense<0.000000e+00> : vector<12x4xf32>
    %610 = tpu.matmul %607, %609, %cst_210 {dimension_numbers = #tpu.dot_dimension_numbers<[1], [0], [0], [1], [0, 0, 1, 1], [], []>} : vector<12x3xbf16>, vector<3x4xbf16>, vector<12x4xf32> -> vector<12x4xf32>
    %611 = arith.addf %606, %610 : vector<12x4xf32>
    %612 = vector.extract_strided_slice %596 {offsets = [3, 0], sizes = [12, 3], strides = [1, 1]} : vector<16x3xbf16> to vector<12x3xbf16>
    %613 = vector.extract_strided_slice %1 {offsets = [4, 3, 0, 0], sizes = [1, 1, 3, 4], strides = [1, 1, 1, 1]} : vector<5x5x3x4xbf16> to vector<1x1x3x4xbf16>
    %614 = vector.shape_cast %613 : vector<1x1x3x4xbf16> to vector<3x4xbf16>
    %cst_211 = arith.constant dense<0.000000e+00> : vector<12x4xf32>
    %615 = tpu.matmul %612, %614, %cst_211 {dimension_numbers = #tpu.dot_dimension_numbers<[1], [0], [0], [1], [0, 0, 1, 1], [], []>} : vector<12x3xbf16>, vector<3x4xbf16>, vector<12x4xf32> -> vector<12x4xf32>
    %616 = arith.addf %611, %615 : vector<12x4xf32>
    %617 = vector.extract_strided_slice %596 {offsets = [4, 0], sizes = [12, 3], strides = [1, 1]} : vector<16x3xbf16> to vector<12x3xbf16>
    %618 = vector.extract_strided_slice %1 {offsets = [4, 4, 0, 0], sizes = [1, 1, 3, 4], strides = [1, 1, 1, 1]} : vector<5x5x3x4xbf16> to vector<1x1x3x4xbf16>
    %619 = vector.shape_cast %618 : vector<1x1x3x4xbf16> to vector<3x4xbf16>
    %cst_212 = arith.constant dense<0.000000e+00> : vector<12x4xf32>
    %620 = tpu.matmul %617, %619, %cst_212 {dimension_numbers = #tpu.dot_dimension_numbers<[1], [0], [0], [1], [0, 0, 1, 1], [], []>} : vector<12x3xbf16>, vector<3x4xbf16>, vector<12x4xf32> -> vector<12x4xf32>
    %621 = arith.addf %616, %620 : vector<12x4xf32>
    %622 = vector.broadcast %2 : vector<1x4xf32> to vector<12x4xf32>
    %623 = arith.addf %621, %622 : vector<12x4xf32>
    %c0_213 = arith.constant 0 : index
    %c3 = arith.constant 3 : index
    %c0_214 = arith.constant 0 : index
    %c0_215 = arith.constant 0 : index
    %624 = vector.load %arg5[%c0_213, %c3, %c0_214, %c0_215] : memref<1x6x12x4xf32, #tpu.memory_space<vmem>>, vector<1x1x12x4xf32>
    %625 = vector.shape_cast %624 : vector<1x1x12x4xf32> to vector<12x4xf32>
    %626 = vector.shape_cast %623 : vector<12x4xf32> to vector<1x1x12x4xf32>
    tpu.vector_store %arg5[%c0_213, %c3, %c0_214, %c0_215], %626 {strides = array<i32>} : memref<1x6x12x4xf32, #tpu.memory_space<vmem>>, vector<1x1x12x4xf32>,
    %cst_216 = arith.constant 0.000000e+00 : f32
    %627 = vector.broadcast %cst_216 : f32 to vector<12x4xf32>
    %c4_i32_217 = arith.constant 4 : i32
    %628 = arith.addi %0, %c4_i32_217 : i32
    %c0_i32_218 = arith.constant 0 : i32
    %629 = arith.addi %628, %c0_i32_218 : i32
    %c0_219 = arith.constant 0 : index
    %630 = arith.index_cast %629 : i32 to index
    %c0_220 = arith.constant 0 : index
    %c0_221 = arith.constant 0 : index
    %631 = vector.load %arg2[%c0_219, %630, %c0_220, %c0_221] : memref<1x16x16x3xbf16, #tpu.memory_space<vmem>>, vector<1x1x16x3xbf16>
    %632 = vector.shape_cast %631 : vector<1x1x16x3xbf16> to vector<16x3xbf16>
    %633 = vector.extract_strided_slice %632 {offsets = [0, 0], sizes = [12, 3], strides = [1, 1]} : vector<16x3xbf16> to vector<12x3xbf16>
    %634 = vector.extract_strided_slice %1 {offsets = [0, 0, 0, 0], sizes = [1, 1, 3, 4], strides = [1, 1, 1, 1]} : vector<5x5x3x4xbf16> to vector<1x1x3x4xbf16>
    %635 = vector.shape_cast %634 : vector<1x1x3x4xbf16> to vector<3x4xbf16>
    %cst_222 = arith.constant dense<0.000000e+00> : vector<12x4xf32>
    %636 = tpu.matmul %633, %635, %cst_222 {dimension_numbers = #tpu.dot_dimension_numbers<[1], [0], [0], [1], [0, 0, 1, 1], [], []>} : vector<12x3xbf16>, vector<3x4xbf16>, vector<12x4xf32> -> vector<12x4xf32>
    %637 = arith.addf %627, %636 : vector<12x4xf32>
    %638 = vector.extract_strided_slice %632 {offsets = [1, 0], sizes = [12, 3], strides = [1, 1]} : vector<16x3xbf16> to vector<12x3xbf16>
    %639 = vector.extract_strided_slice %1 {offsets = [0, 1, 0, 0], sizes = [1, 1, 3, 4], strides = [1, 1, 1, 1]} : vector<5x5x3x4xbf16> to vector<1x1x3x4xbf16>
    %640 = vector.shape_cast %639 : vector<1x1x3x4xbf16> to vector<3x4xbf16>
    %cst_223 = arith.constant dense<0.000000e+00> : vector<12x4xf32>
    %641 = tpu.matmul %638, %640, %cst_223 {dimension_numbers = #tpu.dot_dimension_numbers<[1], [0], [0], [1], [0, 0, 1, 1], [], []>} : vector<12x3xbf16>, vector<3x4xbf16>, vector<12x4xf32> -> vector<12x4xf32>
    %642 = arith.addf %637, %641 : vector<12x4xf32>
    %643 = vector.extract_strided_slice %632 {offsets = [2, 0], sizes = [12, 3], strides = [1, 1]} : vector<16x3xbf16> to vector<12x3xbf16>
    %644 = vector.extract_strided_slice %1 {offsets = [0, 2, 0, 0], sizes = [1, 1, 3, 4], strides = [1, 1, 1, 1]} : vector<5x5x3x4xbf16> to vector<1x1x3x4xbf16>
    %645 = vector.shape_cast %644 : vector<1x1x3x4xbf16> to vector<3x4xbf16>
    %cst_224 = arith.constant dense<0.000000e+00> : vector<12x4xf32>
    %646 = tpu.matmul %643, %645, %cst_224 {dimension_numbers = #tpu.dot_dimension_numbers<[1], [0], [0], [1], [0, 0, 1, 1], [], []>} : vector<12x3xbf16>, vector<3x4xbf16>, vector<12x4xf32> -> vector<12x4xf32>
    %647 = arith.addf %642, %646 : vector<12x4xf32>
    %648 = vector.extract_strided_slice %632 {offsets = [3, 0], sizes = [12, 3], strides = [1, 1]} : vector<16x3xbf16> to vector<12x3xbf16>
    %649 = vector.extract_strided_slice %1 {offsets = [0, 3, 0, 0], sizes = [1, 1, 3, 4], strides = [1, 1, 1, 1]} : vector<5x5x3x4xbf16> to vector<1x1x3x4xbf16>
    %650 = vector.shape_cast %649 : vector<1x1x3x4xbf16> to vector<3x4xbf16>
    %cst_225 = arith.constant dense<0.000000e+00> : vector<12x4xf32>
    %651 = tpu.matmul %648, %650, %cst_225 {dimension_numbers = #tpu.dot_dimension_numbers<[1], [0], [0], [1], [0, 0, 1, 1], [], []>} : vector<12x3xbf16>, vector<3x4xbf16>, vector<12x4xf32> -> vector<12x4xf32>
    %652 = arith.addf %647, %651 : vector<12x4xf32>
    %653 = vector.extract_strided_slice %632 {offsets = [4, 0], sizes = [12, 3], strides = [1, 1]} : vector<16x3xbf16> to vector<12x3xbf16>
    %654 = vector.extract_strided_slice %1 {offsets = [0, 4, 0, 0], sizes = [1, 1, 3, 4], strides = [1, 1, 1, 1]} : vector<5x5x3x4xbf16> to vector<1x1x3x4xbf16>
    %655 = vector.shape_cast %654 : vector<1x1x3x4xbf16> to vector<3x4xbf16>
    %cst_226 = arith.constant dense<0.000000e+00> : vector<12x4xf32>
    %656 = tpu.matmul %653, %655, %cst_226 {dimension_numbers = #tpu.dot_dimension_numbers<[1], [0], [0], [1], [0, 0, 1, 1], [], []>} : vector<12x3xbf16>, vector<3x4xbf16>, vector<12x4xf32> -> vector<12x4xf32>
    %657 = arith.addf %652, %656 : vector<12x4xf32>
    %c4_i32_227 = arith.constant 4 : i32
    %658 = arith.addi %0, %c4_i32_227 : i32
    %c1_i32_228 = arith.constant 1 : i32
    %659 = arith.addi %658, %c1_i32_228 : i32
    %c0_229 = arith.constant 0 : index
    %660 = arith.index_cast %659 : i32 to index
    %c0_230 = arith.constant 0 : index
    %c0_231 = arith.constant 0 : index
    %661 = vector.load %arg2[%c0_229, %660, %c0_230, %c0_231] : memref<1x16x16x3xbf16, #tpu.memory_space<vmem>>, vector<1x1x16x3xbf16>
    %662 = vector.shape_cast %661 : vector<1x1x16x3xbf16> to vector<16x3xbf16>
    %663 = vector.extract_strided_slice %662 {offsets = [0, 0], sizes = [12, 3], strides = [1, 1]} : vector<16x3xbf16> to vector<12x3xbf16>
    %664 = vector.extract_strided_slice %1 {offsets = [1, 0, 0, 0], sizes = [1, 1, 3, 4], strides = [1, 1, 1, 1]} : vector<5x5x3x4xbf16> to vector<1x1x3x4xbf16>
    %665 = vector.shape_cast %664 : vector<1x1x3x4xbf16> to vector<3x4xbf16>
    %cst_232 = arith.constant dense<0.000000e+00> : vector<12x4xf32>
    %666 = tpu.matmul %663, %665, %cst_232 {dimension_numbers = #tpu.dot_dimension_numbers<[1], [0], [0], [1], [0, 0, 1, 1], [], []>} : vector<12x3xbf16>, vector<3x4xbf16>, vector<12x4xf32> -> vector<12x4xf32>
    %667 = arith.addf %657, %666 : vector<12x4xf32>
    %668 = vector.extract_strided_slice %662 {offsets = [1, 0], sizes = [12, 3], strides = [1, 1]} : vector<16x3xbf16> to vector<12x3xbf16>
    %669 = vector.extract_strided_slice %1 {offsets = [1, 1, 0, 0], sizes = [1, 1, 3, 4], strides = [1, 1, 1, 1]} : vector<5x5x3x4xbf16> to vector<1x1x3x4xbf16>
    %670 = vector.shape_cast %669 : vector<1x1x3x4xbf16> to vector<3x4xbf16>
    %cst_233 = arith.constant dense<0.000000e+00> : vector<12x4xf32>
    %671 = tpu.matmul %668, %670, %cst_233 {dimension_numbers = #tpu.dot_dimension_numbers<[1], [0], [0], [1], [0, 0, 1, 1], [], []>} : vector<12x3xbf16>, vector<3x4xbf16>, vector<12x4xf32> -> vector<12x4xf32>
    %672 = arith.addf %667, %671 : vector<12x4xf32>
    %673 = vector.extract_strided_slice %662 {offsets = [2, 0], sizes = [12, 3], strides = [1, 1]} : vector<16x3xbf16> to vector<12x3xbf16>
    %674 = vector.extract_strided_slice %1 {offsets = [1, 2, 0, 0], sizes = [1, 1, 3, 4], strides = [1, 1, 1, 1]} : vector<5x5x3x4xbf16> to vector<1x1x3x4xbf16>
    %675 = vector.shape_cast %674 : vector<1x1x3x4xbf16> to vector<3x4xbf16>
    %cst_234 = arith.constant dense<0.000000e+00> : vector<12x4xf32>
    %676 = tpu.matmul %673, %675, %cst_234 {dimension_numbers = #tpu.dot_dimension_numbers<[1], [0], [0], [1], [0, 0, 1, 1], [], []>} : vector<12x3xbf16>, vector<3x4xbf16>, vector<12x4xf32> -> vector<12x4xf32>
    %677 = arith.addf %672, %676 : vector<12x4xf32>
    %678 = vector.extract_strided_slice %662 {offsets = [3, 0], sizes = [12, 3], strides = [1, 1]} : vector<16x3xbf16> to vector<12x3xbf16>
    %679 = vector.extract_strided_slice %1 {offsets = [1, 3, 0, 0], sizes = [1, 1, 3, 4], strides = [1, 1, 1, 1]} : vector<5x5x3x4xbf16> to vector<1x1x3x4xbf16>
    %680 = vector.shape_cast %679 : vector<1x1x3x4xbf16> to vector<3x4xbf16>
    %cst_235 = arith.constant dense<0.000000e+00> : vector<12x4xf32>
    %681 = tpu.matmul %678, %680, %cst_235 {dimension_numbers = #tpu.dot_dimension_numbers<[1], [0], [0], [1], [0, 0, 1, 1], [], []>} : vector<12x3xbf16>, vector<3x4xbf16>, vector<12x4xf32> -> vector<12x4xf32>
    %682 = arith.addf %677, %681 : vector<12x4xf32>
    %683 = vector.extract_strided_slice %662 {offsets = [4, 0], sizes = [12, 3], strides = [1, 1]} : vector<16x3xbf16> to vector<12x3xbf16>
    %684 = vector.extract_strided_slice %1 {offsets = [1, 4, 0, 0], sizes = [1, 1, 3, 4], strides = [1, 1, 1, 1]} : vector<5x5x3x4xbf16> to vector<1x1x3x4xbf16>
    %685 = vector.shape_cast %684 : vector<1x1x3x4xbf16> to vector<3x4xbf16>
    %cst_236 = arith.constant dense<0.000000e+00> : vector<12x4xf32>
    %686 = tpu.matmul %683, %685, %cst_236 {dimension_numbers = #tpu.dot_dimension_numbers<[1], [0], [0], [1], [0, 0, 1, 1], [], []>} : vector<12x3xbf16>, vector<3x4xbf16>, vector<12x4xf32> -> vector<12x4xf32>
    %687 = arith.addf %682, %686 : vector<12x4xf32>
    %c4_i32_237 = arith.constant 4 : i32
    %688 = arith.addi %0, %c4_i32_237 : i32
    %c2_i32_238 = arith.constant 2 : i32
    %689 = arith.addi %688, %c2_i32_238 : i32
    %c0_239 = arith.constant 0 : index
    %690 = arith.index_cast %689 : i32 to index
    %c0_240 = arith.constant 0 : index
    %c0_241 = arith.constant 0 : index
    %691 = vector.load %arg2[%c0_239, %690, %c0_240, %c0_241] : memref<1x16x16x3xbf16, #tpu.memory_space<vmem>>, vector<1x1x16x3xbf16>
    %692 = vector.shape_cast %691 : vector<1x1x16x3xbf16> to vector<16x3xbf16>
    %693 = vector.extract_strided_slice %692 {offsets = [0, 0], sizes = [12, 3], strides = [1, 1]} : vector<16x3xbf16> to vector<12x3xbf16>
    %694 = vector.extract_strided_slice %1 {offsets = [2, 0, 0, 0], sizes = [1, 1, 3, 4], strides = [1, 1, 1, 1]} : vector<5x5x3x4xbf16> to vector<1x1x3x4xbf16>
    %695 = vector.shape_cast %694 : vector<1x1x3x4xbf16> to vector<3x4xbf16>
    %cst_242 = arith.constant dense<0.000000e+00> : vector<12x4xf32>
    %696 = tpu.matmul %693, %695, %cst_242 {dimension_numbers = #tpu.dot_dimension_numbers<[1], [0], [0], [1], [0, 0, 1, 1], [], []>} : vector<12x3xbf16>, vector<3x4xbf16>, vector<12x4xf32> -> vector<12x4xf32>
    %697 = arith.addf %687, %696 : vector<12x4xf32>
    %698 = vector.extract_strided_slice %692 {offsets = [1, 0], sizes = [12, 3], strides = [1, 1]} : vector<16x3xbf16> to vector<12x3xbf16>
    %699 = vector.extract_strided_slice %1 {offsets = [2, 1, 0, 0], sizes = [1, 1, 3, 4], strides = [1, 1, 1, 1]} : vector<5x5x3x4xbf16> to vector<1x1x3x4xbf16>
    %700 = vector.shape_cast %699 : vector<1x1x3x4xbf16> to vector<3x4xbf16>
    %cst_243 = arith.constant dense<0.000000e+00> : vector<12x4xf32>
    %701 = tpu.matmul %698, %700, %cst_243 {dimension_numbers = #tpu.dot_dimension_numbers<[1], [0], [0], [1], [0, 0, 1, 1], [], []>} : vector<12x3xbf16>, vector<3x4xbf16>, vector<12x4xf32> -> vector<12x4xf32>
    %702 = arith.addf %697, %701 : vector<12x4xf32>
    %703 = vector.extract_strided_slice %692 {offsets = [2, 0], sizes = [12, 3], strides = [1, 1]} : vector<16x3xbf16> to vector<12x3xbf16>
    %704 = vector.extract_strided_slice %1 {offsets = [2, 2, 0, 0], sizes = [1, 1, 3, 4], strides = [1, 1, 1, 1]} : vector<5x5x3x4xbf16> to vector<1x1x3x4xbf16>
    %705 = vector.shape_cast %704 : vector<1x1x3x4xbf16> to vector<3x4xbf16>
    %cst_244 = arith.constant dense<0.000000e+00> : vector<12x4xf32>
    %706 = tpu.matmul %703, %705, %cst_244 {dimension_numbers = #tpu.dot_dimension_numbers<[1], [0], [0], [1], [0, 0, 1, 1], [], []>} : vector<12x3xbf16>, vector<3x4xbf16>, vector<12x4xf32> -> vector<12x4xf32>
    %707 = arith.addf %702, %706 : vector<12x4xf32>
    %708 = vector.extract_strided_slice %692 {offsets = [3, 0], sizes = [12, 3], strides = [1, 1]} : vector<16x3xbf16> to vector<12x3xbf16>
    %709 = vector.extract_strided_slice %1 {offsets = [2, 3, 0, 0], sizes = [1, 1, 3, 4], strides = [1, 1, 1, 1]} : vector<5x5x3x4xbf16> to vector<1x1x3x4xbf16>
    %710 = vector.shape_cast %709 : vector<1x1x3x4xbf16> to vector<3x4xbf16>
    %cst_245 = arith.constant dense<0.000000e+00> : vector<12x4xf32>
    %711 = tpu.matmul %708, %710, %cst_245 {dimension_numbers = #tpu.dot_dimension_numbers<[1], [0], [0], [1], [0, 0, 1, 1], [], []>} : vector<12x3xbf16>, vector<3x4xbf16>, vector<12x4xf32> -> vector<12x4xf32>
    %712 = arith.addf %707, %711 : vector<12x4xf32>
    %713 = vector.extract_strided_slice %692 {offsets = [4, 0], sizes = [12, 3], strides = [1, 1]} : vector<16x3xbf16> to vector<12x3xbf16>
    %714 = vector.extract_strided_slice %1 {offsets = [2, 4, 0, 0], sizes = [1, 1, 3, 4], strides = [1, 1, 1, 1]} : vector<5x5x3x4xbf16> to vector<1x1x3x4xbf16>
    %715 = vector.shape_cast %714 : vector<1x1x3x4xbf16> to vector<3x4xbf16>
    %cst_246 = arith.constant dense<0.000000e+00> : vector<12x4xf32>
    %716 = tpu.matmul %713, %715, %cst_246 {dimension_numbers = #tpu.dot_dimension_numbers<[1], [0], [0], [1], [0, 0, 1, 1], [], []>} : vector<12x3xbf16>, vector<3x4xbf16>, vector<12x4xf32> -> vector<12x4xf32>
    %717 = arith.addf %712, %716 : vector<12x4xf32>
    %c4_i32_247 = arith.constant 4 : i32
    %718 = arith.addi %0, %c4_i32_247 : i32
    %c3_i32_248 = arith.constant 3 : i32
    %719 = arith.addi %718, %c3_i32_248 : i32
    %c0_249 = arith.constant 0 : index
    %720 = arith.index_cast %719 : i32 to index
    %c0_250 = arith.constant 0 : index
    %c0_251 = arith.constant 0 : index
    %721 = vector.load %arg2[%c0_249, %720, %c0_250, %c0_251] : memref<1x16x16x3xbf16, #tpu.memory_space<vmem>>, vector<1x1x16x3xbf16>
    %722 = vector.shape_cast %721 : vector<1x1x16x3xbf16> to vector<16x3xbf16>
    %723 = vector.extract_strided_slice %722 {offsets = [0, 0], sizes = [12, 3], strides = [1, 1]} : vector<16x3xbf16> to vector<12x3xbf16>
    %724 = vector.extract_strided_slice %1 {offsets = [3, 0, 0, 0], sizes = [1, 1, 3, 4], strides = [1, 1, 1, 1]} : vector<5x5x3x4xbf16> to vector<1x1x3x4xbf16>
    %725 = vector.shape_cast %724 : vector<1x1x3x4xbf16> to vector<3x4xbf16>
    %cst_252 = arith.constant dense<0.000000e+00> : vector<12x4xf32>
    %726 = tpu.matmul %723, %725, %cst_252 {dimension_numbers = #tpu.dot_dimension_numbers<[1], [0], [0], [1], [0, 0, 1, 1], [], []>} : vector<12x3xbf16>, vector<3x4xbf16>, vector<12x4xf32> -> vector<12x4xf32>
    %727 = arith.addf %717, %726 : vector<12x4xf32>
    %728 = vector.extract_strided_slice %722 {offsets = [1, 0], sizes = [12, 3], strides = [1, 1]} : vector<16x3xbf16> to vector<12x3xbf16>
    %729 = vector.extract_strided_slice %1 {offsets = [3, 1, 0, 0], sizes = [1, 1, 3, 4], strides = [1, 1, 1, 1]} : vector<5x5x3x4xbf16> to vector<1x1x3x4xbf16>
    %730 = vector.shape_cast %729 : vector<1x1x3x4xbf16> to vector<3x4xbf16>
    %cst_253 = arith.constant dense<0.000000e+00> : vector<12x4xf32>
    %731 = tpu.matmul %728, %730, %cst_253 {dimension_numbers = #tpu.dot_dimension_numbers<[1], [0], [0], [1], [0, 0, 1, 1], [], []>} : vector<12x3xbf16>, vector<3x4xbf16>, vector<12x4xf32> -> vector<12x4xf32>
    %732 = arith.addf %727, %731 : vector<12x4xf32>
    %733 = vector.extract_strided_slice %722 {offsets = [2, 0], sizes = [12, 3], strides = [1, 1]} : vector<16x3xbf16> to vector<12x3xbf16>
    %734 = vector.extract_strided_slice %1 {offsets = [3, 2, 0, 0], sizes = [1, 1, 3, 4], strides = [1, 1, 1, 1]} : vector<5x5x3x4xbf16> to vector<1x1x3x4xbf16>
    %735 = vector.shape_cast %734 : vector<1x1x3x4xbf16> to vector<3x4xbf16>
    %cst_254 = arith.constant dense<0.000000e+00> : vector<12x4xf32>
    %736 = tpu.matmul %733, %735, %cst_254 {dimension_numbers = #tpu.dot_dimension_numbers<[1], [0], [0], [1], [0, 0, 1, 1], [], []>} : vector<12x3xbf16>, vector<3x4xbf16>, vector<12x4xf32> -> vector<12x4xf32>
    %737 = arith.addf %732, %736 : vector<12x4xf32>
    %738 = vector.extract_strided_slice %722 {offsets = [3, 0], sizes = [12, 3], strides = [1, 1]} : vector<16x3xbf16> to vector<12x3xbf16>
    %739 = vector.extract_strided_slice %1 {offsets = [3, 3, 0, 0], sizes = [1, 1, 3, 4], strides = [1, 1, 1, 1]} : vector<5x5x3x4xbf16> to vector<1x1x3x4xbf16>
    %740 = vector.shape_cast %739 : vector<1x1x3x4xbf16> to vector<3x4xbf16>
    %cst_255 = arith.constant dense<0.000000e+00> : vector<12x4xf32>
    %741 = tpu.matmul %738, %740, %cst_255 {dimension_numbers = #tpu.dot_dimension_numbers<[1], [0], [0], [1], [0, 0, 1, 1], [], []>} : vector<12x3xbf16>, vector<3x4xbf16>, vector<12x4xf32> -> vector<12x4xf32>
    %742 = arith.addf %737, %741 : vector<12x4xf32>
    %743 = vector.extract_strided_slice %722 {offsets = [4, 0], sizes = [12, 3], strides = [1, 1]} : vector<16x3xbf16> to vector<12x3xbf16>
    %744 = vector.extract_strided_slice %1 {offsets = [3, 4, 0, 0], sizes = [1, 1, 3, 4], strides = [1, 1, 1, 1]} : vector<5x5x3x4xbf16> to vector<1x1x3x4xbf16>
    %745 = vector.shape_cast %744 : vector<1x1x3x4xbf16> to vector<3x4xbf16>
    %cst_256 = arith.constant dense<0.000000e+00> : vector<12x4xf32>
    %746 = tpu.matmul %743, %745, %cst_256 {dimension_numbers = #tpu.dot_dimension_numbers<[1], [0], [0], [1], [0, 0, 1, 1], [], []>} : vector<12x3xbf16>, vector<3x4xbf16>, vector<12x4xf32> -> vector<12x4xf32>
    %747 = arith.addf %742, %746 : vector<12x4xf32>
    %c4_i32_257 = arith.constant 4 : i32
    %748 = arith.addi %0, %c4_i32_257 : i32
    %c4_i32_258 = arith.constant 4 : i32
    %749 = arith.addi %748, %c4_i32_258 : i32
    %c0_259 = arith.constant 0 : index
    %750 = arith.index_cast %749 : i32 to index
    %c0_260 = arith.constant 0 : index
    %c0_261 = arith.constant 0 : index
    %751 = vector.load %arg2[%c0_259, %750, %c0_260, %c0_261] : memref<1x16x16x3xbf16, #tpu.memory_space<vmem>>, vector<1x1x16x3xbf16>
    %752 = vector.shape_cast %751 : vector<1x1x16x3xbf16> to vector<16x3xbf16>
    %753 = vector.extract_strided_slice %752 {offsets = [0, 0], sizes = [12, 3], strides = [1, 1]} : vector<16x3xbf16> to vector<12x3xbf16>
    %754 = vector.extract_strided_slice %1 {offsets = [4, 0, 0, 0], sizes = [1, 1, 3, 4], strides = [1, 1, 1, 1]} : vector<5x5x3x4xbf16> to vector<1x1x3x4xbf16>
    %755 = vector.shape_cast %754 : vector<1x1x3x4xbf16> to vector<3x4xbf16>
    %cst_262 = arith.constant dense<0.000000e+00> : vector<12x4xf32>
    %756 = tpu.matmul %753, %755, %cst_262 {dimension_numbers = #tpu.dot_dimension_numbers<[1], [0], [0], [1], [0, 0, 1, 1], [], []>} : vector<12x3xbf16>, vector<3x4xbf16>, vector<12x4xf32> -> vector<12x4xf32>
    %757 = arith.addf %747, %756 : vector<12x4xf32>
    %758 = vector.extract_strided_slice %752 {offsets = [1, 0], sizes = [12, 3], strides = [1, 1]} : vector<16x3xbf16> to vector<12x3xbf16>
    %759 = vector.extract_strided_slice %1 {offsets = [4, 1, 0, 0], sizes = [1, 1, 3, 4], strides = [1, 1, 1, 1]} : vector<5x5x3x4xbf16> to vector<1x1x3x4xbf16>
    %760 = vector.shape_cast %759 : vector<1x1x3x4xbf16> to vector<3x4xbf16>
    %cst_263 = arith.constant dense<0.000000e+00> : vector<12x4xf32>
    %761 = tpu.matmul %758, %760, %cst_263 {dimension_numbers = #tpu.dot_dimension_numbers<[1], [0], [0], [1], [0, 0, 1, 1], [], []>} : vector<12x3xbf16>, vector<3x4xbf16>, vector<12x4xf32> -> vector<12x4xf32>
    %762 = arith.addf %757, %761 : vector<12x4xf32>
    %763 = vector.extract_strided_slice %752 {offsets = [2, 0], sizes = [12, 3], strides = [1, 1]} : vector<16x3xbf16> to vector<12x3xbf16>
    %764 = vector.extract_strided_slice %1 {offsets = [4, 2, 0, 0], sizes = [1, 1, 3, 4], strides = [1, 1, 1, 1]} : vector<5x5x3x4xbf16> to vector<1x1x3x4xbf16>
    %765 = vector.shape_cast %764 : vector<1x1x3x4xbf16> to vector<3x4xbf16>
    %cst_264 = arith.constant dense<0.000000e+00> : vector<12x4xf32>
    %766 = tpu.matmul %763, %765, %cst_264 {dimension_numbers = #tpu.dot_dimension_numbers<[1], [0], [0], [1], [0, 0, 1, 1], [], []>} : vector<12x3xbf16>, vector<3x4xbf16>, vector<12x4xf32> -> vector<12x4xf32>
    %767 = arith.addf %762, %766 : vector<12x4xf32>
    %768 = vector.extract_strided_slice %752 {offsets = [3, 0], sizes = [12, 3], strides = [1, 1]} : vector<16x3xbf16> to vector<12x3xbf16>
    %769 = vector.extract_strided_slice %1 {offsets = [4, 3, 0, 0], sizes = [1, 1, 3, 4], strides = [1, 1, 1, 1]} : vector<5x5x3x4xbf16> to vector<1x1x3x4xbf16>
    %770 = vector.shape_cast %769 : vector<1x1x3x4xbf16> to vector<3x4xbf16>
    %cst_265 = arith.constant dense<0.000000e+00> : vector<12x4xf32>
    %771 = tpu.matmul %768, %770, %cst_265 {dimension_numbers = #tpu.dot_dimension_numbers<[1], [0], [0], [1], [0, 0, 1, 1], [], []>} : vector<12x3xbf16>, vector<3x4xbf16>, vector<12x4xf32> -> vector<12x4xf32>
    %772 = arith.addf %767, %771 : vector<12x4xf32>
    %773 = vector.extract_strided_slice %752 {offsets = [4, 0], sizes = [12, 3], strides = [1, 1]} : vector<16x3xbf16> to vector<12x3xbf16>
    %774 = vector.extract_strided_slice %1 {offsets = [4, 4, 0, 0], sizes = [1, 1, 3, 4], strides = [1, 1, 1, 1]} : vector<5x5x3x4xbf16> to vector<1x1x3x4xbf16>
    %775 = vector.shape_cast %774 : vector<1x1x3x4xbf16> to vector<3x4xbf16>
    %cst_266 = arith.constant dense<0.000000e+00> : vector<12x4xf32>
    %776 = tpu.matmul %773, %775, %cst_266 {dimension_numbers = #tpu.dot_dimension_numbers<[1], [0], [0], [1], [0, 0, 1, 1], [], []>} : vector<12x3xbf16>, vector<3x4xbf16>, vector<12x4xf32> -> vector<12x4xf32>
    %777 = arith.addf %772, %776 : vector<12x4xf32>
    %778 = vector.broadcast %2 : vector<1x4xf32> to vector<12x4xf32>
    %779 = arith.addf %777, %778 : vector<12x4xf32>
    %c0_267 = arith.constant 0 : index
    %c4 = arith.constant 4 : index
    %c0_268 = arith.constant 0 : index
    %c0_269 = arith.constant 0 : index
    %780 = vector.load %arg5[%c0_267, %c4, %c0_268, %c0_269] : memref<1x6x12x4xf32, #tpu.memory_space<vmem>>, vector<1x1x12x4xf32>
    %781 = vector.shape_cast %780 : vector<1x1x12x4xf32> to vector<12x4xf32>
    %782 = vector.shape_cast %779 : vector<12x4xf32> to vector<1x1x12x4xf32>
    tpu.vector_store %arg5[%c0_267, %c4, %c0_268, %c0_269], %782 {strides = array<i32>} : memref<1x6x12x4xf32, #tpu.memory_space<vmem>>, vector<1x1x12x4xf32>,
    %cst_270 = arith.constant 0.000000e+00 : f32
    %783 = vector.broadcast %cst_270 : f32 to vector<12x4xf32>
    %c5_i32 = arith.constant 5 : i32
    %784 = arith.addi %0, %c5_i32 : i32
    %c0_i32_271 = arith.constant 0 : i32
    %785 = arith.addi %784, %c0_i32_271 : i32
    %c0_272 = arith.constant 0 : index
    %786 = arith.index_cast %785 : i32 to index
    %c0_273 = arith.constant 0 : index
    %c0_274 = arith.constant 0 : index
    %787 = vector.load %arg2[%c0_272, %786, %c0_273, %c0_274] : memref<1x16x16x3xbf16, #tpu.memory_space<vmem>>, vector<1x1x16x3xbf16>
    %788 = vector.shape_cast %787 : vector<1x1x16x3xbf16> to vector<16x3xbf16>
    %789 = vector.extract_strided_slice %788 {offsets = [0, 0], sizes = [12, 3], strides = [1, 1]} : vector<16x3xbf16> to vector<12x3xbf16>
    %790 = vector.extract_strided_slice %1 {offsets = [0, 0, 0, 0], sizes = [1, 1, 3, 4], strides = [1, 1, 1, 1]} : vector<5x5x3x4xbf16> to vector<1x1x3x4xbf16>
    %791 = vector.shape_cast %790 : vector<1x1x3x4xbf16> to vector<3x4xbf16>
    %cst_275 = arith.constant dense<0.000000e+00> : vector<12x4xf32>
    %792 = tpu.matmul %789, %791, %cst_275 {dimension_numbers = #tpu.dot_dimension_numbers<[1], [0], [0], [1], [0, 0, 1, 1], [], []>} : vector<12x3xbf16>, vector<3x4xbf16>, vector<12x4xf32> -> vector<12x4xf32>
    %793 = arith.addf %783, %792 : vector<12x4xf32>
    %794 = vector.extract_strided_slice %788 {offsets = [1, 0], sizes = [12, 3], strides = [1, 1]} : vector<16x3xbf16> to vector<12x3xbf16>
    %795 = vector.extract_strided_slice %1 {offsets = [0, 1, 0, 0], sizes = [1, 1, 3, 4], strides = [1, 1, 1, 1]} : vector<5x5x3x4xbf16> to vector<1x1x3x4xbf16>
    %796 = vector.shape_cast %795 : vector<1x1x3x4xbf16> to vector<3x4xbf16>
    %cst_276 = arith.constant dense<0.000000e+00> : vector<12x4xf32>
    %797 = tpu.matmul %794, %796, %cst_276 {dimension_numbers = #tpu.dot_dimension_numbers<[1], [0], [0], [1], [0, 0, 1, 1], [], []>} : vector<12x3xbf16>, vector<3x4xbf16>, vector<12x4xf32> -> vector<12x4xf32>
    %798 = arith.addf %793, %797 : vector<12x4xf32>
    %799 = vector.extract_strided_slice %788 {offsets = [2, 0], sizes = [12, 3], strides = [1, 1]} : vector<16x3xbf16> to vector<12x3xbf16>
    %800 = vector.extract_strided_slice %1 {offsets = [0, 2, 0, 0], sizes = [1, 1, 3, 4], strides = [1, 1, 1, 1]} : vector<5x5x3x4xbf16> to vector<1x1x3x4xbf16>
    %801 = vector.shape_cast %800 : vector<1x1x3x4xbf16> to vector<3x4xbf16>
    %cst_277 = arith.constant dense<0.000000e+00> : vector<12x4xf32>
    %802 = tpu.matmul %799, %801, %cst_277 {dimension_numbers = #tpu.dot_dimension_numbers<[1], [0], [0], [1], [0, 0, 1, 1], [], []>} : vector<12x3xbf16>, vector<3x4xbf16>, vector<12x4xf32> -> vector<12x4xf32>
    %803 = arith.addf %798, %802 : vector<12x4xf32>
    %804 = vector.extract_strided_slice %788 {offsets = [3, 0], sizes = [12, 3], strides = [1, 1]} : vector<16x3xbf16> to vector<12x3xbf16>
    %805 = vector.extract_strided_slice %1 {offsets = [0, 3, 0, 0], sizes = [1, 1, 3, 4], strides = [1, 1, 1, 1]} : vector<5x5x3x4xbf16> to vector<1x1x3x4xbf16>
    %806 = vector.shape_cast %805 : vector<1x1x3x4xbf16> to vector<3x4xbf16>
    %cst_278 = arith.constant dense<0.000000e+00> : vector<12x4xf32>
    %807 = tpu.matmul %804, %806, %cst_278 {dimension_numbers = #tpu.dot_dimension_numbers<[1], [0], [0], [1], [0, 0, 1, 1], [], []>} : vector<12x3xbf16>, vector<3x4xbf16>, vector<12x4xf32> -> vector<12x4xf32>
    %808 = arith.addf %803, %807 : vector<12x4xf32>
    %809 = vector.extract_strided_slice %788 {offsets = [4, 0], sizes = [12, 3], strides = [1, 1]} : vector<16x3xbf16> to vector<12x3xbf16>
    %810 = vector.extract_strided_slice %1 {offsets = [0, 4, 0, 0], sizes = [1, 1, 3, 4], strides = [1, 1, 1, 1]} : vector<5x5x3x4xbf16> to vector<1x1x3x4xbf16>
    %811 = vector.shape_cast %810 : vector<1x1x3x4xbf16> to vector<3x4xbf16>
    %cst_279 = arith.constant dense<0.000000e+00> : vector<12x4xf32>
    %812 = tpu.matmul %809, %811, %cst_279 {dimension_numbers = #tpu.dot_dimension_numbers<[1], [0], [0], [1], [0, 0, 1, 1], [], []>} : vector<12x3xbf16>, vector<3x4xbf16>, vector<12x4xf32> -> vector<12x4xf32>
    %813 = arith.addf %808, %812 : vector<12x4xf32>
    %c5_i32_280 = arith.constant 5 : i32
    %814 = arith.addi %0, %c5_i32_280 : i32
    %c1_i32_281 = arith.constant 1 : i32
    %815 = arith.addi %814, %c1_i32_281 : i32
    %c0_282 = arith.constant 0 : index
    %816 = arith.index_cast %815 : i32 to index
    %c0_283 = arith.constant 0 : index
    %c0_284 = arith.constant 0 : index
    %817 = vector.load %arg2[%c0_282, %816, %c0_283, %c0_284] : memref<1x16x16x3xbf16, #tpu.memory_space<vmem>>, vector<1x1x16x3xbf16>
    %818 = vector.shape_cast %817 : vector<1x1x16x3xbf16> to vector<16x3xbf16>
    %819 = vector.extract_strided_slice %818 {offsets = [0, 0], sizes = [12, 3], strides = [1, 1]} : vector<16x3xbf16> to vector<12x3xbf16>
    %820 = vector.extract_strided_slice %1 {offsets = [1, 0, 0, 0], sizes = [1, 1, 3, 4], strides = [1, 1, 1, 1]} : vector<5x5x3x4xbf16> to vector<1x1x3x4xbf16>
    %821 = vector.shape_cast %820 : vector<1x1x3x4xbf16> to vector<3x4xbf16>
    %cst_285 = arith.constant dense<0.000000e+00> : vector<12x4xf32>
    %822 = tpu.matmul %819, %821, %cst_285 {dimension_numbers = #tpu.dot_dimension_numbers<[1], [0], [0], [1], [0, 0, 1, 1], [], []>} : vector<12x3xbf16>, vector<3x4xbf16>, vector<12x4xf32> -> vector<12x4xf32>
    %823 = arith.addf %813, %822 : vector<12x4xf32>
    %824 = vector.extract_strided_slice %818 {offsets = [1, 0], sizes = [12, 3], strides = [1, 1]} : vector<16x3xbf16> to vector<12x3xbf16>
    %825 = vector.extract_strided_slice %1 {offsets = [1, 1, 0, 0], sizes = [1, 1, 3, 4], strides = [1, 1, 1, 1]} : vector<5x5x3x4xbf16> to vector<1x1x3x4xbf16>
    %826 = vector.shape_cast %825 : vector<1x1x3x4xbf16> to vector<3x4xbf16>
    %cst_286 = arith.constant dense<0.000000e+00> : vector<12x4xf32>
    %827 = tpu.matmul %824, %826, %cst_286 {dimension_numbers = #tpu.dot_dimension_numbers<[1], [0], [0], [1], [0, 0, 1, 1], [], []>} : vector<12x3xbf16>, vector<3x4xbf16>, vector<12x4xf32> -> vector<12x4xf32>
    %828 = arith.addf %823, %827 : vector<12x4xf32>
    %829 = vector.extract_strided_slice %818 {offsets = [2, 0], sizes = [12, 3], strides = [1, 1]} : vector<16x3xbf16> to vector<12x3xbf16>
    %830 = vector.extract_strided_slice %1 {offsets = [1, 2, 0, 0], sizes = [1, 1, 3, 4], strides = [1, 1, 1, 1]} : vector<5x5x3x4xbf16> to vector<1x1x3x4xbf16>
    %831 = vector.shape_cast %830 : vector<1x1x3x4xbf16> to vector<3x4xbf16>
    %cst_287 = arith.constant dense<0.000000e+00> : vector<12x4xf32>
    %832 = tpu.matmul %829, %831, %cst_287 {dimension_numbers = #tpu.dot_dimension_numbers<[1], [0], [0], [1], [0, 0, 1, 1], [], []>} : vector<12x3xbf16>, vector<3x4xbf16>, vector<12x4xf32> -> vector<12x4xf32>
    %833 = arith.addf %828, %832 : vector<12x4xf32>
    %834 = vector.extract_strided_slice %818 {offsets = [3, 0], sizes = [12, 3], strides = [1, 1]} : vector<16x3xbf16> to vector<12x3xbf16>
    %835 = vector.extract_strided_slice %1 {offsets = [1, 3, 0, 0], sizes = [1, 1, 3, 4], strides = [1, 1, 1, 1]} : vector<5x5x3x4xbf16> to vector<1x1x3x4xbf16>
    %836 = vector.shape_cast %835 : vector<1x1x3x4xbf16> to vector<3x4xbf16>
    %cst_288 = arith.constant dense<0.000000e+00> : vector<12x4xf32>
    %837 = tpu.matmul %834, %836, %cst_288 {dimension_numbers = #tpu.dot_dimension_numbers<[1], [0], [0], [1], [0, 0, 1, 1], [], []>} : vector<12x3xbf16>, vector<3x4xbf16>, vector<12x4xf32> -> vector<12x4xf32>
    %838 = arith.addf %833, %837 : vector<12x4xf32>
    %839 = vector.extract_strided_slice %818 {offsets = [4, 0], sizes = [12, 3], strides = [1, 1]} : vector<16x3xbf16> to vector<12x3xbf16>
    %840 = vector.extract_strided_slice %1 {offsets = [1, 4, 0, 0], sizes = [1, 1, 3, 4], strides = [1, 1, 1, 1]} : vector<5x5x3x4xbf16> to vector<1x1x3x4xbf16>
    %841 = vector.shape_cast %840 : vector<1x1x3x4xbf16> to vector<3x4xbf16>
    %cst_289 = arith.constant dense<0.000000e+00> : vector<12x4xf32>
    %842 = tpu.matmul %839, %841, %cst_289 {dimension_numbers = #tpu.dot_dimension_numbers<[1], [0], [0], [1], [0, 0, 1, 1], [], []>} : vector<12x3xbf16>, vector<3x4xbf16>, vector<12x4xf32> -> vector<12x4xf32>
    %843 = arith.addf %838, %842 : vector<12x4xf32>
    %c5_i32_290 = arith.constant 5 : i32
    %844 = arith.addi %0, %c5_i32_290 : i32
    %c2_i32_291 = arith.constant 2 : i32
    %845 = arith.addi %844, %c2_i32_291 : i32
    %c0_292 = arith.constant 0 : index
    %846 = arith.index_cast %845 : i32 to index
    %c0_293 = arith.constant 0 : index
    %c0_294 = arith.constant 0 : index
    %847 = vector.load %arg2[%c0_292, %846, %c0_293, %c0_294] : memref<1x16x16x3xbf16, #tpu.memory_space<vmem>>, vector<1x1x16x3xbf16>
    %848 = vector.shape_cast %847 : vector<1x1x16x3xbf16> to vector<16x3xbf16>
    %849 = vector.extract_strided_slice %848 {offsets = [0, 0], sizes = [12, 3], strides = [1, 1]} : vector<16x3xbf16> to vector<12x3xbf16>
    %850 = vector.extract_strided_slice %1 {offsets = [2, 0, 0, 0], sizes = [1, 1, 3, 4], strides = [1, 1, 1, 1]} : vector<5x5x3x4xbf16> to vector<1x1x3x4xbf16>
    %851 = vector.shape_cast %850 : vector<1x1x3x4xbf16> to vector<3x4xbf16>
    %cst_295 = arith.constant dense<0.000000e+00> : vector<12x4xf32>
    %852 = tpu.matmul %849, %851, %cst_295 {dimension_numbers = #tpu.dot_dimension_numbers<[1], [0], [0], [1], [0, 0, 1, 1], [], []>} : vector<12x3xbf16>, vector<3x4xbf16>, vector<12x4xf32> -> vector<12x4xf32>
    %853 = arith.addf %843, %852 : vector<12x4xf32>
    %854 = vector.extract_strided_slice %848 {offsets = [1, 0], sizes = [12, 3], strides = [1, 1]} : vector<16x3xbf16> to vector<12x3xbf16>
    %855 = vector.extract_strided_slice %1 {offsets = [2, 1, 0, 0], sizes = [1, 1, 3, 4], strides = [1, 1, 1, 1]} : vector<5x5x3x4xbf16> to vector<1x1x3x4xbf16>
    %856 = vector.shape_cast %855 : vector<1x1x3x4xbf16> to vector<3x4xbf16>
    %cst_296 = arith.constant dense<0.000000e+00> : vector<12x4xf32>
    %857 = tpu.matmul %854, %856, %cst_296 {dimension_numbers = #tpu.dot_dimension_numbers<[1], [0], [0], [1], [0, 0, 1, 1], [], []>} : vector<12x3xbf16>, vector<3x4xbf16>, vector<12x4xf32> -> vector<12x4xf32>
    %858 = arith.addf %853, %857 : vector<12x4xf32>
    %859 = vector.extract_strided_slice %848 {offsets = [2, 0], sizes = [12, 3], strides = [1, 1]} : vector<16x3xbf16> to vector<12x3xbf16>
    %860 = vector.extract_strided_slice %1 {offsets = [2, 2, 0, 0], sizes = [1, 1, 3, 4], strides = [1, 1, 1, 1]} : vector<5x5x3x4xbf16> to vector<1x1x3x4xbf16>
    %861 = vector.shape_cast %860 : vector<1x1x3x4xbf16> to vector<3x4xbf16>
    %cst_297 = arith.constant dense<0.000000e+00> : vector<12x4xf32>
    %862 = tpu.matmul %859, %861, %cst_297 {dimension_numbers = #tpu.dot_dimension_numbers<[1], [0], [0], [1], [0, 0, 1, 1], [], []>} : vector<12x3xbf16>, vector<3x4xbf16>, vector<12x4xf32> -> vector<12x4xf32>
    %863 = arith.addf %858, %862 : vector<12x4xf32>
    %864 = vector.extract_strided_slice %848 {offsets = [3, 0], sizes = [12, 3], strides = [1, 1]} : vector<16x3xbf16> to vector<12x3xbf16>
    %865 = vector.extract_strided_slice %1 {offsets = [2, 3, 0, 0], sizes = [1, 1, 3, 4], strides = [1, 1, 1, 1]} : vector<5x5x3x4xbf16> to vector<1x1x3x4xbf16>
    %866 = vector.shape_cast %865 : vector<1x1x3x4xbf16> to vector<3x4xbf16>
    %cst_298 = arith.constant dense<0.000000e+00> : vector<12x4xf32>
    %867 = tpu.matmul %864, %866, %cst_298 {dimension_numbers = #tpu.dot_dimension_numbers<[1], [0], [0], [1], [0, 0, 1, 1], [], []>} : vector<12x3xbf16>, vector<3x4xbf16>, vector<12x4xf32> -> vector<12x4xf32>
    %868 = arith.addf %863, %867 : vector<12x4xf32>
    %869 = vector.extract_strided_slice %848 {offsets = [4, 0], sizes = [12, 3], strides = [1, 1]} : vector<16x3xbf16> to vector<12x3xbf16>
    %870 = vector.extract_strided_slice %1 {offsets = [2, 4, 0, 0], sizes = [1, 1, 3, 4], strides = [1, 1, 1, 1]} : vector<5x5x3x4xbf16> to vector<1x1x3x4xbf16>
    %871 = vector.shape_cast %870 : vector<1x1x3x4xbf16> to vector<3x4xbf16>
    %cst_299 = arith.constant dense<0.000000e+00> : vector<12x4xf32>
    %872 = tpu.matmul %869, %871, %cst_299 {dimension_numbers = #tpu.dot_dimension_numbers<[1], [0], [0], [1], [0, 0, 1, 1], [], []>} : vector<12x3xbf16>, vector<3x4xbf16>, vector<12x4xf32> -> vector<12x4xf32>
    %873 = arith.addf %868, %872 : vector<12x4xf32>
    %c5_i32_300 = arith.constant 5 : i32
    %874 = arith.addi %0, %c5_i32_300 : i32
    %c3_i32_301 = arith.constant 3 : i32
    %875 = arith.addi %874, %c3_i32_301 : i32
    %c0_302 = arith.constant 0 : index
    %876 = arith.index_cast %875 : i32 to index
    %c0_303 = arith.constant 0 : index
    %c0_304 = arith.constant 0 : index
    %877 = vector.load %arg2[%c0_302, %876, %c0_303, %c0_304] : memref<1x16x16x3xbf16, #tpu.memory_space<vmem>>, vector<1x1x16x3xbf16>
    %878 = vector.shape_cast %877 : vector<1x1x16x3xbf16> to vector<16x3xbf16>
    %879 = vector.extract_strided_slice %878 {offsets = [0, 0], sizes = [12, 3], strides = [1, 1]} : vector<16x3xbf16> to vector<12x3xbf16>
    %880 = vector.extract_strided_slice %1 {offsets = [3, 0, 0, 0], sizes = [1, 1, 3, 4], strides = [1, 1, 1, 1]} : vector<5x5x3x4xbf16> to vector<1x1x3x4xbf16>
    %881 = vector.shape_cast %880 : vector<1x1x3x4xbf16> to vector<3x4xbf16>
    %cst_305 = arith.constant dense<0.000000e+00> : vector<12x4xf32>
    %882 = tpu.matmul %879, %881, %cst_305 {dimension_numbers = #tpu.dot_dimension_numbers<[1], [0], [0], [1], [0, 0, 1, 1], [], []>} : vector<12x3xbf16>, vector<3x4xbf16>, vector<12x4xf32> -> vector<12x4xf32>
    %883 = arith.addf %873, %882 : vector<12x4xf32>
    %884 = vector.extract_strided_slice %878 {offsets = [1, 0], sizes = [12, 3], strides = [1, 1]} : vector<16x3xbf16> to vector<12x3xbf16>
    %885 = vector.extract_strided_slice %1 {offsets = [3, 1, 0, 0], sizes = [1, 1, 3, 4], strides = [1, 1, 1, 1]} : vector<5x5x3x4xbf16> to vector<1x1x3x4xbf16>
    %886 = vector.shape_cast %885 : vector<1x1x3x4xbf16> to vector<3x4xbf16>
    %cst_306 = arith.constant dense<0.000000e+00> : vector<12x4xf32>
    %887 = tpu.matmul %884, %886, %cst_306 {dimension_numbers = #tpu.dot_dimension_numbers<[1], [0], [0], [1], [0, 0, 1, 1], [], []>} : vector<12x3xbf16>, vector<3x4xbf16>, vector<12x4xf32> -> vector<12x4xf32>
    %888 = arith.addf %883, %887 : vector<12x4xf32>
    %889 = vector.extract_strided_slice %878 {offsets = [2, 0], sizes = [12, 3], strides = [1, 1]} : vector<16x3xbf16> to vector<12x3xbf16>
    %890 = vector.extract_strided_slice %1 {offsets = [3, 2, 0, 0], sizes = [1, 1, 3, 4], strides = [1, 1, 1, 1]} : vector<5x5x3x4xbf16> to vector<1x1x3x4xbf16>
    %891 = vector.shape_cast %890 : vector<1x1x3x4xbf16> to vector<3x4xbf16>
    %cst_307 = arith.constant dense<0.000000e+00> : vector<12x4xf32>
    %892 = tpu.matmul %889, %891, %cst_307 {dimension_numbers = #tpu.dot_dimension_numbers<[1], [0], [0], [1], [0, 0, 1, 1], [], []>} : vector<12x3xbf16>, vector<3x4xbf16>, vector<12x4xf32> -> vector<12x4xf32>
    %893 = arith.addf %888, %892 : vector<12x4xf32>
    %894 = vector.extract_strided_slice %878 {offsets = [3, 0], sizes = [12, 3], strides = [1, 1]} : vector<16x3xbf16> to vector<12x3xbf16>
    %895 = vector.extract_strided_slice %1 {offsets = [3, 3, 0, 0], sizes = [1, 1, 3, 4], strides = [1, 1, 1, 1]} : vector<5x5x3x4xbf16> to vector<1x1x3x4xbf16>
    %896 = vector.shape_cast %895 : vector<1x1x3x4xbf16> to vector<3x4xbf16>
    %cst_308 = arith.constant dense<0.000000e+00> : vector<12x4xf32>
    %897 = tpu.matmul %894, %896, %cst_308 {dimension_numbers = #tpu.dot_dimension_numbers<[1], [0], [0], [1], [0, 0, 1, 1], [], []>} : vector<12x3xbf16>, vector<3x4xbf16>, vector<12x4xf32> -> vector<12x4xf32>
    %898 = arith.addf %893, %897 : vector<12x4xf32>
    %899 = vector.extract_strided_slice %878 {offsets = [4, 0], sizes = [12, 3], strides = [1, 1]} : vector<16x3xbf16> to vector<12x3xbf16>
    %900 = vector.extract_strided_slice %1 {offsets = [3, 4, 0, 0], sizes = [1, 1, 3, 4], strides = [1, 1, 1, 1]} : vector<5x5x3x4xbf16> to vector<1x1x3x4xbf16>
    %901 = vector.shape_cast %900 : vector<1x1x3x4xbf16> to vector<3x4xbf16>
    %cst_309 = arith.constant dense<0.000000e+00> : vector<12x4xf32>
    %902 = tpu.matmul %899, %901, %cst_309 {dimension_numbers = #tpu.dot_dimension_numbers<[1], [0], [0], [1], [0, 0, 1, 1], [], []>} : vector<12x3xbf16>, vector<3x4xbf16>, vector<12x4xf32> -> vector<12x4xf32>
    %903 = arith.addf %898, %902 : vector<12x4xf32>
    %c5_i32_310 = arith.constant 5 : i32
    %904 = arith.addi %0, %c5_i32_310 : i32
    %c4_i32_311 = arith.constant 4 : i32
    %905 = arith.addi %904, %c4_i32_311 : i32
    %c0_312 = arith.constant 0 : index
    %906 = arith.index_cast %905 : i32 to index
    %c0_313 = arith.constant 0 : index
    %c0_314 = arith.constant 0 : index
    %907 = vector.load %arg2[%c0_312, %906, %c0_313, %c0_314] : memref<1x16x16x3xbf16, #tpu.memory_space<vmem>>, vector<1x1x16x3xbf16>
    %908 = vector.shape_cast %907 : vector<1x1x16x3xbf16> to vector<16x3xbf16>
    %909 = vector.extract_strided_slice %908 {offsets = [0, 0], sizes = [12, 3], strides = [1, 1]} : vector<16x3xbf16> to vector<12x3xbf16>
    %910 = vector.extract_strided_slice %1 {offsets = [4, 0, 0, 0], sizes = [1, 1, 3, 4], strides = [1, 1, 1, 1]} : vector<5x5x3x4xbf16> to vector<1x1x3x4xbf16>
    %911 = vector.shape_cast %910 : vector<1x1x3x4xbf16> to vector<3x4xbf16>
    %cst_315 = arith.constant dense<0.000000e+00> : vector<12x4xf32>
    %912 = tpu.matmul %909, %911, %cst_315 {dimension_numbers = #tpu.dot_dimension_numbers<[1], [0], [0], [1], [0, 0, 1, 1], [], []>} : vector<12x3xbf16>, vector<3x4xbf16>, vector<12x4xf32> -> vector<12x4xf32>
    %913 = arith.addf %903, %912 : vector<12x4xf32>
    %914 = vector.extract_strided_slice %908 {offsets = [1, 0], sizes = [12, 3], strides = [1, 1]} : vector<16x3xbf16> to vector<12x3xbf16>
    %915 = vector.extract_strided_slice %1 {offsets = [4, 1, 0, 0], sizes = [1, 1, 3, 4], strides = [1, 1, 1, 1]} : vector<5x5x3x4xbf16> to vector<1x1x3x4xbf16>
    %916 = vector.shape_cast %915 : vector<1x1x3x4xbf16> to vector<3x4xbf16>
    %cst_316 = arith.constant dense<0.000000e+00> : vector<12x4xf32>
    %917 = tpu.matmul %914, %916, %cst_316 {dimension_numbers = #tpu.dot_dimension_numbers<[1], [0], [0], [1], [0, 0, 1, 1], [], []>} : vector<12x3xbf16>, vector<3x4xbf16>, vector<12x4xf32> -> vector<12x4xf32>
    %918 = arith.addf %913, %917 : vector<12x4xf32>
    %919 = vector.extract_strided_slice %908 {offsets = [2, 0], sizes = [12, 3], strides = [1, 1]} : vector<16x3xbf16> to vector<12x3xbf16>
    %920 = vector.extract_strided_slice %1 {offsets = [4, 2, 0, 0], sizes = [1, 1, 3, 4], strides = [1, 1, 1, 1]} : vector<5x5x3x4xbf16> to vector<1x1x3x4xbf16>
    %921 = vector.shape_cast %920 : vector<1x1x3x4xbf16> to vector<3x4xbf16>
    %cst_317 = arith.constant dense<0.000000e+00> : vector<12x4xf32>
    %922 = tpu.matmul %919, %921, %cst_317 {dimension_numbers = #tpu.dot_dimension_numbers<[1], [0], [0], [1], [0, 0, 1, 1], [], []>} : vector<12x3xbf16>, vector<3x4xbf16>, vector<12x4xf32> -> vector<12x4xf32>
    %923 = arith.addf %918, %922 : vector<12x4xf32>
    %924 = vector.extract_strided_slice %908 {offsets = [3, 0], sizes = [12, 3], strides = [1, 1]} : vector<16x3xbf16> to vector<12x3xbf16>
    %925 = vector.extract_strided_slice %1 {offsets = [4, 3, 0, 0], sizes = [1, 1, 3, 4], strides = [1, 1, 1, 1]} : vector<5x5x3x4xbf16> to vector<1x1x3x4xbf16>
    %926 = vector.shape_cast %925 : vector<1x1x3x4xbf16> to vector<3x4xbf16>
    %cst_318 = arith.constant dense<0.000000e+00> : vector<12x4xf32>
    %927 = tpu.matmul %924, %926, %cst_318 {dimension_numbers = #tpu.dot_dimension_numbers<[1], [0], [0], [1], [0, 0, 1, 1], [], []>} : vector<12x3xbf16>, vector<3x4xbf16>, vector<12x4xf32> -> vector<12x4xf32>
    %928 = arith.addf %923, %927 : vector<12x4xf32>
    %929 = vector.extract_strided_slice %908 {offsets = [4, 0], sizes = [12, 3], strides = [1, 1]} : vector<16x3xbf16> to vector<12x3xbf16>
    %930 = vector.extract_strided_slice %1 {offsets = [4, 4, 0, 0], sizes = [1, 1, 3, 4], strides = [1, 1, 1, 1]} : vector<5x5x3x4xbf16> to vector<1x1x3x4xbf16>
    %931 = vector.shape_cast %930 : vector<1x1x3x4xbf16> to vector<3x4xbf16>
    %cst_319 = arith.constant dense<0.000000e+00> : vector<12x4xf32>
    %932 = tpu.matmul %929, %931, %cst_319 {dimension_numbers = #tpu.dot_dimension_numbers<[1], [0], [0], [1], [0, 0, 1, 1], [], []>} : vector<12x3xbf16>, vector<3x4xbf16>, vector<12x4xf32> -> vector<12x4xf32>
    %933 = arith.addf %928, %932 : vector<12x4xf32>
    %934 = vector.broadcast %2 : vector<1x4xf32> to vector<12x4xf32>
    %935 = arith.addf %933, %934 : vector<12x4xf32>
    %c0_320 = arith.constant 0 : index
    %c5 = arith.constant 5 : index
    %c0_321 = arith.constant 0 : index
    %c0_322 = arith.constant 0 : index
    %936 = vector.load %arg5[%c0_320, %c5, %c0_321, %c0_322] : memref<1x6x12x4xf32, #tpu.memory_space<vmem>>, vector<1x1x12x4xf32>
    %937 = vector.shape_cast %936 : vector<1x1x12x4xf32> to vector<12x4xf32>
    %938 = vector.shape_cast %935 : vector<12x4xf32> to vector<1x1x12x4xf32>
    tpu.vector_store %arg5[%c0_320, %c5, %c0_321, %c0_322], %938 {strides = array<i32>} : memref<1x6x12x4xf32, #tpu.memory_space<vmem>>, vector<1x1x12x4xf32>,
    return
  }
  func.func @transform_0(%arg0: i32, %arg1: i32) -> (i32, i32, i32, i32) {
    %c0_i32 = arith.constant 0 : i32
    %c0_i32_0 = arith.constant 0 : i32
    %c0_i32_1 = arith.constant 0 : i32
    %c0_i32_2 = arith.constant 0 : i32
    return %arg0, %c0_i32, %c0_i32_0, %c0_i32_1 : i32, i32, i32, i32
  }
  func.func @transform_1(%arg0: i32, %arg1: i32) -> (i32, i32, i32, i32) {
    %c0_i32 = arith.constant 0 : i32
    %c0_i32_0 = arith.constant 0 : i32
    %c0_i32_1 = arith.constant 0 : i32
    %c0_i32_2 = arith.constant 0 : i32
    %c0_i32_3 = arith.constant 0 : i32
    return %c0_i32, %c0_i32_0, %c0_i32_1, %c0_i32_2 : i32, i32, i32, i32
  }
  func.func @transform_2(%arg0: i32, %arg1: i32) -> (i32, i32) {
    %c0_i32 = arith.constant 0 : i32
    %c0_i32_0 = arith.constant 0 : i32
    %c0_i32_1 = arith.constant 0 : i32
    return %c0_i32, %c0_i32_0 : i32, i32
  }
  func.func @transform_3(%arg0: i32, %arg1: i32) -> (i32, i32, i32, i32) {
    %c0_i32 = arith.constant 0 : i32
    %c0_i32_0 = arith.constant 0 : i32
    %c0_i32_1 = arith.constant 0 : i32
    return %arg0, %arg1, %c0_i32, %c0_i32_0 : i32, i32, i32, i32
  }
}

</mosaic_0001>

<bundles_post_ra>
// kernel: tpu_custom_call.1
= control target key start
LH: loop header
LB: loop body
LE: loop exit
PB: predicated region body
PF: predicated region fallthrough
CT: control target
= control target key end

     0   :  { %s9536_s12 = smov 0   ;;  %s9538_s13 = smov 0   ;;  %s10961_s0 = inlined_call_operand.vmem [shape: bf16[2,16,16,3], index: 0, kind: input, shape index: {}]   ;;  %s10962_s1 = inlined_call_operand.vmem [shape: bf16[5,5,3,4], index: 1, kind: input, shape index: {}]   ;;  %s10963_s2 = inlined_call_operand.vmem [shape: f32[1,4], index: 2, kind: input, shape index: {}]   ;;  %s10964_s3 = inlined_call_operand.vmem [shape: f32[2,12,12,4], index: 3, kind: output, shape index: {}]  }
   0x1   :  { %s9540_s14 = smov 0   ;;  %s9542_s15 = smov 0  }
   0x2   :  { %s9544_s16 = smov 0  }
   0x3 LB: > { %s22_s17 = sadd.s32 1, %s9503_s14  ;;  %s25_s18 = sadd.s32 1, %s9507_s15  ;;  %s9511_s16 = sphi %s9544_s16, %s13_s16   ;;  %s9507_s15 = sphi %s9542_s15, %s10969_s15   ;;  %s9503_s14 = sphi %s9540_s14, %s10968_s14   ;;  %s9499_s13 = sphi %s9538_s13, %s10967_s13   ;;  %s9495_s12 = sphi %s9536_s12, %s10966_s12  }
   0x4   : > { %p23_p0 = scmp.ge.s32.totalorder %s22_s17, 2  ;;  %p7928_p1 = scmp.ge.s32.totalorder %s9511_s16, 1 }
   0x5   : > { %p151_p2 = scmp.lt.s32.totalorder %s9511_s16, 5 }
   0x6   : > { %s10971_s17 = smov (%p23_p0, %s22_s17), 0  ;;  %s10973_s18 = smov (!%p23_p0, %s25_s18), %s9507_s15 }
   0x7   : > { %p152_p3 = pnand %p7928_p1, %p151_p2  ;;  %p27_p4 = scmp.ge.s32.totalorder %s10973_s18, 2 }
   0x8   : > { %p180_p5 = scmp.lt.s32.totalorder (!%p152_p3), %s9499_s13, 1  ;;  %s8196_s23 = smul.u32 (!%p152_p3), 48, %s9495_s12 }
   0x9   : > { %s10975_s18 = smov (%p27_p4, %s10973_s18), 0  ;;  %155 = sbr.rel (%p152_p3) target bundleno = 822 (0x336), region = 32 }
   0xa   : > { %s185_s10 = smul.u32 (!%p152_p3), 6, %s9495_s12 }
   0xc   : > { %p10213_p6 = scmp.lt.s32.totalorder (!%p152_p3), %s185_s10, 11 }
   0xe   : > { %v198_v0 = vld [vmem:[%s10962_s1] sm:$0x3]  ;;  %vm245_vm0 = vcmask 1040384   ;;  %vm246_vm1 = vcmask 1041408   ;;  %v9513_v1 = vmov 0.0   ;;  %v9514_v2 = vmov 65535  }
   0xf   : > { %8503 = vmatprep.subr.bf16.mxu1 %v9513_v1  ;;  %v247_v3 = vsel %vm245_vm0, 4294967295, %v9514_v2  ;;  %8497 = vmatprep.subr.bf16.mxu0 %v9513_v1  ;;  %v199_v4 = vld [vmem:[%s10962_s1 + $0x2] sm:$0x3]  ;;  %vm9515_vm2 = vmmov 0   ;;  %s10977_s13 = smov (!%p180_p5, %s9499_s13), 1  ;;  %vm241_vm3 = vcmask 23552  }
  0x10   : > { %v9579_v5 = vsel %vm246_vm1, %v247_v3, 0  ;;  %8505 = vmatprep.mubr.msk.bf16.mxu1 %vm9515_vm2, %v9513_v1  ;;  %8499 = vmatprep.mubr.msk.bf16.mxu0 %vm9515_vm2, %v9513_v1  ;;  %v201_v8 = vld [vmem:[%s10962_s1 + $0x6] sm:$0x3]  ;;  %s8195_s26 = sshll.u32 %s10977_s13, 7  ;;  %v200_v13 = vld [vmem:[%s10962_s1 + $0x4] sm:$0x3] }
  0x11   : > { %v9587_v6 = vand.u32 %v9579_v5, %v198_v0  ;;  %v9590_v7 = vand.u32 %v9579_v5, %v199_v4  ;;  %s184_s29 = scalar_lea.vmem %s10961_s0, %s8195_s26  ;;  %v9609_v9 = vand.u32 %v9579_v5, %v201_v8  ;;  %v203_v14 = vld [vmem:[%s10962_s1 + $0xa] sm:$0x3]  ;;  %v9624_v18 = vand.u32 %v9579_v5, %v200_v13  ;;  %v202_v22 = vld [vmem:[%s10962_s1 + $0x8] sm:$0x3]  ;;  %v205_v24 = vld [vmem:[%s10962_s1 + $0xe] sm:$0x3] }
  0x12   : > { %s9606_s30 = scalar_lea.vmem %s184_s29, %s8196_s23  ;;  %v9627_v21 = vand.u32 %v9579_v5, %v203_v14  ;;  %v9646_v25 = vand.u32 %v9579_v5, %v202_v22  ;;  %v9650_v27 = vand.u32 %v9579_v5, %v205_v24  ;;  %v204_v28 = vld [vmem:[%s10962_s1 + $0xc] sm:$0x3]  ;;  %v207_v30 = vld [vmem:[%s10962_s1 + $0x12] sm:$0x3]  ;;  %v206_v38 = vld [vmem:[%s10962_s1 + $0x10] sm:$0x3] }
  0x13   : > { %8504 = vmatpush3.bf16.msra.mxu1 %v9587_v6  ;;  %8498 = vmatpush3.bf16.msra.mxu0 %v9590_v7  ;;  %v9441_v10 = vld [vmem:[%s9606_s30] sm:$0xff]   ;;  %v9442_v26 = vld [vmem:[%s9606_s30 + $0x8] sm:$0xff]   ;;  %v9669_v34 = vand.u32 %v9579_v5, %v204_v28  ;;  %v9672_v36 = vld [vmem:[%s9606_s30 + $0x10] sm:$0xff]   ;;  %v9675_v37 = vand.u32 %v9579_v5, %v207_v30  ;;  %v9695_v43 = vand.u32 %v9579_v5, %v206_v38  ;;  %s10979_s10 = smov (!%p10213_p6, %s185_s10), 11  ;;  %s9397_s12 = smul.u32 24, %s10977_s13  ;;  %vm1567_vm4 = vcmask 31744  }
  0x14   : > { %8509 = vmatprep.subr.bf16.mxu0 %v9513_v1  ;;  %8515 = vmatprep.subr.bf16.mxu1 %v9513_v1  ;;  %v235_v11 = vshrl.u32 %v9441_v10, 16  ;;  %v237_v12 = vshll.u32 %v9441_v10, 16  ;;  %v339_v23 = vrot.slane %v9441_v10, 1  ;;  %v553_v29 = vshll.u32 %v9442_v26, 16  ;;  %v209_v39 = vld [vmem:[%s10962_s1 + $0x16] sm:$0x3] }
  0x15   : > { %v441_v31 = vrot.slane %v9441_v10, 2  ;;  %v606_v32 = vrot.slane %v9442_v26, 1  ;;  %v551_v33 = vshrl.u32 %v9442_v26, 16  ;;  %v708_v41 = vrot.slane %v9442_v26, 2  ;;  %v208_v47 = vld [vmem:[%s10962_s1 + $0x14] sm:$0x3] }
  0x16   : > { %8506 = vmatmul.mubr.msk.bf16.vlgmr.msra.gmra.mxu1 %vm241_vm3, %v9441_v10  ;;  %v239_v15 = vrot.slane %v237_v12, 1  ;;  %v389_v16 = vrot.slane %v235_v11, 1  ;;  %v390_v17 = vrot.slane %v237_v12, 2  ;;  %v555_v35 = vrot.slane %v553_v29, 1  ;;  %v211_v51 = vld [vmem:[%s10962_s1 + $0x1a] sm:$0x3] }
  0x17   : > { %8516 = vmatpush3.bf16.msra.mxu1 %v9609_v9  ;;  %8517 = vmatprep.mubr.msk.bf16.mxu1 %vm9515_vm2, %v9513_v1  ;;  %v820_v42 = vshll.u32 %v9672_v36, 16  ;;  %v656_v44 = vrot.slane %v551_v33, 1  ;;  %v657_v45 = vrot.slane %v553_v29, 2  ;;  %v9698_v46 = vand.u32 %v9579_v5, %v209_v39  ;;  %v210_v55 = vld [vmem:[%s10962_s1 + $0x18] sm:$0x3]  ;;  %s7931_s19 = sshll.u32 %s10979_s10, 1 }
  0x18   : > { %8527 = vmatprep.subr.bf16.mxu1 %v9513_v1  ;;  %v240_v19 = vor.u32 %v239_v15, %v235_v11  ;;  %v391_v20 = vor.u32 %v390_v17, %v389_v16  ;;  %v556_v40 = vor.u32 %v555_v35, %v551_v33  ;;  %v818_v48 = vshrl.u32 %v9672_v36, 16  ;;  %v213_v58 = vld [vmem:[%s10962_s1 + $0x1e] sm:$0x3]  ;;  %v212_v62 = vld [vmem:[%s10962_s1 + $0x1c] sm:$0x3]  ;;  %s192_s13 = sadd.s32 %s9397_s12, %s7931_s19 }
  0x19   : > { %v822_v49 = vrot.slane %v820_v42, 1  ;;  %v658_v50 = vor.u32 %v657_v45, %v656_v44  ;;  %v9718_v52 = vand.u32 %v9579_v5, %v208_v47  ;;  %v9721_v54 = vand.u32 %v9579_v5, %v211_v51  ;;  %v215_v0 = vld [vmem:[%s10962_s1 + $0x22] sm:$0x3]  ;;  %v9444_v3 = vld [vmem:[%s9606_s30 + $0x18] sm:$0xff]   ;;  %v214_v8 = vld [vmem:[%s10962_s1 + $0x20] sm:$0x3] }
  0x1a   : > { %8500 = vmatmul.mubr.msk.bf16.vlgmr.msra.gmra.mxu0 %vm241_vm3, %v240_v19  ;;  %v923_v56 = vrot.slane %v818_v48, 1  ;;  %v924_v57 = vrot.slane %v820_v42, 2  ;;  %v9740_v59 = vand.u32 %v9579_v5, %v210_v55  ;;  %v9743_v61 = vand.u32 %v9579_v5, %v213_v58  ;;  %v217_v12 = vld [vmem:[%s10962_s1 + $0x26] sm:$0x3]  ;;  %v216_v19 = vld [vmem:[%s10962_s1 + $0x24] sm:$0x3] }
  0x1b   : > { %8510 = vmatpush3.bf16.msra.mxu0 %v9624_v18  ;;  %8511 = vmatprep.mubr.msk.bf16.mxu0 %vm9515_vm2, %v9513_v1  ;;  %v823_v53 = vor.u32 %v822_v49, %v818_v48  ;;  %v873_v63 = vrot.slane %v9672_v36, 1  ;;  %v9764_v2 = vand.u32 %v9579_v5, %v212_v62  ;;  %v9768_v4 = vand.u32 %v9579_v5, %v215_v0  ;;  %v221_v38 = vld [vmem:[%s10962_s1 + $0x2e] sm:$0x3]  ;;  %v220_v42 = vld [vmem:[%s10962_s1 + $0x2c] sm:$0x3]  ;;  %v9447_v62 = vld [vmem:[%s9606_s30 + $0x10] sm:$0xff]  }
  0x1c   : > { %8521 = vmatprep.subr.bf16.mxu0 %v9513_v1  ;;  %v925_v60 = vor.u32 %v924_v57, %v923_v56  ;;  %v975_v10 = vrot.slane %v9672_v36, 2  ;;  %v1087_v11 = vshll.u32 %v9444_v3, 16  ;;  %v9788_v13 = vand.u32 %v9579_v5, %v214_v8  ;;  %v9446_v47 = vld [vmem:[%s9606_s30 + $0x8] sm:$0xff]   ;;  %v222_v51 = vld [vmem:[%s10962_s1 + $0x30] sm:$0x3]  ;;  %s7932_s20 = sshll.u32 %s192_s13, 3 }
  0x1d   : > { %v1140_v14 = vrot.slane %v9444_v3, 1  ;;  %v9791_v15 = vand.u32 %v9579_v5, %v217_v12  ;;  %v1085_v16 = vshrl.u32 %v9444_v3, 16  ;;  %v9813_v24 = vand.u32 %v9579_v5, %v216_v19  ;;  %s10263_s25 = scalar_lea.vmem %s10964_s3, %s7932_s20 }
  0x1e   : > { %8518 = vmatmul.mubr.msk.bf16.vlgmr.msra.gmra.mxu1 %vm241_vm3, %v391_v20  ;;  %v1089_v17 = vrot.slane %v1087_v11, 1  ;;  %v9803_v20 = vld [vmem:[%s9606_s30 + $0x20] sm:$0xff]   ;;  %v9857_v48 = vand.u32 %v9579_v5, %v220_v42  ;;  %v9875_v57 = vand.u32 %v9579_v5, %v222_v51  ;;  %v1870_v0 = vshll.u32 %v9447_v62, 16 }
  0x1f   : > { %8528 = vmatpush3.bf16.msra.mxu1 %v9627_v21  ;;  %8529 = vmatprep.mubr.msk.bf16.mxu1 %vm9515_vm2, %v9513_v1  ;;  %v1354_v28 = vshll.u32 %v9803_v20, 16  ;;  %v1190_v30 = vrot.slane %v1085_v16, 1  ;;  %v1352_v33 = vshrl.u32 %v9803_v20, 16  ;;  %v1407_v56 = vrot.slane %v9803_v20, 1 }
  0x20   : > { %8539 = vmatprep.subr.bf16.mxu1 %v9513_v1  ;;  %v1090_v22 = vor.u32 %v1089_v17, %v1085_v16  ;;  %v1968_v17 = vrot.slane %v1870_v0, 2  ;;  %vm1569_vm5 = vcmask 27648  }
  0x21   : > { %v1356_v35 = vrot.slane %v1354_v28, 1  ;;  %v1457_v44 = vrot.slane %v1352_v33, 1  ;;  %v1458_v45 = vrot.slane %v1354_v28, 2 }
  0x22   : > { %8512 = vmatmul.mubr.msk.bf16.vlgmr.msra.gmra.mxu0 %vm241_vm3, %v339_v23  ;;  %v219_v23 = vld [vmem:[%s10962_s1 + $0x2a] sm:$0x3] }
  0x23   : > { %8522 = vmatpush3.bf16.msra.mxu0 %v9646_v25  ;;  %8523 = vmatprep.mubr.msk.bf16.mxu0 %vm9515_vm2, %v9513_v1  ;;  %v9817_v29 = vand.u32 %v9579_v5, %v219_v23  ;;  %v1459_v49 = vor.u32 %v1458_v45, %v1457_v44  ;;  %v2016_v23 = vrot.slane %v9447_v62, 2 }
  0x24   : > { %8533 = vmatprep.subr.bf16.mxu0 %v9513_v1 }
  0x26   : > { %8530 = vmatmul.mubr.msk.bf16.vlgmr.msra.gmra.mxu1 %vm241_vm3, %v9442_v26  ;;  %v1242_v26 = vrot.slane %v9444_v3, 2 }
  0x27   : > { %8540 = vmatpush3.bf16.msra.mxu1 %v9650_v27  ;;  %8541 = vmatprep.mubr.msk.bf16.mxu1 %vm9515_vm2, %v9513_v1 }
  0x28   : > { %8551 = vmatprep.subr.bf16.mxu1 %v9513_v1 }
  0x2a   : > { %8524 = vmatmul.mubr.msk.bf16.vlgmr.msra.gmra.mxu0 %vm241_vm3, %v441_v31  ;;  %v1191_v31 = vrot.slane %v1087_v11, 2  ;;  %v1872_v11 = vrot.slane %v1870_v0, 1 }
  0x2b   : > { %8534 = vmatpush3.bf16.msra.mxu0 %v9669_v34  ;;  %8535 = vmatprep.mubr.msk.bf16.mxu0 %vm9515_vm2, %v9513_v1 }
  0x2c   : > { %8545 = vmatprep.subr.bf16.mxu0 %v9513_v1 }
  0x2e   : > { %8542 = vmatmul.mubr.msk.bf16.vlgmr.msra.gmra.mxu1 %vm241_vm3, %v606_v32  ;;  %v218_v32 = vld [vmem:[%s10962_s1 + $0x28] sm:$0x3] }
  0x2f   : > { %8552 = vmatpush3.bf16.msra.mxu1 %v9675_v37  ;;  %8553 = vmatprep.mubr.msk.bf16.mxu1 %vm9515_vm2, %v9513_v1  ;;  %v9837_v39 = vand.u32 %v9579_v5, %v218_v32  ;;  %v9449_v32 = vld [vmem:[%s9606_s30 + $0x20] sm:$0xff]  }
  0x30   : > { %8563 = vmatprep.subr.bf16.mxu1 %v9513_v1  ;;  %v2364_v42 = vshrl.u32 %v9449_v32, 16 }
  0x32   : > { %8536 = vmatmul.mubr.msk.bf16.vlgmr.msra.gmra.mxu0 %vm241_vm3, %v556_v40  ;;  %v1357_v40 = vor.u32 %v1356_v35, %v1352_v33 }
  0x33   : > { %8546 = vmatpush3.bf16.msra.mxu0 %v9695_v43  ;;  %8547 = vmatprep.mubr.msk.bf16.mxu0 %vm9515_vm2, %v9513_v1 }
  0x34   : > { %8557 = vmatprep.subr.bf16.mxu0 %v9513_v1 }
  0x36   : > { %8554 = vmatmul.mubr.msk.bf16.vlgmr.msra.gmra.mxu1 %vm241_vm3, %v708_v41  ;;  %v9840_v41 = vand.u32 %v9579_v5, %v221_v38  ;;  %v1509_v5 = vrot.slane %v9803_v20, 2 }
  0x37   : > { %8564 = vmatpush3.bf16.msra.mxu1 %v9698_v46  ;;  %8565 = vmatprep.mubr.msk.bf16.mxu1 %vm9515_vm2, %v9513_v1 }
  0x38   : > { %8575 = vmatprep.subr.bf16.mxu1 %v9513_v1 }
  0x3a   : > { %8548 = vmatmul.mubr.msk.bf16.vlgmr.msra.gmra.mxu0 %vm241_vm3, %v658_v50  ;;  %v1581_v50 = vshll.u32 %v9446_v47, 16 }
  0x3b   : > { %8558 = vmatpush3.bf16.msra.mxu0 %v9718_v52  ;;  %8559 = vmatprep.mubr.msk.bf16.mxu0 %vm9515_vm2, %v9513_v1 }
  0x3c   : > { %8569 = vmatprep.subr.bf16.mxu0 %v9513_v1  ;;  %v1583_v55 = vrot.slane %v1581_v50, 1  ;;  %v1720_v8 = vrot.slane %v1581_v50, 2 }
  0x3e   : > { %8566 = vmatmul.mubr.msk.bf16.vlgmr.msra.gmra.mxu1 %vm241_vm3, %v823_v53  ;;  %v1579_v53 = vshrl.u32 %v9446_v47, 16 }
  0x3f   : > { %8576 = vmatpush3.bf16.msra.mxu1 %v9721_v54  ;;  %8577 = vmatprep.mubr.msk.bf16.mxu1 %vm9515_vm2, %v9513_v1 }
  0x40   : > { %8587 = vmatprep.subr.bf16.mxu1 %v9513_v1  ;;  %v1584_v58 = vor.u32 %v1583_v55, %v1579_v53  ;;  %v9450_v55 = vld [vmem:[%s9606_s30 + $0x28] sm:$0xff]  }
  0x41   : > { %v2764_v0 = vrot.slane %v9450_v55, 2 }
  0x42   : > { %8560 = vmatmul.mubr.msk.bf16.vlgmr.msra.gmra.mxu0 %vm241_vm3, %v9672_v36  ;;  %v1192_v36 = vor.u32 %v1191_v31, %v1190_v30 }
  0x43   : > { %8570 = vmatpush3.bf16.msra.mxu0 %v9740_v59  ;;  %8571 = vmatprep.mubr.msk.bf16.mxu0 %vm9515_vm2, %v9513_v1 }
  0x44   : > { %8581 = vmatprep.subr.bf16.mxu0 %v9513_v1 }
  0x46   : > { %8578 = vmatmul.mubr.msk.bf16.vlgmr.msra.gmra.mxu1 %vm241_vm3, %v925_v60  ;;  %v1672_v60 = vrot.slane %v9446_v47, 1 }
  0x47   : > { %8588 = vmatpush3.bf16.msra.mxu1 %v9743_v61  ;;  %8589 = vmatprep.mubr.msk.bf16.mxu1 %vm9515_vm2, %v9513_v1 }
  0x48   : > { %8599 = vmatprep.subr.bf16.mxu1 %v9513_v1 }
  0x4a   : > { %8572 = vmatmul.mubr.msk.bf16.vlgmr.msra.gmra.mxu0 %vm241_vm3, %v873_v63  ;;  %v1768_v63 = vrot.slane %v9446_v47, 2 }
  0x4b   : > { %8582 = vmatpush3.bf16.msra.mxu0 %v9764_v2  ;;  %8583 = vmatprep.mubr.msk.bf16.mxu0 %vm9515_vm2, %v9513_v1 }
  0x4c   : > { %8593 = vmatprep.subr.bf16.mxu0 %v9513_v1 }
  0x4e   : > { %8590 = vmatmul.mubr.msk.bf16.vlgmr.msra.gmra.mxu1 %vm241_vm3, %v9444_v3  ;;  %v1719_v3 = vrot.slane %v1579_v53, 1  ;;  %v2416_v53 = vrot.slane %v9449_v32, 1 }
  0x4f   : > { %8600 = vmatpush3.bf16.msra.mxu1 %v9768_v4  ;;  %8601 = vmatprep.mubr.msk.bf16.mxu1 %vm9515_vm2, %v9513_v1 }
  0x50   : > { %8611 = vmatprep.subr.bf16.mxu1 %v9513_v1  ;;  %v1721_v12 = vor.u32 %v1720_v8, %v1719_v3 }
  0x52   : > { %8584 = vmatmul.mubr.msk.bf16.vlgmr.msra.gmra.mxu0 %vm241_vm3, %v975_v10  ;;  %v1868_v10 = vshrl.u32 %v9447_v62, 16 }
  0x53   : > { %8594 = vmatpush3.bf16.msra.mxu0 %v9788_v13  ;;  %8595 = vmatprep.mubr.msk.bf16.mxu0 %vm9515_vm2, %v9513_v1 }
  0x54   : > { %8605 = vmatprep.subr.bf16.mxu0 %v9513_v1  ;;  %v1967_v16 = vrot.slane %v1868_v10, 1 }
  0x56   : > { %8602 = vmatmul.mubr.msk.bf16.vlgmr.msra.gmra.mxu1 %vm241_vm3, %v1140_v14  ;;  %v1873_v14 = vor.u32 %v1872_v11, %v1868_v10  ;;  %v1969_v19 = vor.u32 %v1968_v17, %v1967_v16  ;;  %v10004_v10 = vld [vmem:[%s9606_s30 + $0x10] sm:$0xff]  }
  0x57   : > { %8612 = vmatpush3.bf16.msra.mxu1 %v9791_v15  ;;  %8613 = vmatprep.mubr.msk.bf16.mxu1 %vm9515_vm2, %v9513_v1  ;;  %v2826_v16 = vshll.u32 %v10004_v10, 16 }
  0x58   : > { %8623 = vmatprep.subr.bf16.mxu1 %v9513_v1 }
  0x5a   : > { %8596 = vmatmul.mubr.msk.bf16.vlgmr.msra.gmra.mxu0 %vm241_vm3, %v1090_v22  ;;  %v9448_v22 = vld [vmem:[%s9606_s30 + $0x18] sm:$0xff]  }
  0x5b   : > { %8606 = vmatpush3.bf16.msra.mxu0 %v9813_v24  ;;  %8607 = vmatprep.mubr.msk.bf16.mxu0 %vm9515_vm2, %v9513_v1  ;;  %v2168_v28 = vrot.slane %v9448_v22, 1  ;;  %v2116_v30 = vshrl.u32 %v9448_v22, 16  ;;  %v2264_v35 = vrot.slane %v9448_v22, 2 }
  0x5c   : > { %8617 = vmatprep.subr.bf16.mxu0 %v9513_v1 }
  0x5d   : > { %v2215_v38 = vrot.slane %v2116_v30, 1 }
  0x5e   : > { %8614 = vmatmul.mubr.msk.bf16.vlgmr.msra.gmra.mxu1 %vm241_vm3, %v1242_v26  ;;  %v2118_v26 = vshll.u32 %v9448_v22, 16 }
  0x5f   : > { %8624 = vmatpush3.bf16.msra.mxu1 %v9817_v29  ;;  %8625 = vmatprep.mubr.msk.bf16.mxu1 %vm9515_vm2, %v9513_v1 }
  0x60   : > { %8635 = vmatprep.subr.bf16.mxu1 %v9513_v1  ;;  %v2120_v31 = vrot.slane %v2118_v26, 1 }
  0x62   : > { %8608 = vmatmul.mubr.msk.bf16.vlgmr.msra.gmra.mxu0 %vm241_vm3, %v1192_v36  ;;  %v2121_v33 = vor.u32 %v2120_v31, %v2116_v30  ;;  %v2366_v36 = vshll.u32 %v9449_v32, 16  ;;  %v2965_v31 = vrot.slane %v2826_v16, 2 }
  0x63   : > { %8618 = vmatpush3.bf16.msra.mxu0 %v9837_v39  ;;  %8619 = vmatprep.mubr.msk.bf16.mxu0 %vm9515_vm2, %v9513_v1 }
  0x64   : > { %8629 = vmatprep.subr.bf16.mxu0 %v9513_v1  ;;  %v2368_v44 = vrot.slane %v2366_v36, 1  ;;  %v2464_v50 = vrot.slane %v2366_v36, 2 }
  0x66   : > { %8626 = vmatmul.mubr.msk.bf16.vlgmr.msra.gmra.mxu1 %vm241_vm3, %v1357_v40  ;;  %v2216_v40 = vrot.slane %v2118_v26, 2 }
  0x67   : > { %8636 = vmatpush3.bf16.msra.mxu1 %v9840_v41  ;;  %8637 = vmatprep.mubr.msk.bf16.mxu1 %vm9515_vm2, %v9513_v1 }
  0x68   : > { %8647 = vmatprep.subr.bf16.mxu1 %v9513_v1  ;;  %v2217_v45 = vor.u32 %v2216_v40, %v2215_v38 }
  0x6a   : > { %8620 = vmatmul.mubr.msk.bf16.vlgmr.msra.gmra.mxu0 %vm241_vm3, %v9803_v20  ;;  %v1920_v20 = vrot.slane %v9447_v62, 1 }
  0x6b   : > { %8630 = vmatpush3.bf16.msra.mxu0 %v9857_v48  ;;  %8631 = vmatprep.mubr.msk.bf16.mxu0 %vm9515_vm2, %v9513_v1 }
  0x6c   : > { %8641 = vmatprep.subr.bf16.mxu0 %v9513_v1 }
  0x6e   : > { %8638 = vmatmul.mubr.msk.bf16.vlgmr.msra.gmra.mxu1 %vm241_vm3, %v1459_v49  ;;  %v2463_v49 = vrot.slane %v2364_v42, 1 }
  0x6f   : > { %8648 = vmatpush3.bf16.msra.mxu1 %v9590_v7  ;;  %8649 = vmatprep.mubr.msk.bf16.mxu1 %vm9515_vm2, %v9513_v1 }
  0x70   : > { %8659 = vmatprep.subr.bf16.mxu1 %v9513_v1  ;;  %v2465_v51 = vor.u32 %v2464_v50, %v2463_v49 }
  0x72   : > { %8632 = vmatmul.mubr.msk.bf16.vlgmr.msra.gmra.mxu0 %vm241_vm3, %v1407_v56  ;;  %v2512_v56 = vrot.slane %v9449_v32, 2 }
  0x73   : > { %8642 = vmatpush3.bf16.msra.mxu0 %v9875_v57  ;;  %8643 = vmatprep.mubr.msk.bf16.mxu0 %vm9515_vm2, %v9513_v1 }
  0x74   : > { %8653 = vmatprep.subr.bf16.mxu0 %v9513_v1 }
  0x76   : > { %8650 = vmatmul.mubr.msk.bf16.vlgmr.msra.gmra.mxu1 %vm241_vm3, %v1584_v58  ;;  %v2618_v58 = vshll.u32 %v9450_v55, 16 }
  0x77   : > { %8660 = vmatpush3.bf16.msra.mxu1 %v9624_v18  ;;  %8661 = vmatprep.mubr.msk.bf16.mxu1 %vm9515_vm2, %v9513_v1 }
  0x78   : > { %8671 = vmatprep.subr.bf16.mxu1 %v9513_v1  ;;  %v2716_v8 = vrot.slane %v2618_v58, 2 }
  0x7a   : > { %8644 = vmatmul.mubr.msk.bf16.vlgmr.msra.gmra.mxu0 %vm241_vm3, %v1509_v5  ;;  %v2668_v5 = vrot.slane %v9450_v55, 1 }
  0x7b   : > { %8654 = vmatpush3.bf16.msra.mxu0 %v9587_v6  ;;  %8655 = vmatprep.mubr.msk.bf16.mxu0 %vm9515_vm2, %v9513_v1 }
  0x7c   : > { %8665 = vmatprep.subr.bf16.mxu0 %v9513_v1 }
  0x7e   : > { %8662 = vmatmul.mubr.msk.bf16.vlgmr.msra.gmra.mxu1 %vm241_vm3, %v1672_v60  ;;  %v2616_v60 = vshrl.u32 %v9450_v55, 16 }
  0x7f   : > { %8672 = vmatpush3.bf16.msra.mxu1 %v9646_v25  ;;  %8673 = vmatprep.mubr.msk.bf16.mxu1 %vm9515_vm2, %v9513_v1 }
  0x80   : > { %8683 = vmatprep.subr.bf16.mxu1 %v9513_v1  ;;  %v2715_v3 = vrot.slane %v2616_v60, 1 }
  0x82   : > { %8656 = vmatmul.mubr.msk.bf16.vlgmr.msra.gmra.mxu0 %vm241_vm3, %v9446_v47  ;;  %v2369_v47 = vor.u32 %v2368_v44, %v2364_v42 }
  0x83   : > { %8666 = vmatpush3.bf16.msra.mxu0 %v9609_v9  ;;  %8667 = vmatprep.mubr.msk.bf16.mxu0 %vm9515_vm2, %v9513_v1 }
  0x84   : > { %8677 = vmatprep.subr.bf16.mxu0 %v9513_v1 }
  0x86   : > { %8674 = vmatmul.mubr.msk.bf16.vlgmr.msra.gmra.mxu1 %vm241_vm3, %v1768_v63 }
  0x87   : > { %8684 = vmatpush3.bf16.msra.mxu1 %v9669_v34  ;;  %8685 = vmatprep.mubr.msk.bf16.mxu1 %vm9515_vm2, %v9513_v1 }
  0x88   : > { %8695 = vmatprep.subr.bf16.mxu1 %v9513_v1 }
  0x8a   : > { %8668 = vmatmul.mubr.msk.bf16.vlgmr.msra.gmra.mxu0 %vm241_vm3, %v1721_v12 }
  0x8b   : > { %8678 = vmatpush3.bf16.msra.mxu0 %v9627_v21  ;;  %8679 = vmatprep.mubr.msk.bf16.mxu0 %vm9515_vm2, %v9513_v1 }
  0x8c   : > { %8689 = vmatprep.subr.bf16.mxu0 %v9513_v1 }
  0x8e   : > { %8686 = vmatmul.mubr.msk.bf16.vlgmr.msra.gmra.mxu1 %vm241_vm3, %v1873_v14  ;;  %v2717_v14 = vor.u32 %v2716_v8, %v2715_v3  ;;  %v3013_v3 = vrot.slane %v10004_v10, 2 }
  0x8f   : > { %8696 = vmatpush3.bf16.msra.mxu1 %v9695_v43  ;;  %8697 = vmatprep.mubr.msk.bf16.mxu1 %vm9515_vm2, %v9513_v1 }
  0x90   : > { %8707 = vmatprep.subr.bf16.mxu1 %v9513_v1 }
  0x92   : > { %8680 = vmatmul.mubr.msk.bf16.vlgmr.msra.gmra.mxu0 %vm241_vm3, %v9447_v62  ;;  %v2620_v62 = vrot.slane %v2618_v58, 1 }
  0x93   : > { %8690 = vmatpush3.bf16.msra.mxu0 %v9650_v27  ;;  %8691 = vmatprep.mubr.msk.bf16.mxu0 %vm9515_vm2, %v9513_v1 }
  0x94   : > { %8701 = vmatprep.subr.bf16.mxu0 %v9513_v1  ;;  %v2621_v63 = vor.u32 %v2620_v62, %v2616_v60 }
  0x96   : > { %8698 = vmatmul.mubr.msk.bf16.vlgmr.msra.gmra.mxu1 %vm241_vm3, %v1969_v19 }
  0x97   : > { %8708 = vmatpush3.bf16.msra.mxu1 %v9718_v52  ;;  %8709 = vmatprep.mubr.msk.bf16.mxu1 %vm9515_vm2, %v9513_v1 }
  0x98   : > { %8719 = vmatprep.subr.bf16.mxu1 %v9513_v1 }
  0x9a   : > { %8692 = vmatmul.mubr.msk.bf16.vlgmr.msra.gmra.mxu0 %vm241_vm3, %v1920_v20 }
  0x9b   : > { %8702 = vmatpush3.bf16.msra.mxu0 %v9675_v37  ;;  %8703 = vmatprep.mubr.msk.bf16.mxu0 %vm9515_vm2, %v9513_v1 }
  0x9c   : > { %8713 = vmatprep.subr.bf16.mxu0 %v9513_v1 }
  0x9e   : > { %8710 = vmatmul.mubr.msk.bf16.vlgmr.msra.gmra.mxu1 %vm241_vm3, %v9448_v22  ;;  %v2824_v22 = vshrl.u32 %v10004_v10, 16 }
  0x9f   : > { %8720 = vmatpush3.bf16.msra.mxu1 %v9740_v59  ;;  %8721 = vmatprep.mubr.msk.bf16.mxu1 %vm9515_vm2, %v9513_v1 }
  0xa0   : > { %8731 = vmatprep.subr.bf16.mxu1 %v9513_v1  ;;  %v2964_v30 = vrot.slane %v2824_v22, 1 }
  0xa2   : > { %8704 = vmatmul.mubr.msk.bf16.vlgmr.msra.gmra.mxu0 %vm241_vm3, %v2016_v23  ;;  %v2828_v23 = vrot.slane %v2826_v16, 1  ;;  %v2966_v40 = vor.u32 %v2965_v31, %v2964_v30  ;;  %v10086_v31 = vld [vmem:[%s9606_s30 + $0x20] sm:$0xff]  }
  0xa3   : > { %8714 = vmatpush3.bf16.msra.mxu0 %v9698_v46  ;;  %8715 = vmatprep.mubr.msk.bf16.mxu0 %vm9515_vm2, %v9513_v1 }
  0xa4   : > { %8725 = vmatprep.subr.bf16.mxu0 %v9513_v1 }
  0xa6   : > { %8722 = vmatmul.mubr.msk.bf16.vlgmr.msra.gmra.mxu1 %vm241_vm3, %v2168_v28 }
  0xa7   : > { %8732 = vmatpush3.bf16.msra.mxu1 %v9764_v2  ;;  %8733 = vmatprep.mubr.msk.bf16.mxu1 %vm9515_vm2, %v9513_v1 }
  0xa8   : > { %8743 = vmatprep.subr.bf16.mxu1 %v9513_v1 }
  0xaa   : > { %8716 = vmatmul.mubr.msk.bf16.vlgmr.msra.gmra.mxu0 %vm241_vm3, %v2121_v33 }
  0xab   : > { %8726 = vmatpush3.bf16.msra.mxu0 %v9721_v54  ;;  %8727 = vmatprep.mubr.msk.bf16.mxu0 %vm9515_vm2, %v9513_v1 }
  0xac   : > { %8737 = vmatprep.subr.bf16.mxu0 %v9513_v1 }
  0xae   : > { %8734 = vmatmul.mubr.msk.bf16.vlgmr.msra.gmra.mxu1 %vm241_vm3, %v2264_v35  ;;  %v2829_v35 = vor.u32 %v2828_v23, %v2824_v22 }
  0xaf   : > { %8744 = vmatpush3.bf16.msra.mxu1 %v9788_v13  ;;  %8745 = vmatprep.mubr.msk.bf16.mxu1 %vm9515_vm2, %v9513_v1 }
  0xb0   : > { %8755 = vmatprep.subr.bf16.mxu1 %v9513_v1 }
  0xb2   : > { %8728 = vmatmul.mubr.msk.bf16.vlgmr.msra.gmra.mxu0 %vm241_vm3, %v2217_v45 }
  0xb3   : > { %8738 = vmatpush3.bf16.msra.mxu0 %v9743_v61  ;;  %8739 = vmatprep.mubr.msk.bf16.mxu0 %vm9515_vm2, %v9513_v1 }
  0xb4   : > { %8749 = vmatprep.subr.bf16.mxu0 %v9513_v1 }
  0xb6   : > { %8746 = vmatmul.mubr.msk.bf16.vlgmr.msra.gmra.mxu1 %vm241_vm3, %v2369_v47 }
  0xb7   : > { %8756 = vmatpush3.bf16.msra.mxu1 %v9813_v24  ;;  %8757 = vmatprep.mubr.msk.bf16.mxu1 %vm9515_vm2, %v9513_v1 }
  0xb8   : > { %8767 = vmatprep.subr.bf16.mxu1 %v9513_v1 }
  0xba   : > { %8740 = vmatmul.mubr.msk.bf16.vlgmr.msra.gmra.mxu0 %vm241_vm3, %v9449_v32 }
  0xbb   : > { %8750 = vmatpush3.bf16.msra.mxu0 %v9768_v4  ;;  %8751 = vmatprep.mubr.msk.bf16.mxu0 %vm9515_vm2, %v9513_v1 }
  0xbc   : > { %8761 = vmatprep.subr.bf16.mxu0 %v9513_v1 }
  0xbe   : > { %8758 = vmatmul.mubr.msk.bf16.vlgmr.msra.gmra.mxu1 %vm241_vm3, %v2465_v51  ;;  %v2917_v51 = vrot.slane %v10004_v10, 1 }
  0xbf   : > { %8768 = vmatpush3.bf16.msra.mxu1 %v9837_v39  ;;  %8769 = vmatprep.mubr.msk.bf16.mxu1 %vm9515_vm2, %v9513_v1 }
  0xc0   : > { %8779 = vmatprep.subr.bf16.mxu1 %v9513_v1 }
  0xc2   : > { %8752 = vmatmul.mubr.msk.bf16.vlgmr.msra.gmra.mxu0 %vm241_vm3, %v2416_v53 }
  0xc3   : > { %8762 = vmatpush3.bf16.msra.mxu0 %v9791_v15  ;;  %8763 = vmatprep.mubr.msk.bf16.mxu0 %vm9515_vm2, %v9513_v1 }
  0xc4   : > { %8773 = vmatprep.subr.bf16.mxu0 %v9513_v1 }
  0xc6   : > { %8770 = vmatmul.mubr.msk.bf16.vlgmr.msra.gmra.mxu1 %vm241_vm3, %v9450_v55 }
  0xc7   : > { %8780 = vmatpush3.bf16.msra.mxu1 %v9857_v48  ;;  %8781 = vmatprep.mubr.msk.bf16.mxu1 %vm9515_vm2, %v9513_v1 }
  0xc8   : > { %8791 = vmatprep.subr.bf16.mxu1 %v9513_v1 }
  0xca   : > { %8764 = vmatmul.mubr.msk.bf16.vlgmr.msra.gmra.mxu0 %vm241_vm3, %v2512_v56  ;;  %v9452_v56 = vld [vmem:[%s9606_s30 + $0x18] sm:$0xff]  }
  0xcb   : > { %8774 = vmatpush3.bf16.msra.mxu0 %v9817_v29  ;;  %8775 = vmatprep.mubr.msk.bf16.mxu0 %vm9515_vm2, %v9513_v1  ;;  %v3115_v8 = vshll.u32 %v9452_v56, 16  ;;  %v3165_v16 = vrot.slane %v9452_v56, 1  ;;  %v3113_v23 = vshrl.u32 %v9452_v56, 16 }
  0xcc   : > { %8785 = vmatprep.subr.bf16.mxu0 %v9513_v1 }
  0xce   : > { %8782 = vmatmul.mubr.msk.bf16.vlgmr.msra.gmra.mxu1 %vm241_vm3, %v2668_v5 }
  0xcf   : > { %8792 = vmatpush3.bf16.msra.mxu1 %v9875_v57  ;;  %8793 = vmatprep.mubr.msk.bf16.mxu1 %vm9515_vm2, %v9513_v1 }
  0xd0   : > { %8803 = vmatprep.subr.bf16.mxu1 %v9513_v1 }
  0xd2   : > { %8776 = vmatmul.mubr.msk.bf16.vlgmr.msra.gmra.mxu0 %vm241_vm3, %v2621_v63 }
  0xd3   : > { %8786 = vmatpush3.bf16.msra.mxu0 %v9840_v41  ;;  %8787 = vmatprep.mubr.msk.bf16.mxu0 %vm9515_vm2, %v9513_v1 }
  0xd4   : > { %8797 = vmatprep.subr.bf16.mxu0 %v9513_v1 }
  0xd6   : > { %v10009_v11 = vpop.f32.mrf.mxu1  ;;  %8794 = vmatmul.mubr.msk.bf16.vlgmr.msra.gmra.mxu1 %vm241_vm3, %v2764_v0 }
  0xd7   : > { %8804 = vmatpush3.bf16.msra.mxu1 %v9587_v6  ;;  %8805 = vmatprep.mubr.msk.bf16.mxu1 %vm9515_vm2, %v9513_v1 }
  0xd8   : > { %v8507_v12 = vpop.f32.mrf.mxu1  ;;  %8815 = vmatprep.subr.bf16.mxu1 %v9513_v1 }
  0xda   : > { %v10018_v17 = vpop.f32.mrf.mxu1  ;;  %v10020_v19 = vpop.f32.mrf.mxu0  ;;  %8788 = vmatmul.mubr.msk.bf16.vlgmr.msra.gmra.mxu0 %vm241_vm3, %v2717_v14 }
  0xdb   : > { %8798 = vmatpush3.bf16.msra.mxu0 %v9590_v7  ;;  %8799 = vmatprep.mubr.msk.bf16.mxu0 %vm9515_vm2, %v9513_v1 }
  0xdc   : > { %v8508_v20 = vpop.f32.mrf.mxu1  ;;  %v8501_v26 = vpop.f32.mrf.mxu0  ;;  %8809 = vmatprep.subr.bf16.mxu0 %v9513_v1 }
  0xdd   : > { %v3117_v26 = vrot.slane %v3115_v8, 1 }
  0xde   : > { %v10027_v28 = vpop.f32.mrf.mxu1  ;;  %8806 = vmatmul.mubr.msk.bf16.vlgmr.msra.gmra.mxu1 %vm241_vm3, %v10004_v10  ;;  %v10035_v32 = vpop.f32.mrf.mxu0 }
  0xdf   : > { %8816 = vmatpush3.bf16.msra.mxu1 %v9609_v9  ;;  %8817 = vmatprep.mubr.msk.bf16.mxu1 %vm9515_vm2, %v9513_v1 }
  0xe0   : > { %v8519_v33 = vpop.f32.mrf.mxu1  ;;  %8827 = vmatprep.subr.bf16.mxu1 %v9513_v1  ;;  %v8502_v36 = vpop.f32.mrf.mxu0 }
  0xe1   : > { %v3118_v36 = vor.u32 %v3117_v26, %v3113_v23 }
  0xe2   : > { %v10038_v38 = vpop.f32.mrf.mxu1  ;;  %v380_v42 = vpop.f32.mrf.mxu0  ;;  %8800 = vmatmul.mubr.msk.bf16.vlgmr.msra.gmra.mxu0 %vm241_vm3, %v2829_v35 }
  0xe3   : > { %8810 = vmatpush3.bf16.msra.mxu0 %v9624_v18  ;;  %8811 = vmatprep.mubr.msk.bf16.mxu0 %vm9515_vm2, %v9513_v1 }
  0xe4   : > { %v8520_v44 = vpop.f32.mrf.mxu1  ;;  %v8513_v45 = vpop.f32.mrf.mxu0  ;;  %8821 = vmatprep.subr.bf16.mxu0 %v9513_v1 }
  0xe6   : > { %v10044_v47 = vpop.f32.mrf.mxu1  ;;  %8818 = vmatmul.mubr.msk.bf16.vlgmr.msra.gmra.mxu1 %vm241_vm3, %v2966_v40  ;;  %v10051_v49 = vpop.f32.mrf.mxu0  ;;  %v333_v40 = vadd.f32 %v10009_v11, %v10020_v19 }
  0xe7   : > { %8828 = vmatpush3.bf16.msra.mxu1 %v9627_v21  ;;  %8829 = vmatprep.mubr.msk.bf16.mxu1 %vm9515_vm2, %v9513_v1 }
  0xe8   : > { %v8531_v50 = vpop.f32.mrf.mxu1  ;;  %8839 = vmatprep.subr.bf16.mxu1 %v9513_v1  ;;  %v8514_v53 = vpop.f32.mrf.mxu0 }
  0xe9   : > { %v3261_v50 = vrot.slane %v9452_v56, 2  ;;  %v387_v53 = vadd.f32 %v380_v42, %v333_v40  ;;  %v3361_v42 = vshrl.u32 %v10086_v31, 16 }
  0xea   : > { %v10055_v55 = vpop.f32.mrf.mxu1  ;;  %v10058_v58 = vpop.f32.mrf.mxu0  ;;  %8812 = vmatmul.mubr.msk.bf16.vlgmr.msra.gmra.mxu0 %vm241_vm3, %v2917_v51  ;;  %v3363_v51 = vshll.u32 %v10086_v31, 16 }
  0xeb   : > { %8822 = vmatpush3.bf16.msra.mxu0 %v9646_v25  ;;  %8823 = vmatprep.mubr.msk.bf16.mxu0 %vm9515_vm2, %v9513_v1 }
  0xec   : > { %v8532_v5 = vpop.f32.mrf.mxu1  ;;  %v8525_v60 = vpop.f32.mrf.mxu0  ;;  %8833 = vmatprep.subr.bf16.mxu0 %v9513_v1 }
  0xee   : > { %v10064_v62 = vpop.f32.mrf.mxu1  ;;  %8830 = vmatmul.mubr.msk.bf16.vlgmr.msra.gmra.mxu1 %vm241_vm3, %v9452_v56  ;;  %v485_v63 = vpop.f32.mrf.mxu0  ;;  %v3365_v56 = vrot.slane %v3363_v51, 1 }
  0xef   : > { %8840 = vmatpush3.bf16.msra.mxu1 %v9650_v27  ;;  %8841 = vmatprep.mubr.msk.bf16.mxu1 %vm9515_vm2, %v9513_v1 }
  0xf0   : > { %v8543_v0 = vpop.f32.mrf.mxu1  ;;  %8851 = vmatprep.subr.bf16.mxu1 %v9513_v1  ;;  %v8526_v12 = vpop.f32.mrf.mxu0 }
  0xf1   : > { %v3212_v0 = vrot.slane %v3113_v23, 1  ;;  %v336_v12 = vadd.f32 %v10018_v17, %v10035_v32 }
  0xf2   : > { %v10073_v14 = vpop.f32.mrf.mxu1  ;;  %v10075_v20 = vpop.f32.mrf.mxu0  ;;  %8824 = vmatmul.mubr.msk.bf16.vlgmr.msra.gmra.mxu0 %vm241_vm3, %v3013_v3  ;;  %v3213_v3 = vrot.slane %v3115_v8, 2 }
  0xf3   : > { %8834 = vmatpush3.bf16.msra.mxu0 %v9669_v34  ;;  %8835 = vmatprep.mubr.msk.bf16.mxu0 %vm9515_vm2, %v9513_v1  ;;  %v388_v8 = vadd.f32 %v10051_v49, %v336_v12 }
  0xf4   : > { %v8544_v22 = vpop.f32.mrf.mxu1  ;;  %v8537_v10 = vpop.f32.mrf.mxu0  ;;  %8845 = vmatprep.subr.bf16.mxu0 %v9513_v1 }
  0xf5   : > { %v3214_v22 = vor.u32 %v3213_v3, %v3212_v0  ;;  %v440_v49 = vadd.f32 %v10038_v38, %v388_v8  ;;  %v3460_v38 = vrot.slane %v3361_v42, 1 }
  0xf6   : > { %v10081_v30 = vpop.f32.mrf.mxu1  ;;  %8842 = vmatmul.mubr.msk.bf16.vlgmr.msra.gmra.mxu1 %vm241_vm3, %v3165_v16  ;;  %v600_v33 = vpop.f32.mrf.mxu0  ;;  %v439_v16 = vadd.f32 %v10027_v28, %v387_v53  ;;  %v3461_v53 = vrot.slane %v3363_v51, 2 }
  0xf7   : > { %8852 = vmatpush3.bf16.msra.mxu1 %v9675_v37  ;;  %8853 = vmatprep.mubr.msk.bf16.mxu1 %vm9515_vm2, %v9513_v1  ;;  %v490_v40 = vadd.f32 %v485_v63, %v440_v49  ;;  %v10155_v49 = vld [vmem:[%s9606_s30 + $0x28] sm:$0xff]  }
  0xf8   : > { %v8555_v35 = vpop.f32.mrf.mxu1  ;;  %8863 = vmatprep.subr.bf16.mxu1 %v9513_v1  ;;  %v8538_v44 = vpop.f32.mrf.mxu0  ;;  %v489_v23 = vadd.f32 %v10058_v58, %v439_v16 }
  0xf9   : > { %v3366_v35 = vor.u32 %v3365_v56, %v3361_v42  ;;  %v550_v0 = vadd.f32 %v10055_v55, %v490_v40 }
  0xfa   : > { %v10094_v45 = vpop.f32.mrf.mxu1  ;;  %v699_v5 = vpop.f32.mrf.mxu0  ;;  %8836 = vmatmul.mubr.msk.bf16.vlgmr.msra.gmra.mxu0 %vm241_vm3, %v3118_v36  ;;  %v549_v44 = vadd.f32 %v10044_v47, %v489_v23 }
  0xfb   : > { %8846 = vmatpush3.bf16.msra.mxu0 %v9695_v43  ;;  %8847 = vmatprep.mubr.msk.bf16.mxu0 %vm9515_vm2, %v9513_v1  ;;  %v605_v56 = vadd.f32 %v600_v33, %v550_v0 }
  0xfc   : > { %v8556_v60 = vpop.f32.mrf.mxu1  ;;  %v8549_v11 = vpop.f32.mrf.mxu0  ;;  %8857 = vmatprep.subr.bf16.mxu0 %v9513_v1 }
  0xfd   : > { %v604_v60 = vadd.f32 %v10075_v20, %v549_v44  ;;  %v3462_v11 = vor.u32 %v3461_v53, %v3460_v38  ;;  %v3509_v53 = vrot.slane %v10086_v31, 2 }
  0xfe   : > { %v10103_v19 = vpop.f32.mrf.mxu1  ;;  %8854 = vmatmul.mubr.msk.bf16.vlgmr.msra.gmra.mxu1 %vm241_vm3, %v3261_v50  ;;  %v702_v17 = vpop.f32.mrf.mxu0 }
  0xff   : > { %8864 = vmatpush3.bf16.msra.mxu1 %v9698_v46  ;;  %8865 = vmatprep.mubr.msk.bf16.mxu1 %vm9515_vm2, %v9513_v1  ;;  %v654_v51 = vadd.f32 %v10064_v62, %v604_v60  ;;  %v655_v62 = vadd.f32 %v10073_v14, %v605_v56  ;;  %v3611_v60 = vshll.u32 %v10155_v49, 16 }
 0x100   : > { %v8567_v32 = vpop.f32.mrf.mxu1  ;;  %8875 = vmatprep.subr.bf16.mxu1 %v9513_v1  ;;  %v8550_v26 = vpop.f32.mrf.mxu0 }
 0x101   : > { %v706_v8 = vadd.f32 %v699_v5, %v654_v51  ;;  %v3413_v32 = vrot.slane %v10086_v31, 1  ;;  %v3609_v51 = vshrl.u32 %v10155_v49, 16 }
 0x102   : > { %v10115_v10 = vpop.f32.mrf.mxu1  ;;  %v809_v36 = vpop.f32.mrf.mxu0  ;;  %8848 = vmatmul.mubr.msk.bf16.vlgmr.msra.gmra.mxu0 %vm241_vm3, %v3214_v22  ;;  %v707_v22 = vadd.f32 %v702_v17, %v655_v62 }
 0x103   : > { %8858 = vmatpush3.bf16.msra.mxu0 %v9718_v52  ;;  %8859 = vmatprep.mubr.msk.bf16.mxu0 %vm9515_vm2, %v9513_v1  ;;  %v756_v23 = vadd.f32 %v10081_v30, %v706_v8 }
 0x104   : > { %v8568_v28 = vpop.f32.mrf.mxu1  ;;  %v8561_v50 = vpop.f32.mrf.mxu0  ;;  %8869 = vmatprep.subr.bf16.mxu0 %v9513_v1  ;;  %v757_v44 = vadd.f32 %v10094_v45, %v707_v22 }
 0x105   : > { %v816_v14 = vadd.f32 %v809_v36, %v756_v23 }
 0x106   : > { %v10123_v58 = vpop.f32.mrf.mxu1  ;;  %8866 = vmatmul.mubr.msk.bf16.vlgmr.msra.gmra.mxu1 %vm241_vm3, %v3366_v35  ;;  %v812_v47 = vpop.f32.mrf.mxu0 }
 0x107   : > { %8876 = vmatpush3.bf16.msra.mxu1 %v9721_v54  ;;  %8877 = vmatprep.mubr.msk.bf16.mxu1 %vm9515_vm2, %v9513_v1  ;;  %v817_v30 = vadd.f32 %v812_v47, %v757_v44  ;;  %v871_v36 = vadd.f32 %v10103_v19, %v816_v14  ;;  %v3661_v47 = vrot.slane %v10155_v49, 1 }
 0x108   : > { %v8579_v63 = vpop.f32.mrf.mxu1  ;;  %8887 = vmatprep.subr.bf16.mxu1 %v9513_v1  ;;  %v8562_v3 = vpop.f32.mrf.mxu0 }
 0x109   : > { %v872_v19 = vadd.f32 %v10115_v10, %v817_v30  ;;  %v10185_v10 = vld [vmem:[%s9606_s30 + $0x30] sm:$0xff]   ;;  %v3708_v30 = vrot.slane %v3609_v51, 1 }
 0x10a   : > { %v10133_v12 = vpop.f32.mrf.mxu1  ;;  %v914_v42 = vpop.f32.mrf.mxu0  ;;  %8860 = vmatmul.mubr.msk.bf16.vlgmr.msra.gmra.mxu0 %vm241_vm3, %v10086_v31  ;;  %v3863_v14 = vshll.u32 %v10185_v10, 16 }
 0x10b   : > { %8870 = vmatpush3.bf16.msra.mxu0 %v9740_v59  ;;  %8871 = vmatprep.mubr.msk.bf16.mxu0 %vm9515_vm2, %v9513_v1  ;;  %v921_v63 = vadd.f32 %v914_v42, %v871_v36  ;;  %v3709_v36 = vrot.slane %v3611_v60, 2 }
 0x10c   : > { %v8580_v20 = vpop.f32.mrf.mxu1  ;;  %v8573_v55 = vpop.f32.mrf.mxu0  ;;  %8881 = vmatprep.subr.bf16.mxu0 %v9513_v1 }
 0x10d   : > { %v3613_v20 = vrot.slane %v3611_v60, 1  ;;  %v973_v8 = vadd.f32 %v10123_v58, %v921_v63 }
 0x10e   : > { %v10141_v16 = vpop.f32.mrf.mxu1  ;;  %8878 = vmatmul.mubr.msk.bf16.vlgmr.msra.gmra.mxu1 %vm241_vm3, %v3462_v11  ;;  %v917_v33 = vpop.f32.mrf.mxu0 }
 0x10f   : > { %8888 = vmatpush3.bf16.msra.mxu1 %v9743_v61  ;;  %8889 = vmatprep.mubr.msk.bf16.mxu1 %vm9515_vm2, %v9513_v1  ;;  %v922_v31 = vadd.f32 %v917_v33, %v872_v19 }
 0x110   : > { %v8591_v5 = vpop.f32.mrf.mxu1  ;;  %8899 = vmatprep.subr.bf16.mxu1 %v9513_v1  ;;  %v8574_v26 = vpop.f32.mrf.mxu0 }
 0x111   : > { %v3614_v5 = vor.u32 %v3613_v20, %v3609_v51  ;;  %v3757_v26 = vrot.slane %v10155_v49, 2 }
 0x112   : > { %v10152_v35 = vpop.f32.mrf.mxu1  ;;  %v1016_v28 = vpop.f32.mrf.mxu0  ;;  %8872 = vmatmul.mubr.msk.bf16.vlgmr.msra.gmra.mxu0 %vm241_vm3, %v3413_v32  ;;  %v974_v32 = vadd.f32 %v10133_v12, %v922_v31 }
 0x113   : > { %8882 = vmatpush3.bf16.msra.mxu0 %v9764_v2  ;;  %8883 = vmatprep.mubr.msk.bf16.mxu0 %vm9515_vm2, %v9513_v1  ;;  %v1023_v62 = vadd.f32 %v1016_v28, %v973_v8 }
 0x114   : > { %v8592_v40 = vpop.f32.mrf.mxu1  ;;  %v8585_v17 = vpop.f32.mrf.mxu0  ;;  %8893 = vmatprep.subr.bf16.mxu0 %v9513_v1 }
 0x115   : > { %v1083_v28 = vadd.f32 %v10141_v16, %v1023_v62  ;;  %v3861_v16 = vshrl.u32 %v10185_v10, 16 }
 0x116   : > { %v10162_v50 = vpop.f32.mrf.mxu1  ;;  %8890 = vmatmul.mubr.msk.bf16.vlgmr.msra.gmra.mxu1 %vm241_vm3, %v10155_v49  ;;  %v1019_v45 = vpop.f32.mrf.mxu0 }
 0x117   : > { %8900 = vmatpush3.bf16.msra.mxu1 %v9768_v4  ;;  %8901 = vmatprep.mubr.msk.bf16.mxu1 %vm9515_vm2, %v9513_v1  ;;  %v1024_v40 = vadd.f32 %v1019_v45, %v974_v32  ;;  %v3865_v45 = vrot.slane %v3863_v14, 1  ;;  %v3960_v62 = vrot.slane %v3861_v16, 1 }
 0x118   : > { %v8603_v38 = vpop.f32.mrf.mxu1  ;;  %8911 = vmatprep.subr.bf16.mxu1 %v9513_v1  ;;  %v8586_v0 = vpop.f32.mrf.mxu0 }
 0x119   : > { %v3710_v0 = vor.u32 %v3709_v36, %v3708_v30  ;;  %v3866_v51 = vor.u32 %v3865_v45, %v3861_v16 }
 0x11a   : > { %v1184_v3 = vpop.f32.mrf.mxu1  ;;  %v1131_v11 = vpop.f32.mrf.mxu0  ;;  %8884 = vmatmul.mubr.msk.bf16.vlgmr.msra.gmra.mxu0 %vm241_vm3, %v3509_v53  ;;  %v1084_v53 = vadd.f32 %v10152_v35, %v1024_v40 }
 0x11b   : > { %8894 = vmatpush3.bf16.msra.mxu0 %v9788_v13  ;;  %8895 = vmatprep.mubr.msk.bf16.mxu0 %vm9515_vm2, %v9513_v1  ;;  %v1138_v38 = vadd.f32 %v1131_v11, %v1083_v28 }
 0x11c   : > { %v8604_v56 = vpop.f32.mrf.mxu1  ;;  %v8597_v42 = vpop.f32.mrf.mxu0  ;;  %8905 = vmatprep.subr.bf16.mxu0 %v9513_v1 }
 0x11d   : > { %v1188_v19 = vadd.f32 %v10162_v50, %v1138_v38 }
 0x11e   : > { %v1283_v55 = vpop.f32.mrf.mxu1  ;;  %8902 = vmatmul.mubr.msk.bf16.vlgmr.msra.gmra.mxu1 %vm241_vm3, %v3661_v47  ;;  %v1134_v58 = vpop.f32.mrf.mxu0 }
 0x11f   : > { %8912 = vmatpush3.bf16.msra.mxu1 %v9791_v15  ;;  %8913 = vmatprep.mubr.msk.bf16.mxu1 %vm9515_vm2, %v9513_v1  ;;  %v1139_v47 = vadd.f32 %v1134_v58, %v1084_v53  ;;  %v3961_v58 = vrot.slane %v3863_v14, 2 }
 0x120   : > { %v8615_v33 = vpop.f32.mrf.mxu1  ;;  %8923 = vmatprep.subr.bf16.mxu1 %v9513_v1  ;;  %v8598_v22 = vpop.f32.mrf.mxu0 }
 0x121   : > { %v1189_v8 = vadd.f32 %v1184_v3, %v1139_v47  ;;  %v10220_v33 = vld [vmem:[%s9606_s30 + $0x18] sm:$0xff]   ;;  %v3962_v14 = vor.u32 %v3961_v58, %v3960_v62 }
 0x122   : > { %v1286_v23 = vpop.f32.mrf.mxu1  ;;  %v1233_v44 = vpop.f32.mrf.mxu0  ;;  %8896 = vmatmul.mubr.msk.bf16.vlgmr.msra.gmra.mxu0 %vm241_vm3, %v3614_v5 }
 0x123   : > { %8906 = vmatpush3.bf16.msra.mxu0 %v9813_v24  ;;  %8907 = vmatprep.mubr.msk.bf16.mxu0 %vm9515_vm2, %v9513_v1  ;;  %v1240_v20 = vadd.f32 %v1233_v44, %v1188_v19  ;;  %v4071_v44 = vshll.u32 %v10220_v33, 16 }
 0x124   : > { %v8616_v17 = vpop.f32.mrf.mxu1  ;;  %v8609_v12 = vpop.f32.mrf.mxu0  ;;  %8917 = vmatprep.subr.bf16.mxu0 %v9513_v1 }
 0x125   : > { %v1290_v5 = vadd.f32 %v1283_v55, %v1240_v20  ;;  %v4073_v45 = vrot.slane %v4071_v44, 1 }
 0x126   : > { %v1398_v49 = vpop.f32.mrf.mxu1  ;;  %8914 = vmatmul.mubr.msk.bf16.vlgmr.msra.gmra.mxu1 %vm241_vm3, %v3757_v26  ;;  %v1236_v60 = vpop.f32.mrf.mxu0 }
 0x127   : > { %8924 = vmatpush3.bf16.msra.mxu1 %v9817_v29  ;;  %8925 = vmatprep.mubr.msk.bf16.mxu1 %vm9515_vm2, %v9513_v1  ;;  %v1241_v3 = vadd.f32 %v1236_v60, %v1189_v8 }
 0x128   : > { %v8627_v63 = vpop.f32.mrf.mxu1  ;;  %8935 = vmatprep.subr.bf16.mxu1 %v9513_v1  ;;  %v8610_v11 = vpop.f32.mrf.mxu0 }
 0x129   : > { %v1291_v17 = vadd.f32 %v1286_v23, %v1241_v3  ;;  %v4069_v23 = vshrl.u32 %v10220_v33, 16  ;;  %v3913_v63 = vrot.slane %v10185_v10, 1 }
 0x12a   : > { %v1401_v56 = vpop.f32.mrf.mxu1  ;;  %v1343_v35 = vpop.f32.mrf.mxu0  ;;  %8908 = vmatmul.mubr.msk.bf16.vlgmr.msra.gmra.mxu0 %vm241_vm3, %v3710_v0 }
 0x12b   : > { %8918 = vmatpush3.bf16.msra.mxu0 %v9837_v39  ;;  %8919 = vmatprep.mubr.msk.bf16.mxu0 %vm9515_vm2, %v9513_v1  ;;  %v1350_v26 = vadd.f32 %v1343_v35, %v1290_v5  ;;  %v4074_v11 = vor.u32 %v4073_v45, %v4069_v23  ;;  %v10254_v35 = vld [vmem:[%s10963_s2] ss:$0 sm:$0xff] }
 0x12c   : > { %v8628_v31 = vpop.f32.mrf.mxu1  ;;  %v8621_v50 = vpop.f32.mrf.mxu0  ;;  %8929 = vmatprep.subr.bf16.mxu0 %v9513_v1 }
 0x12d   : > { %v1405_v38 = vadd.f32 %v1398_v49, %v1350_v26 }
 0x12e   : > { %v1500_v42 = vpop.f32.mrf.mxu1  ;;  %8926 = vmatmul.mubr.msk.bf16.vlgmr.msra.gmra.mxu1 %vm241_vm3, %v3866_v51  ;;  %v1346_v32 = vpop.f32.mrf.mxu0 }
 0x12f   : > { %8936 = vmatpush3.bf16.msra.mxu1 %v9840_v41  ;;  %8937 = vmatprep.mubr.msk.bf16.mxu1 %vm9515_vm2, %v9513_v1  ;;  %v1351_v36 = vadd.f32 %v1346_v32, %v1291_v17  ;;  %v4009_v32 = vrot.slane %v10185_v10, 2 }
 0x130   : > { %v8639_v22 = vpop.f32.mrf.mxu1  ;;  %8947 = vmatprep.subr.bf16.mxu1 %v9513_v1  ;;  %v8622_v40 = vpop.f32.mrf.mxu0 }
 0x131   : > { %v1406_v0 = vadd.f32 %v1401_v56, %v1351_v36  ;;  %v10292_v36 = vld [vmem:[%s9606_s30 + $0x20] sm:$0xff]  }
 0x132   : > { %v1503_v28 = vpop.f32.mrf.mxu1  ;;  %v1448_v55 = vpop.f32.mrf.mxu0  ;;  %8920 = vmatmul.mubr.msk.bf16.vlgmr.msra.gmra.mxu0 %vm241_vm3, %v10185_v10 }
 0x133   : > { %8930 = vmatpush3.bf16.msra.mxu0 %v9857_v48  ;;  %8931 = vmatprep.mubr.msk.bf16.mxu0 %vm9515_vm2, %v9513_v1  ;;  %v1455_v53 = vadd.f32 %v1448_v55, %v1405_v38 }
 0x134   : > { %v8640_v30 = vpop.f32.mrf.mxu1  ;;  %v8633_v12 = vpop.f32.mrf.mxu0  ;;  %8941 = vmatprep.subr.bf16.mxu0 %v9513_v1 }
 0x135   : > { %v1507_v20 = vadd.f32 %v1500_v42, %v1455_v53 }
 0x136   : > { %v10235_v16 = vpop.f32.mrf.mxu1  ;;  %8938 = vmatmul.mubr.msk.bf16.vlgmr.msra.gmra.mxu1 %vm241_vm3, %v3962_v14  ;;  %v1451_v49 = vpop.f32.mrf.mxu0 }
 0x137   : > { %8948 = vmatpush3.bf16.msra.mxu1 %v9590_v7  ;;  %8949 = vmatprep.mubr.msk.bf16.mxu1 %vm9515_vm2, %v9513_v1  ;;  %v1456_v51 = vadd.f32 %v1451_v49, %v1406_v0  ;;  %v4258_v49 = vrot.slane %v10220_v33, 2 }
 0x138   : > { %v8651_v60 = vpop.f32.mrf.mxu1  ;;  %8959 = vmatprep.subr.bf16.mxu1 %v9513_v1  ;;  %v8634_v47 = vpop.f32.mrf.mxu0 }
 0x139   : > { %v1508_v58 = vadd.f32 %v1503_v28, %v1456_v51  ;;  %v4162_v28 = vrot.slane %v10220_v33, 1  ;;  %v4360_v60 = vshll.u32 %v10292_v36, 16  ;;  %v4209_v47 = vrot.slane %v4069_v23, 1 }
 0x13a   : > { %v10247_v19 = vpop.f32.mrf.mxu1  ;;  %v1550_v31 = vpop.f32.mrf.mxu0  ;;  %8932 = vmatmul.mubr.msk.bf16.vlgmr.msra.gmra.mxu0 %vm241_vm3, %v3913_v63 }
 0x13b   : > { %v1557_v50 = vadd.f32 %v1550_v31, %v1507_v20  ;;  %8942 = vmatpush3.bf16.msra.mxu0 %v9875_v57  ;;  %8943 = vmatprep.mubr.msk.bf16.mxu0 %vm9515_vm2, %v9513_v1  ;;  %v4358_v31 = vshrl.u32 %v10292_v36, 16 }
 0x13c   : > { %v8652_v8 = vpop.f32.mrf.mxu1  ;;  %v8645_v56 = vpop.f32.mrf.mxu0  ;;  %8953 = vmatprep.subr.bf16.mxu0 %v9513_v1 }
 0x13d   : > { %v1565_v62 = vadd.f32 %v10254_v35, %v1557_v50  ;;  %v4362_v8 = vrot.slane %v4360_v60, 1 }
 0x13e   : > { %v10265_v42 = vpop.f32.mrf.mxu1  ;;  %8950 = vmatmul.mubr.msk.bf16.vlgmr.msra.gmra.mxu1 %vm241_vm3, %v4074_v11  ;;  %v1553_v3 = vpop.f32.mrf.mxu0  ;;  %v4210_v11 = vrot.slane %v4071_v44, 2 }
 0x13f   : > { %8960 = vmatpush3.bf16.msra.mxu1 %v9624_v18  ;;  %8961 = vmatprep.mubr.msk.bf16.mxu1 %vm9515_vm2, %v9513_v1  ;;  %1568 = vst.msk [vmem:[%s10263_s25] sm:$0xff] %vm1567_vm4, %v1565_v62  ;;  %v1558_v22 = vadd.f32 %v1553_v3, %v1508_v58  ;;  %v4363_v62 = vor.u32 %v4362_v8, %v4358_v31 }
 0x140   : > { %v8663_v5 = vpop.f32.mrf.mxu1  ;;  %8971 = vmatprep.subr.bf16.mxu1 %v9513_v1  ;;  %v8646_v26 = vpop.f32.mrf.mxu0  ;;  %v4211_v23 = vor.u32 %v4210_v11, %v4209_v47 }
 0x141   : > { %v1566_v14 = vadd.f32 %v10254_v35, %v1558_v22  ;;  %v4457_v22 = vrot.slane %v4358_v31, 1  ;;  %v4458_v26 = vrot.slane %v4360_v60, 2  ;;  %v4410_v31 = vrot.slane %v10292_v36, 1 }
 0x142   : > { %v10277_v40 = vpop.f32.mrf.mxu1  ;;  %v1665_v17 = vpop.f32.mrf.mxu0  ;;  %8944 = vmatmul.mubr.msk.bf16.vlgmr.msra.gmra.mxu0 %vm241_vm3, %v4009_v32 }
 0x143   : > { %1570 = vst.msk [vmem:[%s10263_s25 + $0x8] sm:$0xf] %vm1569_vm5, %v1566_v14  ;;  %8954 = vmatpush3.bf16.msra.mxu0 %v9587_v6  ;;  %8955 = vmatprep.mubr.msk.bf16.mxu0 %vm9515_vm2, %v9513_v1 }
 0x144   : > { %v8664_v55 = vpop.f32.mrf.mxu1  ;;  %v8657_v10 = vpop.f32.mrf.mxu0  ;;  %8965 = vmatprep.subr.bf16.mxu0 %v9513_v1 }
 0x146   : > { %v10287_v30 = vpop.f32.mrf.mxu1  ;;  %8962 = vmatmul.mubr.msk.bf16.vlgmr.msra.gmra.mxu1 %vm241_vm3, %v4162_v28  ;;  %v1668_v38 = vpop.f32.mrf.mxu0 }
 0x147   : > { %8972 = vmatpush3.bf16.msra.mxu1 %v9646_v25  ;;  %8973 = vmatprep.mubr.msk.bf16.mxu1 %vm9515_vm2, %v9513_v1 }
 0x148   : > { %v8675_v12 = vpop.f32.mrf.mxu1  ;;  %8983 = vmatprep.subr.bf16.mxu1 %v9513_v1  ;;  %v8658_v45 = vpop.f32.mrf.mxu0 }
 0x149   : > { %v4459_v12 = vor.u32 %v4458_v26, %v4457_v22  ;;  %v1666_v45 = vadd.f32 %v1665_v17, %v10235_v16  ;;  %v1669_v16 = vadd.f32 %v1668_v38, %v10247_v19  ;;  %v4506_v22 = vrot.slane %v10292_v36, 2 }
 0x14a   : > { %v10298_v53 = vpop.f32.mrf.mxu1  ;;  %v1759_v63 = vpop.f32.mrf.mxu0  ;;  %8956 = vmatmul.mubr.msk.bf16.vlgmr.msra.gmra.mxu0 %vm241_vm3, %v10220_v33 }
 0x14b   : > { %8966 = vmatpush3.bf16.msra.mxu0 %v9609_v9  ;;  %8967 = vmatprep.mubr.msk.bf16.mxu0 %vm9515_vm2, %v9513_v1  ;;  %v1717_v17 = vadd.f32 %v10265_v42, %v1666_v45  ;;  %v1718_v19 = vadd.f32 %v10277_v40, %v1669_v16 }
 0x14c   : > { %v8676_v0 = vpop.f32.mrf.mxu1  ;;  %v8669_v51 = vpop.f32.mrf.mxu0  ;;  %8977 = vmatprep.subr.bf16.mxu0 %v9513_v1 }
 0x14d   : > { %v1766_v8 = vadd.f32 %v1759_v63, %v1717_v17 }
 0x14e   : > { %v10311_v20 = vpop.f32.mrf.mxu1  ;;  %8974 = vmatmul.mubr.msk.bf16.vlgmr.msra.gmra.mxu1 %vm241_vm3, %v4258_v49  ;;  %v1762_v33 = vpop.f32.mrf.mxu0 }
 0x14f   : > { %8984 = vmatpush3.bf16.msra.mxu1 %v9669_v34  ;;  %8985 = vmatprep.mubr.msk.bf16.mxu1 %vm9515_vm2, %v9513_v1 }
 0x150   : > { %v8687_v44 = vpop.f32.mrf.mxu1  ;;  %8995 = vmatprep.subr.bf16.mxu1 %v9513_v1  ;;  %v8670_v50 = vpop.f32.mrf.mxu0 }
 0x151   : > { %v10356_v50 = vld [vmem:[%s9606_s30 + $0x28] sm:$0xff]  }
 0x152   : > { %v10320_v56 = vpop.f32.mrf.mxu1  ;;  %v1859_v58 = vpop.f32.mrf.mxu0  ;;  %8968 = vmatmul.mubr.msk.bf16.vlgmr.msra.gmra.mxu0 %vm241_vm3, %v4211_v23  ;;  %v4608_v26 = vshll.u32 %v10356_v50, 16 }
 0x153   : > { %8978 = vmatpush3.bf16.msra.mxu0 %v9627_v21  ;;  %8979 = vmatprep.mubr.msk.bf16.mxu0 %vm9515_vm2, %v9513_v1 }
 0x154   : > { %v8688_v3 = vpop.f32.mrf.mxu1  ;;  %v8681_v5 = vpop.f32.mrf.mxu0  ;;  %8989 = vmatprep.subr.bf16.mxu0 %v9513_v1  ;;  %v4610_v17 = vrot.slane %v4608_v26, 1 }
 0x155   : > { %v1813_v3 = vadd.f32 %v10287_v30, %v1766_v8 }
 0x156   : > { %v10326_v32 = vpop.f32.mrf.mxu1  ;;  %8986 = vmatmul.mubr.msk.bf16.vlgmr.msra.gmra.mxu1 %vm241_vm3, %v4363_v62  ;;  %v1862_v28 = vpop.f32.mrf.mxu0  ;;  %v1767_v62 = vadd.f32 %v1762_v33, %v1718_v19 }
 0x157   : > { %8996 = vmatpush3.bf16.msra.mxu1 %v9695_v43  ;;  %8997 = vmatprep.mubr.msk.bf16.mxu1 %vm9515_vm2, %v9513_v1  ;;  %v1866_v40 = vadd.f32 %v1859_v58, %v1813_v3  ;;  %v4658_v58 = vrot.slane %v10356_v50, 1 }
 0x158   : > { %v8699_v14 = vpop.f32.mrf.mxu1  ;;  %9007 = vmatprep.subr.bf16.mxu1 %v9513_v1  ;;  %v8682_v55 = vpop.f32.mrf.mxu0 }
 0x159   : > { %v1814_v14 = vadd.f32 %v10298_v53, %v1767_v62 }
 0x15a   : > { %v10334_v10 = vpop.f32.mrf.mxu1  ;;  %v1958_v49 = vpop.f32.mrf.mxu0  ;;  %8980 = vmatmul.mubr.msk.bf16.vlgmr.msra.gmra.mxu0 %vm241_vm3, %v10292_v36  ;;  %v4606_v36 = vshrl.u32 %v10356_v50, 16 }
 0x15b   : > { %8990 = vmatpush3.bf16.msra.mxu0 %v9650_v27  ;;  %8991 = vmatprep.mubr.msk.bf16.mxu0 %vm9515_vm2, %v9513_v1  ;;  %v1867_v45 = vadd.f32 %v1862_v28, %v1814_v14 }
 0x15c   : > { %v8700_v60 = vpop.f32.mrf.mxu1  ;;  %v8693_v0 = vpop.f32.mrf.mxu0  ;;  %9001 = vmatprep.subr.bf16.mxu0 %v9513_v1  ;;  %v4705_v14 = vrot.slane %v4606_v36, 1 }
 0x15d   : > { %v1918_v60 = vadd.f32 %v10311_v20, %v1866_v40  ;;  %v10390_v20 = vld [vmem:[%s9606_s30 + $0x30] sm:$0xff]   ;;  %v1919_v28 = vadd.f32 %v10320_v56, %v1867_v45 }
 0x15e   : > { %v10342_v47 = vpop.f32.mrf.mxu1  ;;  %8998 = vmatmul.mubr.msk.bf16.vlgmr.msra.gmra.mxu1 %vm241_vm3, %v4459_v12  ;;  %v1961_v11 = vpop.f32.mrf.mxu0  ;;  %v4856_v56 = vshll.u32 %v10390_v20, 16 }
 0x15f   : > { %9008 = vmatpush3.bf16.msra.mxu1 %v9718_v52  ;;  %9009 = vmatprep.mubr.msk.bf16.mxu1 %vm9515_vm2, %v9513_v1  ;;  %v1966_v19 = vadd.f32 %v1961_v11, %v1919_v28 }
 0x160   : > { %v8711_v51 = vpop.f32.mrf.mxu1  ;;  %9019 = vmatprep.subr.bf16.mxu1 %v9513_v1  ;;  %v8694_v44 = vpop.f32.mrf.mxu0 }
 0x161   : > { %v1965_v51 = vadd.f32 %v1958_v49, %v1918_v60  ;;  %v4611_v44 = vor.u32 %v4610_v17, %v4606_v36 }
 0x162   : > { %v10353_v23 = vpop.f32.mrf.mxu1  ;;  %v2054_v42 = vpop.f32.mrf.mxu0  ;;  %8992 = vmatmul.mubr.msk.bf16.vlgmr.msra.gmra.mxu0 %vm241_vm3, %v4410_v31 }
 0x163   : > { %9002 = vmatpush3.bf16.msra.mxu0 %v9675_v37  ;;  %9003 = vmatprep.mubr.msk.bf16.mxu0 %vm9515_vm2, %v9513_v1 }
 0x164   : > { %v8712_v38 = vpop.f32.mrf.mxu1  ;;  %v8705_v63 = vpop.f32.mrf.mxu0  ;;  %9013 = vmatprep.subr.bf16.mxu0 %v9513_v1 }
 0x165   : > { %v2014_v38 = vadd.f32 %v10326_v32, %v1965_v51  ;;  %v4754_v63 = vrot.slane %v10356_v50, 2 }
 0x166   : > { %v10364_v5 = vpop.f32.mrf.mxu1  ;;  %9010 = vmatmul.mubr.msk.bf16.vlgmr.msra.gmra.mxu1 %vm241_vm3, %v10356_v50  ;;  %v2057_v30 = vpop.f32.mrf.mxu0  ;;  %v4854_v50 = vshrl.u32 %v10390_v20, 16 }
 0x167   : > { %9020 = vmatpush3.bf16.msra.mxu1 %v9740_v59  ;;  %9021 = vmatprep.mubr.msk.bf16.mxu1 %vm9515_vm2, %v9513_v1  ;;  %v2061_v40 = vadd.f32 %v2054_v42, %v2014_v38  ;;  %v4858_v42 = vrot.slane %v4856_v56, 1 }
 0x168   : > { %v8723_v33 = vpop.f32.mrf.mxu1  ;;  %9031 = vmatprep.subr.bf16.mxu1 %v9513_v1  ;;  %v8706_v55 = vpop.f32.mrf.mxu0 }
 0x169   : > { %v4706_v55 = vrot.slane %v4608_v26, 2  ;;  %v2114_v60 = vadd.f32 %v10342_v47, %v2061_v40 }
 0x16a   : > { %v10376_v12 = vpop.f32.mrf.mxu1  ;;  %v2159_v0 = vpop.f32.mrf.mxu0  ;;  %9004 = vmatmul.mubr.msk.bf16.vlgmr.msra.gmra.mxu0 %vm241_vm3, %v4506_v22 }
 0x16b   : > { %9014 = vmatpush3.bf16.msra.mxu0 %v9698_v46  ;;  %9015 = vmatprep.mubr.msk.bf16.mxu0 %vm9515_vm2, %v9513_v1  ;;  %v2166_v36 = vadd.f32 %v2159_v0, %v2114_v60  ;;  %v4953_v0 = vrot.slane %v4854_v50, 1  ;;  %v4906_v60 = vrot.slane %v10390_v20, 1 }
 0x16c   : > { %v8724_v16 = vpop.f32.mrf.mxu1  ;;  %v8717_v53 = vpop.f32.mrf.mxu0  ;;  %9025 = vmatprep.subr.bf16.mxu0 %v9513_v1 }
 0x16d   : > { %v4707_v16 = vor.u32 %v4706_v55, %v4705_v14  ;;  %v4859_v53 = vor.u32 %v4858_v42, %v4854_v50 }
 0x16e   : > { %v10385_v31 = vpop.f32.mrf.mxu1  ;;  %9022 = vmatmul.mubr.msk.bf16.vlgmr.msra.gmra.mxu1 %vm241_vm3, %v4658_v58  ;;  %v2162_v49 = vpop.f32.mrf.mxu0  ;;  %v2015_v58 = vadd.f32 %v10334_v10, %v1966_v19 }
 0x16f   : > { %9032 = vmatpush3.bf16.msra.mxu1 %v9764_v2  ;;  %9033 = vmatprep.mubr.msk.bf16.mxu1 %vm9515_vm2, %v9513_v1 }
 0x170   : > { %v8735_v8 = vpop.f32.mrf.mxu1  ;;  %9043 = vmatprep.subr.bf16.mxu1 %v9513_v1  ;;  %v8718_v62 = vpop.f32.mrf.mxu0  ;;  %v2062_v45 = vadd.f32 %v2057_v30, %v2015_v58 }
 0x172   : > { %v10398_v3 = vpop.f32.mrf.mxu1  ;;  %v2255_v33 = vpop.f32.mrf.mxu0  ;;  %9016 = vmatmul.mubr.msk.bf16.vlgmr.msra.gmra.mxu0 %vm241_vm3, %v4611_v44  ;;  %v2115_v28 = vadd.f32 %v10353_v23, %v2062_v45  ;;  %v2213_v44 = vadd.f32 %v10364_v5, %v2166_v36  ;;  %v4954_v23 = vrot.slane %v4856_v56, 2 }
 0x173   : > { %9026 = vmatpush3.bf16.msra.mxu0 %v9721_v54  ;;  %9027 = vmatprep.mubr.msk.bf16.mxu0 %vm9515_vm2, %v9513_v1 }
 0x174   : > { %v8736_v22 = vpop.f32.mrf.mxu1  ;;  %v8729_v32 = vpop.f32.mrf.mxu0  ;;  %9037 = vmatprep.subr.bf16.mxu0 %v9513_v1  ;;  %v2167_v30 = vadd.f32 %v2162_v49, %v2115_v28  ;;  %v2262_v62 = vadd.f32 %v2255_v33, %v2213_v44  ;;  %v4955_v14 = vor.u32 %v4954_v23, %v4953_v0  ;;  %v5002_v0 = vrot.slane %v10390_v20, 2 }
 0x176   : > { %v2407_v11 = vpop.f32.mrf.mxu1  ;;  %9034 = vmatmul.mubr.msk.bf16.vlgmr.msra.gmra.mxu1 %vm241_vm3, %v4754_v63  ;;  %v2258_v10 = vpop.f32.mrf.mxu0  ;;  %v2214_v63 = vadd.f32 %v10376_v12, %v2167_v30  ;;  %v2309_v58 = vadd.f32 %v10385_v31, %v2262_v62 }
 0x177   : > { %9044 = vmatpush3.bf16.msra.mxu1 %v9788_v13  ;;  %9045 = vmatprep.mubr.msk.bf16.mxu1 %vm9515_vm2, %v9513_v1 }
 0x178   : > { %v8747_v26 = vpop.f32.mrf.mxu1  ;;  %9055 = vmatprep.subr.bf16.mxu1 %v9513_v1  ;;  %v8730_v17 = vpop.f32.mrf.mxu0  ;;  %v2263_v55 = vadd.f32 %v2258_v10, %v2214_v63 }
 0x179   : > { %v10443_v17 = vld [vmem:[%s9606_s30 + $0x38] sm:$0xff]  }
 0x17a   : > { %v2410_v51 = vpop.f32.mrf.mxu1  ;;  %v2355_v8 = vpop.f32.mrf.mxu0  ;;  %9028 = vmatmul.mubr.msk.bf16.vlgmr.msra.gmra.mxu0 %vm241_vm3, %v4707_v16  ;;  %v2310_v31 = vadd.f32 %v10398_v3, %v2263_v55  ;;  %v5108_v23 = vshll.u32 %v10443_v17, 16  ;;  %v5158_v63 = vrot.slane %v10443_v17, 1  ;;  %v5106_v55 = vshrl.u32 %v10443_v17, 16 }
 0x17b   : > { %9038 = vmatpush3.bf16.msra.mxu0 %v9743_v61  ;;  %9039 = vmatprep.mubr.msk.bf16.mxu0 %vm9515_vm2, %v9513_v1  ;;  %v2362_v33 = vadd.f32 %v2355_v8, %v2309_v58 }
 0x17c   : > { %v8748_v47 = vpop.f32.mrf.mxu1  ;;  %v8741_v19 = vpop.f32.mrf.mxu0  ;;  %9049 = vmatprep.subr.bf16.mxu0 %v9513_v1  ;;  %v5110_v58 = vrot.slane %v5108_v23, 1 }
 0x17d   : > { %v2414_v26 = vadd.f32 %v2407_v11, %v2362_v33 }
 0x17e   : > { %v2503_v38 = vpop.f32.mrf.mxu1  ;;  %9046 = vmatmul.mubr.msk.bf16.vlgmr.msra.gmra.mxu1 %vm241_vm3, %v4859_v53  ;;  %v2358_v5 = vpop.f32.mrf.mxu0 }
 0x17f   : > { %9056 = vmatpush3.bf16.msra.mxu1 %v9813_v24  ;;  %9057 = vmatprep.mubr.msk.bf16.mxu1 %vm9515_vm2, %v9513_v1  ;;  %v2363_v10 = vadd.f32 %v2358_v5, %v2310_v31  ;;  %v5111_v31 = vor.u32 %v5110_v58, %v5106_v55 }
 0x180   : > { %v8759_v49 = vpop.f32.mrf.mxu1  ;;  %9067 = vmatprep.subr.bf16.mxu1 %v9513_v1  ;;  %v8742_v40 = vpop.f32.mrf.mxu0 }
 0x181   : > { %v2415_v8 = vadd.f32 %v2410_v51, %v2363_v10  ;;  %v5254_v10 = vrot.slane %v10443_v17, 2 }
 0x182   : > { %v2506_v22 = vpop.f32.mrf.mxu1  ;;  %v2454_v32 = vpop.f32.mrf.mxu0  ;;  %9040 = vmatmul.mubr.msk.bf16.vlgmr.msra.gmra.mxu0 %vm241_vm3, %v10390_v20 }
 0x183   : > { %9050 = vmatpush3.bf16.msra.mxu0 %v9768_v4  ;;  %9051 = vmatprep.mubr.msk.bf16.mxu0 %vm9515_vm2, %v9513_v1  ;;  %v2461_v53 = vadd.f32 %v2454_v32, %v2414_v26 }
 0x184   : > { %v8760_v56 = vpop.f32.mrf.mxu1  ;;  %v8753_v50 = vpop.f32.mrf.mxu0  ;;  %9061 = vmatprep.subr.bf16.mxu0 %v9513_v1 }
 0x185   : > { %v2510_v44 = vadd.f32 %v2503_v38, %v2461_v53 }
 0x186   : > { %v2607_v12 = vpop.f32.mrf.mxu1  ;;  %9058 = vmatmul.mubr.msk.bf16.vlgmr.msra.gmra.mxu1 %vm241_vm3, %v4955_v14  ;;  %v2457_v42 = vpop.f32.mrf.mxu0 }
 0x187   : > { %9068 = vmatpush3.bf16.msra.mxu1 %v9837_v39  ;;  %9069 = vmatprep.mubr.msk.bf16.mxu1 %vm9515_vm2, %v9513_v1  ;;  %v2462_v11 = vadd.f32 %v2457_v42, %v2415_v8  ;;  %v5206_v8 = vrot.slane %v5108_v23, 2 }
 0x188   : > { %v8771_v45 = vpop.f32.mrf.mxu1  ;;  %9079 = vmatprep.subr.bf16.mxu1 %v9513_v1  ;;  %v8754_v16 = vpop.f32.mrf.mxu0 }
 0x189   : > { %v2511_v40 = vadd.f32 %v2506_v22, %v2462_v11 }
 0x18a   : > { %v2610_v36 = vpop.f32.mrf.mxu1  ;;  %v2550_v28 = vpop.f32.mrf.mxu0  ;;  %9052 = vmatmul.mubr.msk.bf16.vlgmr.msra.gmra.mxu0 %vm241_vm3, %v4906_v60 }
 0x18b   : > { %9062 = vmatpush3.bf16.msra.mxu0 %v9791_v15  ;;  %9063 = vmatprep.mubr.msk.bf16.mxu0 %vm9515_vm2, %v9513_v1  ;;  %v2557_v62 = vadd.f32 %v2550_v28, %v2510_v44 }
 0x18c   : > { %v8772_v3 = vpop.f32.mrf.mxu1  ;;  %v8765_v47 = vpop.f32.mrf.mxu0  ;;  %9073 = vmatprep.subr.bf16.mxu0 %v9513_v1 }
 0x18d   : > { %v2614_v56 = vadd.f32 %v2607_v12, %v2557_v62  ;;  %v5205_v3 = vrot.slane %v5106_v55, 1  ;;  %v10473_v47 = vld [vmem:[%s9606_s30 + $0x20] sm:$0xff]  }
 0x18e   : > { %v2706_v30 = vpop.f32.mrf.mxu1  ;;  %9070 = vmatmul.mubr.msk.bf16.vlgmr.msra.gmra.mxu1 %vm241_vm3, %v10443_v17  ;;  %v2553_v51 = vpop.f32.mrf.mxu0  ;;  %v5316_v23 = vshll.u32 %v10473_v47, 16  ;;  %v5314_v55 = vshrl.u32 %v10473_v47, 16 }
 0x18f   : > { %9080 = vmatpush3.bf16.msra.mxu1 %v9857_v48  ;;  %9081 = vmatprep.mubr.msk.bf16.mxu1 %vm9515_vm2, %v9513_v1  ;;  %v2558_v32 = vadd.f32 %v2553_v51, %v2511_v40 }
 0x190   : > { %v8783_v19 = vpop.f32.mrf.mxu1  ;;  %9091 = vmatprep.subr.bf16.mxu1 %v9513_v1  ;;  %v8766_v5 = vpop.f32.mrf.mxu0  ;;  %v5318_v58 = vrot.slane %v5316_v23, 1 }
 0x191   : > { %v2615_v42 = vadd.f32 %v2610_v36, %v2558_v32 }
 0x192   : > { %v2709_v49 = vpop.f32.mrf.mxu1  ;;  %v2659_v38 = vpop.f32.mrf.mxu0  ;;  %9064 = vmatmul.mubr.msk.bf16.vlgmr.msra.gmra.mxu0 %vm241_vm3, %v5002_v0  ;;  %v5207_v0 = vor.u32 %v5206_v8, %v5205_v3  ;;  %v5407_v3 = vrot.slane %v10473_v47, 1 }
 0x193   : > { %9074 = vmatpush3.bf16.msra.mxu0 %v9817_v29  ;;  %9075 = vmatprep.mubr.msk.bf16.mxu0 %vm9515_vm2, %v9513_v1  ;;  %v2666_v22 = vadd.f32 %v2659_v38, %v2614_v56 }
 0x194   : > { %v8784_v14 = vpop.f32.mrf.mxu1  ;;  %v8777_v20 = vpop.f32.mrf.mxu0  ;;  %9085 = vmatprep.subr.bf16.mxu0 %v9513_v1 }
 0x195   : > { %v2713_v16 = vadd.f32 %v2706_v30, %v2666_v22  ;;  %v5455_v22 = vrot.slane %v5316_v23, 2 }
 0x196   : > { %v2802_v33 = vpop.f32.mrf.mxu1  ;;  %9082 = vmatmul.mubr.msk.bf16.vlgmr.msra.gmra.mxu1 %vm241_vm3, %v5158_v63  ;;  %v2662_v50 = vpop.f32.mrf.mxu0 }
 0x197   : > { %9092 = vmatpush3.bf16.msra.mxu1 %v9875_v57  ;;  %9093 = vmatprep.mubr.msk.bf16.mxu1 %vm9515_vm2, %v9513_v1  ;;  %v2667_v26 = vadd.f32 %v2662_v50, %v2615_v42 }
 0x198   : > { %v8795_v12 = vpop.f32.mrf.mxu1  ;;  %9103 = vmatprep.subr.bf16.mxu1 %v9513_v1  ;;  %v8778_v45 = vpop.f32.mrf.mxu0 }
 0x199   : > { %v2714_v30 = vadd.f32 %v2709_v49, %v2667_v26  ;;  %v5319_v12 = vor.u32 %v5318_v58, %v5314_v55 }
 0x19a   : > { %v2805_v60 = vpop.f32.mrf.mxu1  ;;  %v2755_v53 = vpop.f32.mrf.mxu0  ;;  %9076 = vmatmul.mubr.msk.bf16.vlgmr.msra.gmra.mxu0 %vm241_vm3, %v5111_v31 }
 0x19b   : > { %v2762_v11 = vadd.f32 %v2755_v53, %v2713_v16  ;;  %9086 = vmatpush3.bf16.msra.mxu0 %v9840_v41  ;;  %9087 = vmatprep.mubr.msk.bf16.mxu0 %vm9515_vm2, %v9513_v1 }
 0x19c   : > { %v8796_v28 = vpop.f32.mrf.mxu1  ;;  %v8789_v36 = vpop.f32.mrf.mxu0  ;;  %9097 = vmatprep.subr.bf16.mxu0 %v9513_v1 }
 0x19d   : > { %v2809_v17 = vadd.f32 %v2802_v33, %v2762_v11  ;;  %v5454_v33 = vrot.slane %v5314_v55, 1  ;;  %v9462_v36 = vld [vmem:[%s9606_s30 + $0x28] sm:$0xff]  }
 0x19e   : > { %v10478_v44 = vpop.f32.mrf.mxu1  ;;  %9094 = vmatmul.mubr.msk.bf16.vlgmr.msra.gmra.mxu1 %vm241_vm3, %v5254_v10  ;;  %v2758_v51 = vpop.f32.mrf.mxu0 }
 0x19f   : > { %9104 = vmatpush3.bf16.msra.mxu1 %v9587_v6  ;;  %9105 = vmatprep.mubr.msk.bf16.mxu1 %vm9515_vm2, %v9513_v1  ;;  %v2811_v62 = vadd.f32 %v10254_v35, %v2809_v17  ;;  %v2763_v5 = vadd.f32 %v2758_v51, %v2714_v30  ;;  %v5456_v45 = vor.u32 %v5455_v22, %v5454_v33  ;;  %v10561_v22 = vld [vmem:[%s9606_s30 + $0x30] sm:$0xff]  }
 0x1a0   : > { %v8807_v19 = vpop.f32.mrf.mxu1  ;;  %9115 = vmatprep.subr.bf16.mxu1 %v9513_v1  ;;  %v8790_v63 = vpop.f32.mrf.mxu0 }
 0x1a1   : > { %8019 = vst.msk [vmem:[%s10263_s25 + $0x10] sm:$0xff] %vm1567_vm4, %v2811_v62  ;;  %v2810_v49 = vadd.f32 %v2805_v60, %v2763_v5  ;;  %v5503_v62 = vrot.slane %v10473_v47, 2  ;;  %v5605_v5 = vshll.u32 %v9462_v36, 16 }
 0x1a2   : > { %v10488_v40 = vpop.f32.mrf.mxu1  ;;  %v10492_v38 = vpop.f32.mrf.mxu0  ;;  %9088 = vmatmul.mubr.msk.bf16.vlgmr.msra.gmra.mxu0 %vm241_vm3, %v5207_v0 }
 0x1a3   : > { %v2812_v32 = vadd.f32 %v10254_v35, %v2810_v49  ;;  %9098 = vmatpush3.bf16.msra.mxu0 %v9590_v7  ;;  %9099 = vmatprep.mubr.msk.bf16.mxu0 %vm9515_vm2, %v9513_v1 }
 0x1a4   : > { %v8808_v14 = vpop.f32.mrf.mxu1  ;;  %v8801_v56 = vpop.f32.mrf.mxu0  ;;  %9109 = vmatprep.subr.bf16.mxu0 %v9513_v1 }
 0x1a5   : > { %8020 = vst.msk [vmem:[%s10263_s25 + $0x18] sm:$0xf] %vm1569_vm5, %v2812_v32  ;;  %v5655_v14 = vrot.slane %v9462_v36, 1  ;;  %v5603_v32 = vshrl.u32 %v9462_v36, 16  ;;  %v5607_v56 = vrot.slane %v5605_v5, 1 }
 0x1a6   : > { %v10500_v20 = vpop.f32.mrf.mxu1  ;;  %9106 = vmatmul.mubr.msk.bf16.vlgmr.msra.gmra.mxu1 %vm241_vm3, %v10473_v47  ;;  %v10510_v35 = vpop.f32.mrf.mxu0 }
 0x1a7   : > { %9116 = vmatpush3.bf16.msra.mxu1 %v9609_v9  ;;  %9117 = vmatprep.mubr.msk.bf16.mxu1 %vm9515_vm2, %v9513_v1 }
 0x1a8   : > { %v8819_v50 = vpop.f32.mrf.mxu1  ;;  %9127 = vmatprep.subr.bf16.mxu1 %v9513_v1  ;;  %v8802_v31 = vpop.f32.mrf.mxu0 }
 0x1a9   : > { %v5608_v31 = vor.u32 %v5607_v56, %v5603_v32 }
 0x1aa   : > { %v10513_v42 = vpop.f32.mrf.mxu1  ;;  %v2955_v60 = vpop.f32.mrf.mxu0  ;;  %9100 = vmatmul.mubr.msk.bf16.vlgmr.msra.gmra.mxu0 %vm241_vm3, %v5319_v12 }
 0x1ab   : > { %9110 = vmatpush3.bf16.msra.mxu0 %v9624_v18  ;;  %9111 = vmatprep.mubr.msk.bf16.mxu0 %vm9515_vm2, %v9513_v1 }
 0x1ac   : > { %v8820_v10 = vpop.f32.mrf.mxu1  ;;  %v8813_v26 = vpop.f32.mrf.mxu0  ;;  %9121 = vmatprep.subr.bf16.mxu0 %v9513_v1 }
 0x1ae   : > { %v10519_v16 = vpop.f32.mrf.mxu1  ;;  %9118 = vmatmul.mubr.msk.bf16.vlgmr.msra.gmra.mxu1 %vm241_vm3, %v5456_v45  ;;  %v10526_v53 = vpop.f32.mrf.mxu0  ;;  %v2911_v45 = vadd.f32 %v10478_v44, %v10492_v38 }
 0x1af   : > { %9128 = vmatpush3.bf16.msra.mxu1 %v9627_v21  ;;  %9129 = vmatprep.mubr.msk.bf16.mxu1 %vm9515_vm2, %v9513_v1 }
 0x1b0   : > { %v8831_v28 = vpop.f32.mrf.mxu1  ;;  %9139 = vmatprep.subr.bf16.mxu1 %v9513_v1  ;;  %v8814_v8 = vpop.f32.mrf.mxu0 }
 0x1b1   : > { %v5751_v28 = vrot.slane %v9462_v36, 2  ;;  %v2962_v8 = vadd.f32 %v2955_v60, %v2911_v45  ;;  %v5851_v60 = vshrl.u32 %v10561_v22, 16 }
 0x1b2   : > { %v10530_v11 = vpop.f32.mrf.mxu1  ;;  %v10533_v17 = vpop.f32.mrf.mxu0  ;;  %9112 = vmatmul.mubr.msk.bf16.vlgmr.msra.gmra.mxu0 %vm241_vm3, %v5407_v3  ;;  %v5853_v3 = vshll.u32 %v10561_v22, 16 }
 0x1b3   : > { %9122 = vmatpush3.bf16.msra.mxu0 %v9646_v25  ;;  %9123 = vmatprep.mubr.msk.bf16.mxu0 %vm9515_vm2, %v9513_v1 }
 0x1b4   : > { %v8832_v30 = vpop.f32.mrf.mxu1  ;;  %v8825_v51 = vpop.f32.mrf.mxu0  ;;  %9133 = vmatprep.subr.bf16.mxu0 %v9513_v1 }
 0x1b6   : > { %v10539_v19 = vpop.f32.mrf.mxu1  ;;  %9130 = vmatmul.mubr.msk.bf16.vlgmr.msra.gmra.mxu1 %vm241_vm3, %v9462_v36  ;;  %v3054_v0 = vpop.f32.mrf.mxu0  ;;  %v5855_v36 = vrot.slane %v5853_v3, 1 }
 0x1b7   : > { %9140 = vmatpush3.bf16.msra.mxu1 %v9650_v27  ;;  %9141 = vmatprep.mubr.msk.bf16.mxu1 %vm9515_vm2, %v9513_v1 }
 0x1b8   : > { %v8843_v23 = vpop.f32.mrf.mxu1  ;;  %9151 = vmatprep.subr.bf16.mxu1 %v9513_v1  ;;  %v8826_v63 = vpop.f32.mrf.mxu0 }
 0x1b9   : > { %v5702_v23 = vrot.slane %v5603_v32, 1  ;;  %v2914_v63 = vadd.f32 %v10488_v40, %v10510_v35 }
 0x1ba   : > { %v10548_v49 = vpop.f32.mrf.mxu1  ;;  %v10550_v55 = vpop.f32.mrf.mxu0  ;;  %9124 = vmatmul.mubr.msk.bf16.vlgmr.msra.gmra.mxu0 %vm241_vm3, %v5503_v62  ;;  %v5703_v62 = vrot.slane %v5605_v5, 2 }
 0x1bb   : > { %9134 = vmatpush3.bf16.msra.mxu0 %v9669_v34  ;;  %9135 = vmatprep.mubr.msk.bf16.mxu0 %vm9515_vm2, %v9513_v1  ;;  %v2963_v5 = vadd.f32 %v10526_v53, %v2914_v63 }
 0x1bc   : > { %v8844_v58 = vpop.f32.mrf.mxu1  ;;  %v8837_v47 = vpop.f32.mrf.mxu0  ;;  %9145 = vmatprep.subr.bf16.mxu0 %v9513_v1 }
 0x1bd   : > { %v5704_v58 = vor.u32 %v5703_v62, %v5702_v23  ;;  %v3012_v53 = vadd.f32 %v10513_v42, %v2963_v5  ;;  %v5950_v42 = vrot.slane %v5851_v60, 1 }
 0x1be   : > { %v10556_v33 = vpop.f32.mrf.mxu1  ;;  %9142 = vmatmul.mubr.msk.bf16.vlgmr.msra.gmra.mxu1 %vm241_vm3, %v5655_v14  ;;  %v3159_v50 = vpop.f32.mrf.mxu0  ;;  %v3011_v14 = vadd.f32 %v10500_v20, %v2962_v8  ;;  %v5951_v8 = vrot.slane %v5853_v3, 2 }
 0x1bf   : > { %9152 = vmatpush3.bf16.msra.mxu1 %v9675_v37  ;;  %9153 = vmatprep.mubr.msk.bf16.mxu1 %vm9515_vm2, %v9513_v1  ;;  %v3059_v45 = vadd.f32 %v3054_v0, %v3012_v53  ;;  %v10630_v53 = vld [vmem:[%s9606_s30 + $0x38] sm:$0xff]  }
 0x1c0   : > { %v8855_v12 = vpop.f32.mrf.mxu1  ;;  %9163 = vmatprep.subr.bf16.mxu1 %v9513_v1  ;;  %v8838_v10 = vpop.f32.mrf.mxu0  ;;  %v3058_v32 = vadd.f32 %v10533_v17, %v3011_v14 }
 0x1c1   : > { %v5856_v12 = vor.u32 %v5855_v36, %v5851_v60  ;;  %v3112_v23 = vadd.f32 %v10530_v11, %v3059_v45 }
 0x1c2   : > { %v10569_v26 = vpop.f32.mrf.mxu1  ;;  %v3252_v30 = vpop.f32.mrf.mxu0  ;;  %9136 = vmatmul.mubr.msk.bf16.vlgmr.msra.gmra.mxu0 %vm241_vm3, %v5608_v31  ;;  %v3111_v10 = vadd.f32 %v10519_v16, %v3058_v32 }
 0x1c3   : > { %9146 = vmatpush3.bf16.msra.mxu0 %v9695_v43  ;;  %9147 = vmatprep.mubr.msk.bf16.mxu0 %vm9515_vm2, %v9513_v1  ;;  %v3164_v36 = vadd.f32 %v3159_v50, %v3112_v23 }
 0x1c4   : > { %v8856_v51 = vpop.f32.mrf.mxu1  ;;  %v8849_v44 = vpop.f32.mrf.mxu0  ;;  %9157 = vmatprep.subr.bf16.mxu0 %v9513_v1 }
 0x1c5   : > { %v3163_v51 = vadd.f32 %v10550_v55, %v3111_v10  ;;  %v5952_v44 = vor.u32 %v5951_v8, %v5950_v42  ;;  %v5999_v8 = vrot.slane %v10561_v22, 2 }
 0x1c6   : > { %v10578_v38 = vpop.f32.mrf.mxu1  ;;  %9154 = vmatmul.mubr.msk.bf16.vlgmr.msra.gmra.mxu1 %vm241_vm3, %v5751_v28  ;;  %v3255_v40 = vpop.f32.mrf.mxu0 }
 0x1c7   : > { %9164 = vmatpush3.bf16.msra.mxu1 %v9698_v46  ;;  %9165 = vmatprep.mubr.msk.bf16.mxu1 %vm9515_vm2, %v9513_v1  ;;  %v3210_v3 = vadd.f32 %v10539_v19, %v3163_v51  ;;  %v3211_v19 = vadd.f32 %v10548_v49, %v3164_v36  ;;  %v6101_v51 = vshll.u32 %v10630_v53, 16 }
 0x1c8   : > { %v8867_v35 = vpop.f32.mrf.mxu1  ;;  %9175 = vmatprep.subr.bf16.mxu1 %v9513_v1  ;;  %v8850_v56 = vpop.f32.mrf.mxu0 }
 0x1c9   : > { %v3259_v5 = vadd.f32 %v3252_v30, %v3210_v3  ;;  %v5903_v35 = vrot.slane %v10561_v22, 1  ;;  %v6099_v3 = vshrl.u32 %v10630_v53, 16 }
 0x1ca   : > { %v10590_v47 = vpop.f32.mrf.mxu1  ;;  %v3352_v31 = vpop.f32.mrf.mxu0  ;;  %9148 = vmatmul.mubr.msk.bf16.vlgmr.msra.gmra.mxu0 %vm241_vm3, %v5704_v58  ;;  %v3260_v58 = vadd.f32 %v3255_v40, %v3211_v19 }
 0x1cb   : > { %9158 = vmatpush3.bf16.msra.mxu0 %v9718_v52  ;;  %9159 = vmatprep.mubr.msk.bf16.mxu0 %vm9515_vm2, %v9513_v1  ;;  %v3306_v32 = vadd.f32 %v10556_v33, %v3259_v5 }
 0x1cc   : > { %v8868_v20 = vpop.f32.mrf.mxu1  ;;  %v8861_v28 = vpop.f32.mrf.mxu0  ;;  %9169 = vmatprep.subr.bf16.mxu0 %v9513_v1  ;;  %v3307_v10 = vadd.f32 %v10569_v26, %v3260_v58 }
 0x1cd   : > { %v3359_v49 = vadd.f32 %v3352_v31, %v3306_v32 }
 0x1ce   : > { %v10598_v17 = vpop.f32.mrf.mxu1  ;;  %9166 = vmatmul.mubr.msk.bf16.vlgmr.msra.gmra.mxu1 %vm241_vm3, %v5856_v12  ;;  %v3355_v16 = vpop.f32.mrf.mxu0 }
 0x1cf   : > { %9176 = vmatpush3.bf16.msra.mxu1 %v9721_v54  ;;  %9177 = vmatprep.mubr.msk.bf16.mxu1 %vm9515_vm2, %v9513_v1  ;;  %v3360_v33 = vadd.f32 %v3355_v16, %v3307_v10  ;;  %v3411_v31 = vadd.f32 %v10578_v38, %v3359_v49  ;;  %v6151_v16 = vrot.slane %v10630_v53, 1 }
 0x1d0   : > { %v8879_v0 = vpop.f32.mrf.mxu1  ;;  %9187 = vmatprep.subr.bf16.mxu1 %v9513_v1  ;;  %v8862_v62 = vpop.f32.mrf.mxu0 }
 0x1d1   : > { %v3412_v38 = vadd.f32 %v10590_v47, %v3360_v33  ;;  %v10660_v47 = vld [vmem:[%s9606_s30 + $0x40] sm:$0xff]   ;;  %v6198_v33 = vrot.slane %v6099_v3, 1 }
 0x1d2   : > { %v10608_v63 = vpop.f32.mrf.mxu1  ;;  %v3451_v60 = vpop.f32.mrf.mxu0  ;;  %9160 = vmatmul.mubr.msk.bf16.vlgmr.msra.gmra.mxu0 %vm241_vm3, %v10561_v22  ;;  %v6353_v49 = vshll.u32 %v10660_v47, 16 }
 0x1d3   : > { %9170 = vmatpush3.bf16.msra.mxu0 %v9740_v59  ;;  %9171 = vmatprep.mubr.msk.bf16.mxu0 %vm9515_vm2, %v9513_v1  ;;  %v3458_v0 = vadd.f32 %v3451_v60, %v3411_v31  ;;  %v6199_v31 = vrot.slane %v6101_v51, 2 }
 0x1d4   : > { %v8880_v55 = vpop.f32.mrf.mxu1  ;;  %v8873_v11 = vpop.f32.mrf.mxu0  ;;  %9181 = vmatprep.subr.bf16.mxu0 %v9513_v1 }
 0x1d5   : > { %v6103_v55 = vrot.slane %v6101_v51, 1  ;;  %v3507_v5 = vadd.f32 %v10598_v17, %v3458_v0 }
 0x1d6   : > { %v10616_v14 = vpop.f32.mrf.mxu1  ;;  %9178 = vmatmul.mubr.msk.bf16.vlgmr.msra.gmra.mxu1 %vm241_vm3, %v5952_v44  ;;  %v3454_v50 = vpop.f32.mrf.mxu0 }
 0x1d7   : > { %9188 = vmatpush3.bf16.msra.mxu1 %v9743_v61  ;;  %9189 = vmatprep.mubr.msk.bf16.mxu1 %vm9515_vm2, %v9513_v1  ;;  %v3459_v22 = vadd.f32 %v3454_v50, %v3412_v38 }
 0x1d8   : > { %v8891_v30 = vpop.f32.mrf.mxu1  ;;  %9199 = vmatprep.subr.bf16.mxu1 %v9513_v1  ;;  %v8874_v56 = vpop.f32.mrf.mxu0 }
 0x1d9   : > { %v6104_v30 = vor.u32 %v6103_v55, %v6099_v3  ;;  %v6247_v56 = vrot.slane %v10630_v53, 2 }
 0x1da   : > { %v10627_v12 = vpop.f32.mrf.mxu1  ;;  %v3547_v20 = vpop.f32.mrf.mxu0  ;;  %9172 = vmatmul.mubr.msk.bf16.vlgmr.msra.gmra.mxu0 %vm241_vm3, %v5903_v35  ;;  %v3508_v35 = vadd.f32 %v10608_v63, %v3459_v22 }
 0x1db   : > { %9182 = vmatpush3.bf16.msra.mxu0 %v9764_v2  ;;  %9183 = vmatprep.mubr.msk.bf16.mxu0 %vm9515_vm2, %v9513_v1  ;;  %v3554_v19 = vadd.f32 %v3547_v20, %v3507_v5 }
 0x1dc   : > { %v8892_v45 = vpop.f32.mrf.mxu1  ;;  %v8885_v40 = vpop.f32.mrf.mxu0  ;;  %9193 = vmatprep.subr.bf16.mxu0 %v9513_v1 }
 0x1dd   : > { %v3607_v20 = vadd.f32 %v10616_v14, %v3554_v19  ;;  %v6351_v14 = vshrl.u32 %v10660_v47, 16 }
 0x1de   : > { %v10637_v28 = vpop.f32.mrf.mxu1  ;;  %9190 = vmatmul.mubr.msk.bf16.vlgmr.msra.gmra.mxu1 %vm241_vm3, %v10630_v53  ;;  %v3550_v26 = vpop.f32.mrf.mxu0  ;;  %v6355_v53 = vrot.slane %v6353_v49, 1 }
 0x1df   : > { %9200 = vmatpush3.bf16.msra.mxu1 %v9768_v4  ;;  %9201 = vmatprep.mubr.msk.bf16.mxu1 %vm9515_vm2, %v9513_v1  ;;  %v3555_v45 = vadd.f32 %v3550_v26, %v3508_v35 }
 0x1e0   : > { %v8903_v42 = vpop.f32.mrf.mxu1  ;;  %9211 = vmatprep.subr.bf16.mxu1 %v9513_v1  ;;  %v8886_v23 = vpop.f32.mrf.mxu0  ;;  %v6356_v3 = vor.u32 %v6355_v53, %v6351_v14 }
 0x1e1   : > { %v3608_v26 = vadd.f32 %v10627_v12, %v3555_v45  ;;  %v6200_v23 = vor.u32 %v6199_v31, %v6198_v33 }
 0x1e2   : > { %v3702_v62 = vpop.f32.mrf.mxu1  ;;  %v3652_v44 = vpop.f32.mrf.mxu0  ;;  %9184 = vmatmul.mubr.msk.bf16.vlgmr.msra.gmra.mxu0 %vm241_vm3, %v5999_v8 }
 0x1e3   : > { %9194 = vmatpush3.bf16.msra.mxu0 %v9788_v13  ;;  %9195 = vmatprep.mubr.msk.bf16.mxu0 %vm9515_vm2, %v9513_v1  ;;  %v3659_v42 = vadd.f32 %v3652_v44, %v3607_v20 }
 0x1e4   : > { %v8904_v36 = vpop.f32.mrf.mxu1  ;;  %v8897_v60 = vpop.f32.mrf.mxu0  ;;  %9205 = vmatprep.subr.bf16.mxu0 %v9513_v1 }
 0x1e5   : > { %v3706_v38 = vadd.f32 %v10637_v28, %v3659_v42  ;;  %v6450_v28 = vrot.slane %v6351_v14, 1 }
 0x1e6   : > { %v3795_v11 = vpop.f32.mrf.mxu1  ;;  %9202 = vmatmul.mubr.msk.bf16.vlgmr.msra.gmra.mxu1 %vm241_vm3, %v6151_v16  ;;  %v3655_v17 = vpop.f32.mrf.mxu0 }
 0x1e7   : > { %9212 = vmatpush3.bf16.msra.mxu1 %v9791_v15  ;;  %9213 = vmatprep.mubr.msk.bf16.mxu1 %vm9515_vm2, %v9513_v1  ;;  %v3660_v16 = vadd.f32 %v3655_v17, %v3608_v26  ;;  %v6451_v17 = vrot.slane %v6353_v49, 2 }
 0x1e8   : > { %v8915_v50 = vpop.f32.mrf.mxu1  ;;  %9223 = vmatprep.subr.bf16.mxu1 %v9513_v1  ;;  %v8898_v58 = vpop.f32.mrf.mxu0 }
 0x1e9   : > { %v3707_v5 = vadd.f32 %v3702_v62, %v3660_v16  ;;  %v10690_v50 = vld [vmem:[%s9606_s30 + $0x28] sm:$0xff]  }
 0x1ea   : > { %v3798_v32 = vpop.f32.mrf.mxu1  ;;  %v3748_v10 = vpop.f32.mrf.mxu0  ;;  %9196 = vmatmul.mubr.msk.bf16.vlgmr.msra.gmra.mxu0 %vm241_vm3, %v6104_v30 }
 0x1eb   : > { %9206 = vmatpush3.bf16.msra.mxu0 %v9813_v24  ;;  %9207 = vmatprep.mubr.msk.bf16.mxu0 %vm9515_vm2, %v9513_v1  ;;  %v3755_v55 = vadd.f32 %v3748_v10, %v3706_v38  ;;  %v6452_v10 = vor.u32 %v6451_v17, %v6450_v28 }
 0x1ec   : > { %v8916_v40 = vpop.f32.mrf.mxu1  ;;  %v8909_v63 = vpop.f32.mrf.mxu0  ;;  %9217 = vmatprep.subr.bf16.mxu0 %v9513_v1 }
 0x1ed   : > { %v3802_v35 = vadd.f32 %v3795_v11, %v3755_v55  ;;  %v6561_v40 = vshll.u32 %v10690_v50, 16 }
 0x1ee   : > { %v3904_v8 = vpop.f32.mrf.mxu1  ;;  %9214 = vmatmul.mubr.msk.bf16.vlgmr.msra.gmra.mxu1 %vm241_vm3, %v6247_v56  ;;  %v3751_v51 = vpop.f32.mrf.mxu0 }
 0x1ef   : > { %9224 = vmatpush3.bf16.msra.mxu1 %v9817_v29  ;;  %9225 = vmatprep.mubr.msk.bf16.mxu1 %vm9515_vm2, %v9513_v1  ;;  %v3756_v30 = vadd.f32 %v3751_v51, %v3707_v5  ;;  %v6563_v53 = vrot.slane %v6561_v40, 1 }
 0x1f0   : > { %v8927_v0 = vpop.f32.mrf.mxu1  ;;  %9235 = vmatprep.subr.bf16.mxu1 %v9513_v1  ;;  %v8910_v44 = vpop.f32.mrf.mxu0 }
 0x1f1   : > { %v3803_v49 = vadd.f32 %v3798_v32, %v3756_v30  ;;  %v6559_v32 = vshrl.u32 %v10690_v50, 16  ;;  %v6403_v0 = vrot.slane %v10660_v47, 1 }
 0x1f2   : > { %v3907_v36 = vpop.f32.mrf.mxu1  ;;  %v3852_v22 = vpop.f32.mrf.mxu0  ;;  %9208 = vmatmul.mubr.msk.bf16.vlgmr.msra.gmra.mxu0 %vm241_vm3, %v6200_v23 }
 0x1f3   : > { %9218 = vmatpush3.bf16.msra.mxu0 %v9837_v39  ;;  %9219 = vmatprep.mubr.msk.bf16.mxu0 %vm9515_vm2, %v9513_v1  ;;  %v3859_v56 = vadd.f32 %v3852_v22, %v3802_v35  ;;  %v6564_v44 = vor.u32 %v6563_v53, %v6559_v32  ;;  %v6499_v35 = vrot.slane %v10660_v47, 2 }
 0x1f4   : > { %v8928_v12 = vpop.f32.mrf.mxu1  ;;  %v8921_v60 = vpop.f32.mrf.mxu0  ;;  %9229 = vmatprep.subr.bf16.mxu0 %v9513_v1 }
 0x1f5   : > { %v3911_v42 = vadd.f32 %v3904_v8, %v3859_v56 }
 0x1f6   : > { %v4000_v19 = vpop.f32.mrf.mxu1  ;;  %9226 = vmatmul.mubr.msk.bf16.vlgmr.msra.gmra.mxu1 %vm241_vm3, %v6356_v3  ;;  %v3855_v62 = vpop.f32.mrf.mxu0 }
 0x1f7   : > { %9236 = vmatpush3.bf16.msra.mxu1 %v9840_v41  ;;  %9237 = vmatprep.mubr.msk.bf16.mxu1 %vm9515_vm2, %v9513_v1  ;;  %v3860_v31 = vadd.f32 %v3855_v62, %v3803_v49 }
 0x1f8   : > { %v8939_v58 = vpop.f32.mrf.mxu1  ;;  %9247 = vmatprep.subr.bf16.mxu1 %v9513_v1  ;;  %v8922_v45 = vpop.f32.mrf.mxu0 }
 0x1f9   : > { %v3912_v23 = vadd.f32 %v3907_v36, %v3860_v31  ;;  %v10727_v36 = vld [vmem:[%s10963_s2] ss:$0 sm:$0xff]  ;;  %v6652_v45 = vrot.slane %v10690_v50, 1 }
 0x1fa   : > { %v4003_v20 = vpop.f32.mrf.mxu1  ;;  %v3951_v33 = vpop.f32.mrf.mxu0  ;;  %9220 = vmatmul.mubr.msk.bf16.vlgmr.msra.gmra.mxu0 %vm241_vm3, %v10660_v47 }
 0x1fb   : > { %9230 = vmatpush3.bf16.msra.mxu0 %v9857_v48  ;;  %9231 = vmatprep.mubr.msk.bf16.mxu0 %vm9515_vm2, %v9513_v1  ;;  %v3958_v26 = vadd.f32 %v3951_v33, %v3911_v42  ;;  %v10752_v33 = vld [vmem:[%s9606_s30 + $0x30] sm:$0xff]  }
 0x1fc   : > { %v8940_v11 = vpop.f32.mrf.mxu1  ;;  %v8933_v63 = vpop.f32.mrf.mxu0  ;;  %9241 = vmatprep.subr.bf16.mxu0 %v9513_v1  ;;  %v6850_v53 = vshll.u32 %v10752_v33, 16 }
 0x1fd   : > { %v4007_v55 = vadd.f32 %v4000_v19, %v3958_v26  ;;  %v6748_v63 = vrot.slane %v10690_v50, 2 }
 0x1fe   : > { %v10702_v14 = vpop.f32.mrf.mxu1  ;;  %9238 = vmatmul.mubr.msk.bf16.vlgmr.msra.gmra.mxu1 %vm241_vm3, %v6452_v10  ;;  %v3954_v8 = vpop.f32.mrf.mxu0 }
 0x1ff   : > { %9248 = vmatpush3.bf16.msra.mxu1 %v9590_v7  ;;  %9249 = vmatprep.mubr.msk.bf16.mxu1 %vm9515_vm2, %v9513_v1  ;;  %v3959_v3 = vadd.f32 %v3954_v8, %v3912_v23 }
 0x200   : > { %v8951_v51 = vpop.f32.mrf.mxu1  ;;  %9259 = vmatprep.subr.bf16.mxu1 %v9513_v1  ;;  %v8934_v16 = vpop.f32.mrf.mxu0 }
 0x201   : > { %v4008_v28 = vadd.f32 %v4003_v20, %v3959_v3  ;;  %v6700_v51 = vrot.slane %v6561_v40, 2  ;;  %v6848_v16 = vshrl.u32 %v10752_v33, 16 }
 0x202   : > { %v10714_v38 = vpop.f32.mrf.mxu1  ;;  %v4047_v22 = vpop.f32.mrf.mxu0  ;;  %9232 = vmatmul.mubr.msk.bf16.vlgmr.msra.gmra.mxu0 %vm241_vm3, %v6403_v0 }
 0x203   : > { %v4054_v12 = vadd.f32 %v4047_v22, %v4007_v55  ;;  %9242 = vmatpush3.bf16.msra.mxu0 %v9875_v57  ;;  %9243 = vmatprep.mubr.msk.bf16.mxu0 %vm9515_vm2, %v9513_v1 }
 0x204   : > { %v8952_v7 = vpop.f32.mrf.mxu1  ;;  %v8945_v5 = vpop.f32.mrf.mxu0  ;;  %9253 = vmatprep.subr.bf16.mxu0 %v9513_v1 }
 0x205   : > { %v4056_v19 = vadd.f32 %v10727_v36, %v4054_v12  ;;  %v6947_v5 = vrot.slane %v6848_v16, 1 }
 0x206   : > { %v10720_v60 = vpop.f32.mrf.mxu1  ;;  %9250 = vmatmul.mubr.msk.bf16.vlgmr.msra.gmra.mxu1 %vm241_vm3, %v6564_v44  ;;  %v4050_v17 = vpop.f32.mrf.mxu0  ;;  %v6852_v44 = vrot.slane %v6850_v53, 1 }
 0x207   : > { %9260 = vmatpush3.bf16.msra.mxu1 %v9624_v18  ;;  %9261 = vmatprep.mubr.msk.bf16.mxu1 %vm9515_vm2, %v9513_v1  ;;  %8062 = vst.msk [vmem:[%s10263_s25 + $0x20] sm:$0xff] %vm1567_vm4, %v4056_v19  ;;  %v4055_v62 = vadd.f32 %v4050_v17, %v4008_v28  ;;  %v6948_v19 = vrot.slane %v6850_v53, 2  ;;  %v10814_v53 = vld [vmem:[%s9606_s30 + $0x38] sm:$0xff]  }
 0x208   : > { %v8963_v30 = vpop.f32.mrf.mxu1  ;;  %9271 = vmatprep.subr.bf16.mxu1 %v9513_v1  ;;  %v8946_v58 = vpop.f32.mrf.mxu0  ;;  %v6853_v55 = vor.u32 %v6852_v44, %v6848_v16 }
 0x209   : > { %v4057_v18 = vadd.f32 %v10727_v36, %v4055_v62 }
 0x20a   : > { %v10737_v56 = vpop.f32.mrf.mxu1  ;;  %v4155_v20 = vpop.f32.mrf.mxu0  ;;  %9244 = vmatmul.mubr.msk.bf16.vlgmr.msra.gmra.mxu0 %vm241_vm3, %v6499_v35  ;;  %v6949_v35 = vor.u32 %v6948_v19, %v6947_v5 }
 0x20b   : > { %8063 = vst.msk [vmem:[%s10263_s25 + $0x28] sm:$0xf] %vm1569_vm5, %v4057_v18  ;;  %9254 = vmatpush3.bf16.msra.mxu0 %v9587_v6  ;;  %9255 = vmatprep.mubr.msk.bf16.mxu0 %vm9515_vm2, %v9513_v1  ;;  %v4156_v62 = vadd.f32 %v4155_v20, %v10702_v14 }
 0x20c   : > { %v8964_v10 = vpop.f32.mrf.mxu1  ;;  %v8957_v47 = vpop.f32.mrf.mxu0  ;;  %9265 = vmatprep.subr.bf16.mxu0 %v9513_v1 }
 0x20d   : > { %v4207_v20 = vadd.f32 %v10720_v60, %v4156_v62  ;;  %v6900_v47 = vrot.slane %v10752_v33, 1 }
 0x20e   : > { %v10747_v49 = vpop.f32.mrf.mxu1  ;;  %9262 = vmatmul.mubr.msk.bf16.vlgmr.msra.gmra.mxu1 %vm241_vm3, %v6652_v45  ;;  %v4158_v11 = vpop.f32.mrf.mxu0 }
 0x20f   : > { %9272 = vmatpush3.bf16.msra.mxu1 %v9646_v25  ;;  %9273 = vmatprep.mubr.msk.bf16.mxu1 %vm9515_vm2, %v9513_v1  ;;  %v6699_v25 = vrot.slane %v6559_v32, 1  ;;  %v4159_v14 = vadd.f32 %v4158_v11, %v10714_v38 }
 0x210   : > { %v8975_v31 = vpop.f32.mrf.mxu1  ;;  %9283 = vmatprep.subr.bf16.mxu1 %v9513_v1  ;;  %v8958_v6 = vpop.f32.mrf.mxu0 }
 0x211   : > { %v6701_v40 = vor.u32 %v6700_v51, %v6699_v25  ;;  %v4208_v38 = vadd.f32 %v10737_v56, %v4159_v14 }
 0x212   : > { %v10758_v42 = vpop.f32.mrf.mxu1  ;;  %v4249_v26 = vpop.f32.mrf.mxu0  ;;  %9256 = vmatmul.mubr.msk.bf16.vlgmr.msra.gmra.mxu0 %vm241_vm3, %v10690_v50 }
 0x213   : > { %9266 = vmatpush3.bf16.msra.mxu0 %v9609_v9  ;;  %9267 = vmatprep.mubr.msk.bf16.mxu0 %vm9515_vm2, %v9513_v1  ;;  %v4256_v31 = vadd.f32 %v4249_v26, %v4207_v20 }
 0x214   : > { %v8976_v8 = vpop.f32.mrf.mxu1  ;;  %v8969_v0 = vpop.f32.mrf.mxu0  ;;  %9277 = vmatprep.subr.bf16.mxu0 %v9513_v1 }
 0x215   : > { %v4303_v8 = vadd.f32 %v10747_v49, %v4256_v31  ;;  %v7098_v0 = vshll.u32 %v10814_v53, 16 }
 0x216   : > { %v10769_v23 = vpop.f32.mrf.mxu1  ;;  %9274 = vmatmul.mubr.msk.bf16.vlgmr.msra.gmra.mxu1 %vm241_vm3, %v6748_v63  ;;  %v4252_v50 = vpop.f32.mrf.mxu0 }
 0x217   : > { %9284 = vmatpush3.bf16.msra.mxu1 %v9669_v34  ;;  %9285 = vmatprep.mubr.msk.bf16.mxu1 %vm9515_vm2, %v9513_v1  ;;  %v4257_v11 = vadd.f32 %v4252_v50, %v4208_v38  ;;  %v7196_v20 = vrot.slane %v7098_v0, 2 }
 0x218   : > { %v8987_v9 = vpop.f32.mrf.mxu1  ;;  %9295 = vmatprep.subr.bf16.mxu1 %v9513_v1  ;;  %v8970_v32 = vpop.f32.mrf.mxu0 }
 0x219   : > { %v4304_v16 = vadd.f32 %v10758_v42, %v4257_v11  ;;  %v7148_v9 = vrot.slane %v10814_v53, 1 }
 0x21a   : > { %v10778_v3 = vpop.f32.mrf.mxu1  ;;  %v4349_v22 = vpop.f32.mrf.mxu0  ;;  %9268 = vmatmul.mubr.msk.bf16.vlgmr.msra.gmra.mxu0 %vm241_vm3, %v6701_v40 }
 0x21b   : > { %9278 = vmatpush3.bf16.msra.mxu0 %v9627_v21  ;;  %9279 = vmatprep.mubr.msk.bf16.mxu0 %vm9515_vm2, %v9513_v1  ;;  %v4356_v56 = vadd.f32 %v4349_v22, %v4303_v8  ;;  %v7100_v22 = vrot.slane %v7098_v0, 1 }
 0x21c   : > { %v8988_v7 = vpop.f32.mrf.mxu1  ;;  %v8981_v34 = vpop.f32.mrf.mxu0  ;;  %9289 = vmatprep.subr.bf16.mxu0 %v9513_v1 }
 0x21d   : > { %v4408_v40 = vadd.f32 %v10769_v23, %v4356_v56  ;;  %v10848_v23 = vld [vmem:[%s9606_s30 + $0x40] sm:$0xff]  }
 0x21e   : > { %v10784_v12 = vpop.f32.mrf.mxu1  ;;  %9286 = vmatmul.mubr.msk.bf16.vlgmr.msra.gmra.mxu1 %vm241_vm3, %v6853_v55  ;;  %v4352_v28 = vpop.f32.mrf.mxu0 }
 0x21f   : > { %9296 = vmatpush3.bf16.msra.mxu1 %v9695_v43  ;;  %9297 = vmatprep.mubr.msk.bf16.mxu1 %vm9515_vm2, %v9513_v1 }
 0x220   : > { %v8999_v17 = vpop.f32.mrf.mxu1  ;;  %9307 = vmatprep.subr.bf16.mxu1 %v9513_v1  ;;  %v8982_v21 = vpop.f32.mrf.mxu0 }
 0x222   : > { %v10792_v30 = vpop.f32.mrf.mxu1  ;;  %v4448_v58 = vpop.f32.mrf.mxu0  ;;  %9280 = vmatmul.mubr.msk.bf16.vlgmr.msra.gmra.mxu0 %vm241_vm3, %v10752_v33 }
 0x223   : > { %9290 = vmatpush3.bf16.msra.mxu0 %v9650_v27  ;;  %9291 = vmatprep.mubr.msk.bf16.mxu0 %vm9515_vm2, %v9513_v1  ;;  %v4455_v7 = vadd.f32 %v4448_v58, %v4408_v40  ;;  %v7244_v58 = vrot.slane %v10814_v53, 2 }
 0x224   : > { %v9000_v45 = vpop.f32.mrf.mxu1  ;;  %v8993_v43 = vpop.f32.mrf.mxu0  ;;  %9301 = vmatprep.subr.bf16.mxu0 %v9513_v1 }
 0x225   : > { %v4504_v21 = vadd.f32 %v10784_v12, %v4455_v7 }
 0x226   : > { %v10800_v18 = vpop.f32.mrf.mxu1  ;;  %9298 = vmatmul.mubr.msk.bf16.vlgmr.msra.gmra.mxu1 %vm241_vm3, %v6949_v35  ;;  %v4451_v27 = vpop.f32.mrf.mxu0 }
 0x227   : > { %9308 = vmatpush3.bf16.msra.mxu1 %v9718_v52  ;;  %9309 = vmatprep.mubr.msk.bf16.mxu1 %vm9515_vm2, %v9513_v1 }
 0x228   : > { %v9011_v10 = vpop.f32.mrf.mxu1  ;;  %9319 = vmatprep.subr.bf16.mxu1 %v9513_v1  ;;  %v8994_v6 = vpop.f32.mrf.mxu0 }
 0x22a   : > { %v10811_v63 = vpop.f32.mrf.mxu1  ;;  %v4544_v60 = vpop.f32.mrf.mxu0  ;;  %9292 = vmatmul.mubr.msk.bf16.vlgmr.msra.gmra.mxu0 %vm241_vm3, %v6900_v47  ;;  %v7344_v47 = vshrl.u32 %v10848_v23, 16 }
 0x22b   : > { %9302 = vmatpush3.bf16.msra.mxu0 %v9675_v37  ;;  %9303 = vmatprep.mubr.msk.bf16.mxu0 %vm9515_vm2, %v9513_v1  ;;  %v6996_v37 = vrot.slane %v10752_v33, 2  ;;  %v7096_v33 = vshrl.u32 %v10814_v53, 16  ;;  %v4551_v45 = vadd.f32 %v4544_v60, %v4504_v21  ;;  %v9470_v21 = vld [vmem:[%s9606_s30 + $0x48] sm:$0xff]  }
 0x22c   : > { %v9012_v52 = vpop.f32.mrf.mxu1  ;;  %v9005_v26 = vpop.f32.mrf.mxu0  ;;  %9313 = vmatprep.subr.bf16.mxu0 %v9513_v1  ;;  %v7443_v0 = vrot.slane %v7344_v47, 1 }
 0x22d   : > { %v7195_v14 = vrot.slane %v7096_v33, 1 }
 0x22e   : > { %v10822_v25 = vpop.f32.mrf.mxu1  ;;  %9310 = vmatmul.mubr.msk.bf16.vlgmr.msra.gmra.mxu1 %vm241_vm3, %v10814_v53  ;;  %v4547_v49 = vpop.f32.mrf.mxu0  ;;  %v4604_v53 = vadd.f32 %v10800_v18, %v4551_v45 }
 0x22f   : > { %9320 = vmatpush3.bf16.msra.mxu1 %v9740_v59  ;;  %9321 = vmatprep.mubr.msk.bf16.mxu1 %vm9515_vm2, %v9513_v1  ;;  %v4357_v59 = vadd.f32 %v4352_v28, %v4304_v16  ;;  %v7101_v28 = vor.u32 %v7100_v22, %v7096_v33  ;;  %v7197_v38 = vor.u32 %v7196_v20, %v7195_v14 }
 0x230   : > { %v9023_v51 = vpop.f32.mrf.mxu1  ;;  %9331 = vmatprep.subr.bf16.mxu1 %v9513_v1  ;;  %v9006_v44 = vpop.f32.mrf.mxu0 }
 0x231   : > { %v4409_v5 = vadd.f32 %v10778_v3, %v4357_v59  ;;  %v7346_v3 = vshll.u32 %v10848_v23, 16 }
 0x232   : > { %v10834_v50 = vpop.f32.mrf.mxu1  ;;  %v4649_v32 = vpop.f32.mrf.mxu0  ;;  %9304 = vmatmul.mubr.msk.bf16.vlgmr.msra.gmra.mxu0 %vm241_vm3, %v6996_v37 }
 0x233   : > { %9314 = vmatpush3.bf16.msra.mxu0 %v9698_v46  ;;  %9315 = vmatprep.mubr.msk.bf16.mxu0 %vm9515_vm2, %v9513_v1  ;;  %v4456_v17 = vadd.f32 %v4451_v27, %v4409_v5  ;;  %v7348_v31 = vrot.slane %v7346_v3, 1  ;;  %v4656_v60 = vadd.f32 %v4649_v32, %v4604_v53 }
 0x234   : > { %v9024_v55 = vpop.f32.mrf.mxu1  ;;  %v9017_v42 = vpop.f32.mrf.mxu0  ;;  %9325 = vmatprep.subr.bf16.mxu0 %v9513_v1 }
 0x235   : > { %v4505_v10 = vadd.f32 %v10792_v30, %v4456_v17  ;;  %v7349_v8 = vor.u32 %v7348_v31, %v7344_v47  ;;  %v7648_v31 = vrot.slane %v9470_v21, 1 }
 0x236   : > { %v10843_v34 = vpop.f32.mrf.mxu1  ;;  %9322 = vmatmul.mubr.msk.bf16.vlgmr.msra.gmra.mxu1 %vm241_vm3, %v7148_v9  ;;  %v4652_v46 = vpop.f32.mrf.mxu0 }
 0x237   : > { %9332 = vmatpush3.bf16.msra.mxu1 %v9764_v2  ;;  %9333 = vmatprep.mubr.msk.bf16.mxu1 %vm9515_vm2, %v9513_v1  ;;  %v4552_v6 = vadd.f32 %v4547_v49, %v4505_v10  ;;  %v7598_v10 = vshll.u32 %v9470_v21, 16 }
 0x238   : > { %v9035_v19 = vpop.f32.mrf.mxu1  ;;  %9343 = vmatprep.subr.bf16.mxu1 %v9513_v1  ;;  %v9018_v35 = vpop.f32.mrf.mxu0 }
 0x239   : > { %v4605_v26 = vadd.f32 %v10811_v63, %v4552_v6  ;;  %v7444_v63 = vrot.slane %v7346_v3, 2 }
 0x23a   : > { %v10856_v62 = vpop.f32.mrf.mxu1  ;;  %v4745_v2 = vpop.f32.mrf.mxu0  ;;  %9316 = vmatmul.mubr.msk.bf16.vlgmr.msra.gmra.mxu0 %vm241_vm3, %v7101_v28 }
 0x23b   : > { %9326 = vmatpush3.bf16.msra.mxu0 %v9721_v54  ;;  %9327 = vmatprep.mubr.msk.bf16.mxu0 %vm9515_vm2, %v9513_v1  ;;  %v4657_v49 = vadd.f32 %v4652_v46, %v4605_v26  ;;  %v7445_v40 = vor.u32 %v7444_v63, %v7443_v0 }
 0x23c   : > { %v9036_v43 = vpop.f32.mrf.mxu1  ;;  %v9029_v12 = vpop.f32.mrf.mxu0  ;;  %9337 = vmatprep.subr.bf16.mxu0 %v9513_v1 }
 0x23e   : > { %v4897_v27 = vpop.f32.mrf.mxu1  ;;  %9334 = vmatmul.mubr.msk.bf16.vlgmr.msra.gmra.mxu1 %vm241_vm3, %v7244_v58  ;;  %v4748_v54 = vpop.f32.mrf.mxu0 }
 0x23f   : > { %9344 = vmatpush3.bf16.msra.mxu1 %v9788_v13  ;;  %9345 = vmatprep.mubr.msk.bf16.mxu1 %vm9515_vm2, %v9513_v1  ;;  %v4703_v13 = vadd.f32 %v10822_v25, %v4656_v60 }
 0x240   : > { %v9047_v30 = vpop.f32.mrf.mxu1  ;;  %9355 = vmatprep.subr.bf16.mxu1 %v9513_v1  ;;  %v9030_v52 = vpop.f32.mrf.mxu0 }
 0x241   : > { %v4752_v16 = vadd.f32 %v4745_v2, %v4703_v13  ;;  %v7600_v30 = vrot.slane %v7598_v10, 1  ;;  %v7744_v13 = vrot.slane %v9470_v21, 2 }
 0x242   : > { %v4900_v11 = vpop.f32.mrf.mxu1  ;;  %v4845_v56 = vpop.f32.mrf.mxu0  ;;  %9328 = vmatmul.mubr.msk.bf16.vlgmr.msra.gmra.mxu0 %vm241_vm3, %v7197_v38 }
 0x243   : > { %9338 = vmatpush3.bf16.msra.mxu0 %v9743_v61  ;;  %9339 = vmatprep.mubr.msk.bf16.mxu0 %vm9515_vm2, %v9513_v1  ;;  %v4704_v61 = vadd.f32 %v10834_v50, %v4657_v49  ;;  %v4799_v55 = vadd.f32 %v10843_v34, %v4752_v16 }
 0x244   : > { %v9048_v18 = vpop.f32.mrf.mxu1  ;;  %v9041_v51 = vpop.f32.mrf.mxu0  ;;  %9349 = vmatprep.subr.bf16.mxu0 %v9513_v1 }
 0x245   : > { %v4753_v32 = vadd.f32 %v4748_v54, %v4704_v61  ;;  %v4852_v22 = vadd.f32 %v4845_v56, %v4799_v55 }
 0x246   : > { %v4993_v37 = vpop.f32.mrf.mxu1  ;;  %9346 = vmatmul.mubr.msk.bf16.vlgmr.msra.gmra.mxu1 %vm241_vm3, %v7349_v8  ;;  %v4848_v25 = vpop.f32.mrf.mxu0 }
 0x247   : > { %9356 = vmatpush3.bf16.msra.mxu1 %v9813_v24  ;;  %9357 = vmatprep.mubr.msk.bf16.mxu1 %vm9515_vm2, %v9513_v1  ;;  %v4800_v42 = vadd.f32 %v10856_v62, %v4753_v32  ;;  %v4904_v19 = vadd.f32 %v4897_v27, %v4852_v22 }
 0x248   : > { %v9059_v44 = vpop.f32.mrf.mxu1  ;;  %9367 = vmatprep.subr.bf16.mxu1 %v9513_v1  ;;  %v9042_v9 = vpop.f32.mrf.mxu0 }
 0x249   : > { %v4853_v46 = vadd.f32 %v4848_v25, %v4800_v42  ;;  %v7696_v25 = vrot.slane %v7598_v10, 2 }
 0x24a   : > { %v4996_v59 = vpop.f32.mrf.mxu1  ;;  %v4944_v33 = vpop.f32.mrf.mxu0  ;;  %9340 = vmatmul.mubr.msk.bf16.vlgmr.msra.gmra.mxu0 %vm241_vm3, %v10848_v23 }
 0x24b   : > { %9350 = vmatpush3.bf16.msra.mxu0 %v9768_v4  ;;  %9351 = vmatprep.mubr.msk.bf16.mxu0 %vm9515_vm2, %v9513_v1  ;;  %v7396_v4 = vrot.slane %v10848_v23, 1  ;;  %v4951_v35 = vadd.f32 %v4944_v33, %v4904_v19 }
 0x24c   : > { %v9060_v24 = vpop.f32.mrf.mxu1  ;;  %v9053_v7 = vpop.f32.mrf.mxu0  ;;  %9361 = vmatprep.subr.bf16.mxu0 %v9513_v1 }
 0x24d   : > { %v5000_v43 = vadd.f32 %v4993_v37, %v4951_v35 }
 0x24e   : > { %v5097_v50 = vpop.f32.mrf.mxu1  ;;  %9358 = vmatmul.mubr.msk.bf16.vlgmr.msra.gmra.mxu1 %vm241_vm3, %v7445_v40  ;;  %v4947_v34 = vpop.f32.mrf.mxu0 }
 0x24f   : > { %9368 = vmatpush3.bf16.msra.mxu1 %v9837_v39  ;;  %9369 = vmatprep.mubr.msk.bf16.mxu1 %vm9515_vm2, %v9513_v1  ;;  %v4905_v39 = vadd.f32 %v4900_v11, %v4853_v46 }
 0x250   : > { %v9071_v5 = vpop.f32.mrf.mxu1  ;;  %9379 = vmatprep.subr.bf16.mxu1 %v9513_v1  ;;  %v9054_v28 = vpop.f32.mrf.mxu0 }
 0x251   : > { %v4952_v2 = vadd.f32 %v4947_v34, %v4905_v39 }
 0x252   : > { %v5100_v17 = vpop.f32.mrf.mxu1  ;;  %v5040_v58 = vpop.f32.mrf.mxu0  ;;  %9352 = vmatmul.mubr.msk.bf16.vlgmr.msra.gmra.mxu0 %vm241_vm3, %v7396_v4 }
 0x253   : > { %9362 = vmatpush3.bf16.msra.mxu0 %v9791_v15  ;;  %9363 = vmatprep.mubr.msk.bf16.mxu0 %vm9515_vm2, %v9513_v1  ;;  %v7492_v15 = vrot.slane %v10848_v23, 2  ;;  %v5047_v12 = vadd.f32 %v5040_v58, %v5000_v43  ;;  %v5001_v6 = vadd.f32 %v4996_v59, %v4952_v2 }
 0x254   : > { %v9072_v62 = vpop.f32.mrf.mxu1  ;;  %v9065_v3 = vpop.f32.mrf.mxu0  ;;  %9373 = vmatprep.subr.bf16.mxu0 %v9513_v1 }
 0x255   : > { %v5104_v60 = vadd.f32 %v5097_v50, %v5047_v12 }
 0x256   : > { %v5196_v45 = vpop.f32.mrf.mxu1  ;;  %9370 = vmatmul.mubr.msk.bf16.vlgmr.msra.gmra.mxu1 %vm241_vm3, %v9470_v21  ;;  %v5043_v14 = vpop.f32.mrf.mxu0 }
 0x257   : > { %9380 = vmatpush3.bf16.msra.mxu1 %v9857_v48  ;;  %9381 = vmatprep.mubr.msk.bf16.mxu1 %vm9515_vm2, %v9513_v1  ;;  %v7596_v48 = vshrl.u32 %v9470_v21, 16  ;;  %v5048_v38 = vadd.f32 %v5043_v14, %v5001_v6 }
 0x258   : > { %v9083_v20 = vpop.f32.mrf.mxu1  ;;  %9391 = vmatprep.subr.bf16.mxu1 %v9513_v1  ;;  %v9066_v27 = vpop.f32.mrf.mxu0 }
 0x259   : > { %v7601_v56 = vor.u32 %v7600_v30, %v7596_v48  ;;  %v5105_v18 = vadd.f32 %v5100_v17, %v5048_v38  ;;  %v7695_v16 = vrot.slane %v7596_v48, 1 }
 0x25a   : > { %v5199_v47 = vpop.f32.mrf.mxu1  ;;  %v5149_v53 = vpop.f32.mrf.mxu0  ;;  %9364 = vmatmul.mubr.msk.bf16.vlgmr.msra.gmra.mxu0 %vm241_vm3, %v7492_v15 }
 0x25b   : > { %9374 = vmatpush3.bf16.msra.mxu0 %v9817_v29  ;;  %9375 = vmatprep.mubr.msk.bf16.mxu0 %vm9515_vm2, %v9513_v1  ;;  %v5156_v11 = vadd.f32 %v5149_v53, %v5104_v60  ;;  %v7697_v55 = vor.u32 %v7696_v25, %v7695_v16 }
 0x25c   : > { %v9084_v54 = vpop.f32.mrf.mxu1  ;;  %v9077_v23 = vpop.f32.mrf.mxu0  ;;  %9385 = vmatprep.subr.bf16.mxu0 %v9513_v1 }
 0x25d   : > { %v5203_v37 = vadd.f32 %v5196_v45, %v5156_v11 }
 0x25e   : > { %v5292_v52 = vpop.f32.mrf.mxu1  ;;  %9382 = vmatmul.mubr.msk.bf16.vlgmr.msra.gmra.mxu1 %vm241_vm3, %v7648_v31  ;;  %v5152_v8 = vpop.f32.mrf.mxu0 }
 0x25f   : > { %9392 = vmatpush3.bf16.msra.mxu1 %v9875_v57  ;;  %9393 = vmatprep.mubr.msk.bf16.mxu1 %vm9515_vm2, %v9513_v1  ;;  %v5157_v51 = vadd.f32 %v5152_v8, %v5105_v18 }
 0x260   : > { %v9095_v26 = vpop.f32.mrf.mxu1  ;;  %v9078_v29 = vpop.f32.mrf.mxu0 }
 0x261   : > { %v5204_v59 = vadd.f32 %v5199_v47, %v5157_v51 }
 0x262   : > { %v5295_v49 = vpop.f32.mrf.mxu1  ;;  %v5245_v0 = vpop.f32.mrf.mxu0  ;;  %9376 = vmatmul.mubr.msk.bf16.vlgmr.msra.gmra.mxu0 %vm241_vm3, %v7601_v56 }
 0x263   : > { %v5252_v57 = vadd.f32 %v5245_v0, %v5203_v37  ;;  %9386 = vmatpush3.bf16.msra.mxu0 %v9840_v41  ;;  %9387 = vmatprep.mubr.msk.bf16.mxu0 %vm9515_vm2, %v9513_v1 }
 0x264   : > { %v9096_v63 = vpop.f32.mrf.mxu1  ;;  %v9089_v44 = vpop.f32.mrf.mxu0 }
 0x265   : > { %v5299_v9 = vadd.f32 %v5292_v52, %v5252_v57 }
 0x266   : > { %v5400_v61 = vpop.f32.mrf.mxu1  ;;  %9394 = vmatmul.mubr.msk.bf16.vlgmr.msra.gmra.mxu1 %vm241_vm3, %v7744_v13  ;;  %v5248_v40 = vpop.f32.mrf.mxu0 }
 0x267   : > { %v5301_v33 = vadd.f32 %v10727_v36, %v5299_v9  ;;  %v5253_v24 = vadd.f32 %v5248_v40, %v5204_v59 }
 0x268   : > { %v9107_v32 = vpop.f32.mrf.mxu1  ;;  %v9090_v22 = vpop.f32.mrf.mxu0 }
 0x269   : > { %8105 = vst.msk [vmem:[%s10263_s25 + $0x30] sm:$0xff] %vm1567_vm4, %v5301_v33  ;;  %v5300_v41 = vadd.f32 %v5295_v49, %v5253_v24 }
 0x26a   : > { %v5403_v7 = vpop.f32.mrf.mxu1  ;;  %v5357_v50 = vpop.f32.mrf.mxu0  ;;  %9388 = vmatmul.mubr.msk.bf16.vlgmr.msra.gmra.mxu0 %vm241_vm3, %v7697_v55 }
 0x26b   : > { %v5302_v42 = vadd.f32 %v10727_v36, %v5300_v41  ;;  %v5401_v30 = vadd.f32 %v5400_v61, %v5357_v50 }
 0x26c   : > { %v9108_v1 = vpop.f32.mrf.mxu1  ;;  %v9101_v34 = vpop.f32.mrf.mxu0 }
 0x26d   : > { %8106 = vst.msk [vmem:[%s10263_s25 + $0x38] sm:$0xf] %vm1569_vm5, %v5302_v42 }
 0x26e   : > { %v5494_v5 = vpop.f32.mrf.mxu1  ;;  %v5360_v4 = vpop.f32.mrf.mxu0 }
 0x26f   : > { %v5404_v8 = vadd.f32 %v5403_v7, %v5360_v4 }
 0x270   : > { %v9119_v46 = vpop.f32.mrf.mxu1  ;;  %v9102_v19 = vpop.f32.mrf.mxu0 }
 0x272   : > { %v5497_v28 = vpop.f32.mrf.mxu1  ;;  %v5445_v17 = vpop.f32.mrf.mxu0 }
 0x273   : > { %v5452_v23 = vadd.f32 %v5445_v17, %v5401_v30 }
 0x274   : > { %v9120_v21 = vpop.f32.mrf.mxu1  ;;  %v9113_v35 = vpop.f32.mrf.mxu0 }
 0x275   : > { %v5501_v29 = vadd.f32 %v5494_v5, %v5452_v23 }
 0x276   : > { %v5594_v58 = vpop.f32.mrf.mxu1  ;;  %v5448_v62 = vpop.f32.mrf.mxu0 }
 0x277   : > { %v5453_v18 = vadd.f32 %v5448_v62, %v5404_v8 }
 0x278   : > { %v9131_v39 = vpop.f32.mrf.mxu1  ;;  %v9114_v3 = vpop.f32.mrf.mxu0 }
 0x279   : > { %v5502_v63 = vadd.f32 %v5497_v28, %v5453_v18 }
 0x27a   : > { %v5597_v45 = vpop.f32.mrf.mxu1  ;;  %v5541_v2 = vpop.f32.mrf.mxu0 }
 0x27b   : > { %v5548_v51 = vadd.f32 %v5541_v2, %v5501_v29 }
 0x27c   : > { %v9132_v43 = vpop.f32.mrf.mxu1  ;;  %v9125_v14 = vpop.f32.mrf.mxu0 }
 0x27d   : > { %v5601_v44 = vadd.f32 %v5594_v58, %v5548_v51 }
 0x27e   : > { %v5693_v20 = vpop.f32.mrf.mxu1  ;;  %v5544_v15 = vpop.f32.mrf.mxu0 }
 0x27f   : > { %v5549_v57 = vadd.f32 %v5544_v15, %v5502_v63 }
 0x280   : > { %v9143_v10 = vpop.f32.mrf.mxu1  ;;  %v9126_v12 = vpop.f32.mrf.mxu0 }
 0x281   : > { %v5602_v55 = vadd.f32 %v5597_v45, %v5549_v57 }
 0x282   : > { %v5696_v27 = vpop.f32.mrf.mxu1  ;;  %v5646_v47 = vpop.f32.mrf.mxu0 }
 0x283   : > { %v5653_v59 = vadd.f32 %v5646_v47, %v5601_v44 }
 0x284   : > { %v9144_v31 = vpop.f32.mrf.mxu1  ;;  %v9137_v6 = vpop.f32.mrf.mxu0 }
 0x285   : > { %v5700_v7 = vadd.f32 %v5693_v20, %v5653_v59 }
 0x286   : > { %v5789_v53 = vpop.f32.mrf.mxu1  ;;  %v5649_v54 = vpop.f32.mrf.mxu0 }
 0x287   : > { %v5654_v22 = vadd.f32 %v5649_v54, %v5602_v55 }
 0x288   : > { %v9155_v48 = vpop.f32.mrf.mxu1  ;;  %v9138_v38 = vpop.f32.mrf.mxu0 }
 0x289   : > { %v5701_v5 = vadd.f32 %v5696_v27, %v5654_v22 }
 0x28a   : > { %v5792_v60 = vpop.f32.mrf.mxu1  ;;  %v5742_v52 = vpop.f32.mrf.mxu0 }
 0x28b   : > { %v5749_v1 = vadd.f32 %v5742_v52, %v5700_v7 }
 0x28c   : > { %v9156_v11 = vpop.f32.mrf.mxu1  ;;  %v9149_v26 = vpop.f32.mrf.mxu0 }
 0x28d   : > { %v5796_v28 = vadd.f32 %v5789_v53, %v5749_v1 }
 0x28e   : > { %v5894_v56 = vpop.f32.mrf.mxu1  ;;  %v5745_v49 = vpop.f32.mrf.mxu0 }
 0x28f   : > { %v5750_v19 = vadd.f32 %v5745_v49, %v5701_v5 }
 0x290   : > { %v9167_v13 = vpop.f32.mrf.mxu1  ;;  %v9150_v37 = vpop.f32.mrf.mxu0 }
 0x291   : > { %v5797_v39 = vadd.f32 %v5792_v60, %v5750_v19 }
 0x292   : > { %v5897_v0 = vpop.f32.mrf.mxu1  ;;  %v5842_v16 = vpop.f32.mrf.mxu0 }
 0x293   : > { %v5849_v35 = vadd.f32 %v5842_v16, %v5796_v28 }
 0x294   : > { %v9168_v25 = vpop.f32.mrf.mxu1  ;;  %v9161_v61 = vpop.f32.mrf.mxu0 }
 0x295   : > { %v5901_v43 = vadd.f32 %v5894_v56, %v5849_v35 }
 0x296   : > { %v5990_v9 = vpop.f32.mrf.mxu1  ;;  %v5845_v40 = vpop.f32.mrf.mxu0 }
 0x297   : > { %v5850_v2 = vadd.f32 %v5845_v40, %v5797_v39 }
 0x298   : > { %v9179_v32 = vpop.f32.mrf.mxu1  ;;  %v9162_v33 = vpop.f32.mrf.mxu0 }
 0x299   : > { %v5902_v27 = vadd.f32 %v5897_v0, %v5850_v2 }
 0x29a   : > { %v5993_v24 = vpop.f32.mrf.mxu1  ;;  %v5941_v41 = vpop.f32.mrf.mxu0 }
 0x29b   : > { %v5948_v15 = vadd.f32 %v5941_v41, %v5901_v43 }
 0x29c   : > { %v9180_v50 = vpop.f32.mrf.mxu1  ;;  %v9173_v42 = vpop.f32.mrf.mxu0 }
 0x29d   : > { %v5997_v53 = vadd.f32 %v5990_v9, %v5948_v15 }
 0x29e   : > { %v6090_v34 = vpop.f32.mrf.mxu1  ;;  %v5944_v4 = vpop.f32.mrf.mxu0 }
 0x29f   : > { %v5949_v6 = vadd.f32 %v5944_v4, %v5902_v27 }
 0x2a0   : > { %v9191_v46 = vpop.f32.mrf.mxu1  ;;  %v9174_v17 = vpop.f32.mrf.mxu0 }
 0x2a1   : > { %v5998_v60 = vadd.f32 %v5993_v24, %v5949_v6 }
 0x2a2   : > { %v6093_v21 = vpop.f32.mrf.mxu1  ;;  %v6037_v58 = vpop.f32.mrf.mxu0 }
 0x2a3   : > { %v6044_v30 = vadd.f32 %v6037_v58, %v5997_v53 }
 0x2a4   : > { %v9192_v62 = vpop.f32.mrf.mxu1  ;;  %v9185_v3 = vpop.f32.mrf.mxu0 }
 0x2a5   : > { %v6097_v26 = vadd.f32 %v6090_v34, %v6044_v30 }
 0x2a6   : > { %v6189_v45 = vpop.f32.mrf.mxu1  ;;  %v6040_v14 = vpop.f32.mrf.mxu0 }
 0x2a7   : > { %v6045_v8 = vadd.f32 %v6040_v14, %v5998_v60 }
 0x2a8   : > { %v9203_v20 = vpop.f32.mrf.mxu1  ;;  %v9186_v10 = vpop.f32.mrf.mxu0 }
 0x2a9   : > { %v6098_v51 = vadd.f32 %v6093_v21, %v6045_v8 }
 0x2aa   : > { %v6192_v12 = vpop.f32.mrf.mxu1  ;;  %v6142_v47 = vpop.f32.mrf.mxu0 }
 0x2ab   : > { %v6149_v29 = vadd.f32 %v6142_v47, %v6097_v26 }
 0x2ac   : > { %v9204_v31 = vpop.f32.mrf.mxu1  ;;  %v9197_v54 = vpop.f32.mrf.mxu0 }
 0x2ad   : > { %v6196_v16 = vadd.f32 %v6189_v45, %v6149_v29 }
 0x2ae   : > { %v6285_v48 = vpop.f32.mrf.mxu1  ;;  %v6145_v38 = vpop.f32.mrf.mxu0 }
 0x2af   : > { %v6150_v63 = vadd.f32 %v6145_v38, %v6098_v51 }
 0x2b0   : > { %v9215_v23 = vpop.f32.mrf.mxu1  ;;  %v9198_v52 = vpop.f32.mrf.mxu0 }
 0x2b1   : > { %v6197_v59 = vadd.f32 %v6192_v12, %v6150_v63 }
 0x2b2   : > { %v6288_v11 = vpop.f32.mrf.mxu1  ;;  %v6238_v56 = vpop.f32.mrf.mxu0 }
 0x2b3   : > { %v6245_v44 = vadd.f32 %v6238_v56, %v6196_v16 }
 0x2b4   : > { %v9216_v18 = vpop.f32.mrf.mxu1  ;;  %v9209_v49 = vpop.f32.mrf.mxu0 }
 0x2b5   : > { %v6292_v33 = vadd.f32 %v6285_v48, %v6245_v44 }
 0x2b6   : > { %v6394_v13 = vpop.f32.mrf.mxu1  ;;  %v6241_v37 = vpop.f32.mrf.mxu0 }
 0x2b7   : > { %v6246_v55 = vadd.f32 %v6241_v37, %v6197_v59 }
 0x2b8   : > { %v9227_v0 = vpop.f32.mrf.mxu1  ;;  %v9210_v25 = vpop.f32.mrf.mxu0 }
 0x2b9   : > { %v6293_v1 = vadd.f32 %v6288_v11, %v6246_v55 }
 0x2ba   : > { %v6397_v57 = vpop.f32.mrf.mxu1  ;;  %v6342_v61 = vpop.f32.mrf.mxu0 }
 0x2bb   : > { %v6349_v7 = vadd.f32 %v6342_v61, %v6292_v33 }
 0x2bc   : > { %v9228_v9 = vpop.f32.mrf.mxu1  ;;  %v9221_v40 = vpop.f32.mrf.mxu0 }
 0x2bd   : > { %v6401_v4 = vadd.f32 %v6394_v13, %v6349_v7 }
 0x2be   : > { %v6490_v32 = vpop.f32.mrf.mxu1  ;;  %v6345_v24 = vpop.f32.mrf.mxu0 }
 0x2bf   : > { %v6350_v5 = vadd.f32 %v6345_v24, %v6293_v1 }
 0x2c0   : > { %v9239_v22 = vpop.f32.mrf.mxu1  ;;  %v9222_v41 = vpop.f32.mrf.mxu0 }
 0x2c1   : > { %v6402_v35 = vadd.f32 %v6397_v57, %v6350_v5 }
 0x2c2   : > { %v6493_v50 = vpop.f32.mrf.mxu1  ;;  %v6441_v42 = vpop.f32.mrf.mxu0 }
 0x2c3   : > { %v6448_v28 = vadd.f32 %v6441_v42, %v6401_v4 }
 0x2c4   : > { %v9240_v34 = vpop.f32.mrf.mxu1  ;;  %v9233_v46 = vpop.f32.mrf.mxu0 }
 0x2c5   : > { %v6497_v3 = vadd.f32 %v6490_v32, %v6448_v28 }
 0x2c6   : > { %v6602_v19 = vpop.f32.mrf.mxu1  ;;  %v6444_v17 = vpop.f32.mrf.mxu0 }
 0x2c7   : > { %v6449_v39 = vadd.f32 %v6444_v17, %v6402_v35 }
 0x2c8   : > { %v9251_v21 = vpop.f32.mrf.mxu1  ;;  %v9234_v58 = vpop.f32.mrf.mxu0 }
 0x2c9   : > { %v6498_v10 = vadd.f32 %v6493_v50, %v6449_v39 }
 0x2ca   : > { %v6605_v62 = vpop.f32.mrf.mxu1  ;;  %v6537_v45 = vpop.f32.mrf.mxu0 }
 0x2cb   : > { %v6544_v43 = vadd.f32 %v6537_v45, %v6497_v3 }
 0x2cc   : > { %v9252_v2 = vpop.f32.mrf.mxu1  ;;  %v9245_v14 = vpop.f32.mrf.mxu0 }
 0x2cd   : > { %v6546_v15 = vadd.f32 %v10727_v36, %v6544_v43 }
 0x2ce   : > { %v6690_v20 = vpop.f32.mrf.mxu1  ;;  %v6540_v12 = vpop.f32.mrf.mxu0 }
 0x2cf   : > { %8148 = vst.msk [vmem:[%s10263_s25 + $0x40] sm:$0xff] %vm1567_vm4, %v6546_v15  ;;  %v6545_v47 = vadd.f32 %v6540_v12, %v6498_v10 }
 0x2d0   : > { %v9263_v27 = vpop.f32.mrf.mxu1  ;;  %v9246_v31 = vpop.f32.mrf.mxu0 }
 0x2d1   : > { %v6547_v53 = vadd.f32 %v10727_v36, %v6545_v47 }
 0x2d2   : > { %v6693_v6 = vpop.f32.mrf.mxu1  ;;  %v6645_v54 = vpop.f32.mrf.mxu0 }
 0x2d3   : > { %8149 = vst.msk [vmem:[%s10263_s25 + $0x48] sm:$0xf] %vm1569_vm5, %v6547_v53  ;;  %v6646_v61 = vadd.f32 %v6645_v54, %v6602_v19 }
 0x2d4   : > { %v9264_v48 = vpop.f32.mrf.mxu1  ;;  %v9257_v30 = vpop.f32.mrf.mxu0 }
 0x2d5   : > { %v6697_v33 = vadd.f32 %v6690_v20, %v6646_v61 }
 0x2d6   : > { %v6786_v38 = vpop.f32.mrf.mxu1  ;;  %v6648_v23 = vpop.f32.mrf.mxu0 }
 0x2d7   : > { %v6649_v55 = vadd.f32 %v6648_v23, %v6605_v62 }
 0x2d8   : > { %v9275_v60 = vpop.f32.mrf.mxu1  ;;  %v9258_v52 = vpop.f32.mrf.mxu0 }
 0x2d9   : > { %v6698_v1 = vadd.f32 %v6693_v6, %v6649_v55 }
 0x2da   : > { %v6789_v11 = vpop.f32.mrf.mxu1  ;;  %v6739_v8 = vpop.f32.mrf.mxu0 }
 0x2db   : > { %v6746_v7 = vadd.f32 %v6739_v8, %v6697_v33 }
 0x2dc   : > { %v9276_v26 = vpop.f32.mrf.mxu1  ;;  %v9269_v56 = vpop.f32.mrf.mxu0 }
 0x2dd   : > { %v6793_v4 = vadd.f32 %v6786_v38, %v6746_v7 }
 0x2de   : > { %v6891_v18 = vpop.f32.mrf.mxu1  ;;  %v6742_v29 = vpop.f32.mrf.mxu0 }
 0x2df   : > { %v6747_v5 = vadd.f32 %v6742_v29, %v6698_v1 }
 0x2e0   : > { %v9287_v49 = vpop.f32.mrf.mxu1  ;;  %v9270_v13 = vpop.f32.mrf.mxu0 }
 0x2e1   : > { %v6794_v35 = vadd.f32 %v6789_v11, %v6747_v5 }
 0x2e2   : > { %v6894_v51 = vpop.f32.mrf.mxu1  ;;  %v6839_v37 = vpop.f32.mrf.mxu0 }
 0x2e3   : > { %v6846_v17 = vadd.f32 %v6839_v37, %v6793_v4 }
 0x2e4   : > { %v9288_v36 = vpop.f32.mrf.mxu1  ;;  %v9281_v0 = vpop.f32.mrf.mxu0 }
 0x2e5   : > { %v6898_v3 = vadd.f32 %v6891_v18, %v6846_v17 }
 0x2e6   : > { %v6987_v63 = vpop.f32.mrf.mxu1  ;;  %v6842_v16 = vpop.f32.mrf.mxu0 }
 0x2e7   : > { %v6847_v62 = vadd.f32 %v6842_v16, %v6794_v35 }
 0x2e8   : > { %v9299_v25 = vpop.f32.mrf.mxu1  ;;  %v9282_v57 = vpop.f32.mrf.mxu0 }
 0x2e9   : > { %v6899_v15 = vadd.f32 %v6894_v51, %v6847_v62 }
 0x2ea   : > { %v6990_v44 = vpop.f32.mrf.mxu1  ;;  %v6938_v9 = vpop.f32.mrf.mxu0 }
 0x2eb   : > { %v6945_v43 = vadd.f32 %v6938_v9, %v6898_v3 }
 0x2ec   : > { %v9300_v59 = vpop.f32.mrf.mxu1  ;;  %v9293_v40 = vpop.f32.mrf.mxu0 }
 0x2ed   : > { %v6994_v47 = vadd.f32 %v6987_v63, %v6945_v43 }
 0x2ee   : > { %v7087_v32 = vpop.f32.mrf.mxu1  ;;  %v6941_v24 = vpop.f32.mrf.mxu0 }
 0x2ef   : > { %v6946_v27 = vadd.f32 %v6941_v24, %v6899_v15 }
 0x2f0   : > { %v9311_v22 = vpop.f32.mrf.mxu1  ;;  %v9294_v41 = vpop.f32.mrf.mxu0 }
 0x2f1   : > { %v6995_v30 = vadd.f32 %v6990_v44, %v6946_v27 }
 0x2f2   : > { %v7090_v50 = vpop.f32.mrf.mxu1  ;;  %v7034_v42 = vpop.f32.mrf.mxu0 }
 0x2f3   : > { %v7041_v53 = vadd.f32 %v7034_v42, %v6994_v47 }
 0x2f4   : > { %v9312_v34 = vpop.f32.mrf.mxu1  ;;  %v9305_v46 = vpop.f32.mrf.mxu0 }
 0x2f5   : > { %v7094_v52 = vadd.f32 %v7087_v32, %v7041_v53 }
 0x2f6   : > { %v7186_v28 = vpop.f32.mrf.mxu1  ;;  %v7037_v19 = vpop.f32.mrf.mxu0 }
 0x2f7   : > { %v7042_v60 = vadd.f32 %v7037_v19, %v6995_v30 }
 0x2f8   : > { %v9323_v21 = vpop.f32.mrf.mxu1  ;;  %v9306_v58 = vpop.f32.mrf.mxu0 }
 0x2f9   : > { %v7095_v29 = vadd.f32 %v7090_v50, %v7042_v60 }
 0x2fa   : > { %v7189_v39 = vpop.f32.mrf.mxu1  ;;  %v7139_v45 = vpop.f32.mrf.mxu0 }
 0x2fb   : > { %v7146_v26 = vadd.f32 %v7139_v45, %v7094_v52 }
 0x2fc   : > { %v9324_v2 = vpop.f32.mrf.mxu1  ;;  %v9317_v14 = vpop.f32.mrf.mxu0 }
 0x2fd   : > { %v7193_v37 = vadd.f32 %v7186_v28, %v7146_v26 }
 0x2fe   : > { %v7282_v20 = vpop.f32.mrf.mxu1  ;;  %v7142_v10 = vpop.f32.mrf.mxu0 }
 0x2ff   : > { %v7147_v51 = vadd.f32 %v7142_v10, %v7095_v29 }
 0x300   : > { %v9335_v12 = vpop.f32.mrf.mxu1  ;;  %v9318_v31 = vpop.f32.mrf.mxu0 }
 0x301   : > { %v7194_v57 = vadd.f32 %v7189_v39, %v7147_v51 }
 0x302   : > { %v7285_v6 = vpop.f32.mrf.mxu1  ;;  %v7235_v54 = vpop.f32.mrf.mxu0 }
 0x303   : > { %v7242_v63 = vadd.f32 %v7235_v54, %v7193_v37 }
 0x304   : > { %v9336_v48 = vpop.f32.mrf.mxu1  ;;  %v9329_v38 = vpop.f32.mrf.mxu0 }
 0x305   : > { %v7289_v59 = vadd.f32 %v7282_v20, %v7242_v63 }
 0x306   : > { %v7387_v23 = vpop.f32.mrf.mxu1  ;;  %v7238_v11 = vpop.f32.mrf.mxu0 }
 0x307   : > { %v7243_v9 = vadd.f32 %v7238_v11, %v7194_v57 }
 0x308   : > { %v9347_v8 = vpop.f32.mrf.mxu1  ;;  %v9330_v56 = vpop.f32.mrf.mxu0 }
 0x309   : > { %v7290_v22 = vadd.f32 %v7285_v6, %v7243_v9  ;;  %v9472_v56 = vld [vmem:[%s10963_s2] ss:$0 sm:$0xff] }
 0x30a   : > { %v7390_v18 = vpop.f32.mrf.mxu1  ;;  %v7335_v49 = vpop.f32.mrf.mxu0 }
 0x30b   : > { %v7342_v55 = vadd.f32 %v7335_v49, %v7289_v59 }
 0x30c   : > { %v9348_v13 = vpop.f32.mrf.mxu1  ;;  %v9341_v36 = vpop.f32.mrf.mxu0 }
 0x30d   : > { %v7394_v1 = vadd.f32 %v7387_v23, %v7342_v55 }
 0x30e   : > { %v7483_v0 = vpop.f32.mrf.mxu1  ;;  %v7338_v16 = vpop.f32.mrf.mxu0 }
 0x30f   : > { %v7343_v50 = vadd.f32 %v7338_v16, %v7290_v22 }
 0x310   : > { %v9359_v25 = vpop.f32.mrf.mxu1  ;;  %v9342_v44 = vpop.f32.mrf.mxu0 }
 0x311   : > { %v7395_v28 = vadd.f32 %v7390_v18, %v7343_v50 }
 0x312   : > { %v7486_v61 = vpop.f32.mrf.mxu1  ;;  %v7434_v40 = vpop.f32.mrf.mxu0 }
 0x313   : > { %v7441_v5 = vadd.f32 %v7434_v40, %v7394_v1 }
 0x314   : > { %v9360_v32 = vpop.f32.mrf.mxu1  ;;  %v9353_v33 = vpop.f32.mrf.mxu0 }
 0x315   : > { %v7490_v35 = vadd.f32 %v7483_v0, %v7441_v5 }
 0x316   : > { %v7587_v24 = vpop.f32.mrf.mxu1  ;;  %v7437_v7 = vpop.f32.mrf.mxu0 }
 0x317   : > { %v7442_v21 = vadd.f32 %v7437_v7, %v7395_v28 }
 0x318   : > { %v9371_v41 = vpop.f32.mrf.mxu1  ;;  %v9354_v42 = vpop.f32.mrf.mxu0 }
 0x319   : > { %v7491_v2 = vadd.f32 %v7486_v61, %v7442_v21 }
 0x31a   : > { %v7590_v34 = vpop.f32.mrf.mxu1  ;;  %v7530_v4 = vpop.f32.mrf.mxu0 }
 0x31b   : > { %v7537_v62 = vadd.f32 %v7530_v4, %v7490_v35 }
 0x31c   : > { %v9372_v46 = vpop.f32.mrf.mxu1  ;;  %v9365_v17 = vpop.f32.mrf.mxu0 }
 0x31d   : > { %v7594_v15 = vadd.f32 %v7587_v24, %v7537_v62 }
 0x31e   : > { %v7686_v19 = vpop.f32.mrf.mxu1  ;;  %v7533_v58 = vpop.f32.mrf.mxu0 }
 0x31f   : > { %v7538_v20 = vadd.f32 %v7533_v58, %v7491_v2 }
 0x320   : > { %v9383_v39 = vpop.f32.mrf.mxu1  ;;  %v9366_v3 = vpop.f32.mrf.mxu0 }
 0x321   : > { %v7595_v6 = vadd.f32 %v7590_v34, %v7538_v20 }
 0x322   : > { %v7689_v45 = vpop.f32.mrf.mxu1  ;;  %v7639_v43 = vpop.f32.mrf.mxu0 }
 0x323   : > { %v7646_v27 = vadd.f32 %v7639_v43, %v7594_v15 }
 0x324   : > { %v9384_v14 = vpop.f32.mrf.mxu1  ;;  %v9377_v10 = vpop.f32.mrf.mxu0 }
 0x325   : > { %v7693_v30 = vadd.f32 %v7686_v19, %v7646_v27 }
 0x326   : > { %v7782_v12 = vpop.f32.mrf.mxu1  ;;  %v7642_v47 = vpop.f32.mrf.mxu0 }
 0x327   : > { %v7647_v48 = vadd.f32 %v7642_v47, %v7595_v6 }
 0x328   : > { %v9395_v31 = vpop.f32.mrf.mxu1  ;;  %v9378_v53 = vpop.f32.mrf.mxu0 }
 0x329   : > { %v7694_v8 = vadd.f32 %v7689_v45, %v7647_v48 }
 0x32a   : > { %v7785_v54 = vpop.f32.mrf.mxu1  ;;  %v7735_v38 = vpop.f32.mrf.mxu0 }
 0x32b   : > { %v7742_v60 = vadd.f32 %v7735_v38, %v7693_v30 }
 0x32c   : > { %v9396_v23 = vpop.f32.mrf.mxu1  ;;  %v9389_v52 = vpop.f32.mrf.mxu0 }
 0x32d   : > { %v7789_v11 = vadd.f32 %v7782_v12, %v7742_v60 }
 0x32e   : > { %v7738_v26 = vpop.f32.mrf.mxu0 }
 0x32f   : > { %v7791_v18 = vadd.f32 %v9472_v56, %v7789_v11  ;;  %v7743_v29 = vadd.f32 %v7738_v26, %v7694_v8 }
 0x330   : > { %v9390_v49 = vpop.f32.mrf.mxu0 }
 0x331   : > { %8191 = vst.msk [vmem:[%s10263_s25 + $0x50] sm:$0xff] %vm1567_vm4, %v7791_v18  ;;  %v7790_v13 = vadd.f32 %v7785_v54, %v7743_v29 }
 0x333   : > { %v7792_v51 = vadd.f32 %v9472_v56, %v7790_v13 }
 0x335   : > { %8192 = vst.msk [vmem:[%s10263_s25 + $0x58] sm:$0xf] %vm1569_vm5, %v7792_v51 }
 0x336 PF: > { %s13_s16 = sadd.s32 1, %s9511_s16   ;;  %s10966_s12 = smov %s9503_s14 }
 0x337   : > { %p10_p7 = scmp.ge.s32.totalorder %s13_s16, 6   ;;  %s10967_s13 = smov %s9507_s15 }
 0x338   : > { %s10968_s14 = smov %s10971_s17  ;;  %s10969_s15 = smov %s10975_s18 }
 0x339   :  { %12 = sbr.rel (!%p10_p7) target bundleno = 3 (0x3), region = 77 }

</bundles_post_ra>
